<compile_context>
chip_gen: v6e
topology: v6e:2x2x1
jax: 0.10.0
libtpu: 0.0.40
codegen_flags: <defaults>
</compile_context>

<pallas_src>
import numpy as np

import jax
import jax.numpy as jnp
from jax import lax
from jax.experimental import pallas as pl
from jax.experimental.pallas import tpu as pltpu


def _round_up(n, m):
    return ((n + m - 1) // m) * m


def _pick_row_tile(H, W, target):
    """Largest divisor of H <= target whose wide tile (TH*(W+2)) is 8-aligned."""
    RS = W + 2
    target = max(1, min(target, H))
    for th in range(target, 0, -1):
        if H % th == 0 and (th * RS) % 8 == 0:
            return th
    return H  # full-height tile is always legal (full-dim block exemption)


def _vmem_limit_bytes():
    try:
        cap = pltpu.get_tpu_info().vmem_capacity_bytes
    except Exception:
        cap = 64 * 1024 * 1024
    return int(min(100 * 1024 * 1024, (cap * 3) // 4))


def prepare_params(params, lane=128):
    """Pad channel dims to the 128-lane boundary and cast weights to bf16.

    Call once at init (hoisted out of the hot path per the review; for real
    128-multiple channel counts the pads constant-fold to no-ops).
    """
    Cin, width = params["w1"].shape
    Cout = params["w3"].shape[1]
    Cin_p = _round_up(Cin, lane)
    Wd_p = _round_up(width, lane)
    Cout_p = _round_up(Cout, lane)

    def pad_to(a, shape):
        pads = [(0, s - d) for d, s in zip(a.shape, shape)]
        return jnp.pad(a, pads)

    return dict(
        w1=pad_to(params["w1"], (Cin_p, Wd_p)).astype(jnp.bfloat16),
        w2=pad_to(params["w2"], (3, 3, Wd_p, Wd_p)).astype(jnp.bfloat16),
        w3=pad_to(params["w3"], (Wd_p, Cout_p)).astype(jnp.bfloat16),
        s1=pad_to(params["s1"], (1, Wd_p)).astype(jnp.float32),
        b1=pad_to(params["b1"], (1, Wd_p)).astype(jnp.float32),
        s2=pad_to(params["s2"], (1, Wd_p)).astype(jnp.float32),
        b2=pad_to(params["b2"], (1, Wd_p)).astype(jnp.float32),
        s3=pad_to(params["s3"], (1, Cout_p)).astype(jnp.float32),
        b3=pad_to(params["b3"], (1, Cout_p)).astype(jnp.float32),
        dims=(Cin, width, Cout, Cin_p, Wd_p, Cout_p),
    )


def bottleneck_forward(x, prepped, *, row_tile=8):
    """x: (N, H, W, Cin) NHWC float.  prepped: output of prepare_params.

    For real ResNet stages sweep row_tile per generation: ~28-56 on v5e/v6e,
    ~14-28 on v7x (keep >=2 row tiles so both v7x TensorCores get work).
    """
    N, H, W, Cin = x.shape
    Cin_u, width, Cout, Cin_p, Wd_p, Cout_p = prepped["dims"]
    assert Cin == Cin_u
    assert Cin == Cout, "identity residual needs inplanes == planes * expansion"

    RS = W + 2                      # wide row stride (3x3 spatial padding cols)
    TH = _pick_row_tile(H, W, row_tile)
    T = H // TH
    M = TH * RS                     # wide spatial rows per tile
    BASE = (-RS) % 8                # leading pad so the interior store starts
    if BASE == 0:                   # on an 8-sublane boundary (and BASE >= 1
        BASE = 8                    # for the dx-1 tap shift)
    S_rows = _round_up(BASE + (TH + 2) * RS + 1, 8)

    # x -> bf16, +1 zero column on each side (the 3x3 spatial padding), channel
    # pad to the lane boundary.  Single fused pad+cast pass in XLA.
    xw4 = jnp.pad(x.astype(jnp.bfloat16),
                  ((0, 0), (0, 0), (1, 1), (0, Cin_p - Cin)))
    xw_flat = xw4.reshape(N, H * RS, Cin_p)   # free reshape (contiguous merge)

    # Per-wide-row validity mask: zero for the 2 pad columns of each row.
    col = np.tile(np.arange(RS), TH)
    mask_np = ((col >= 1) & (col <= W)).astype(np.float32).reshape(M, 1)
    mask = jnp.asarray(mask_np)

    def kernel(mask_ref, xt_ref, xtop_ref, xbot_ref,
               w1_ref, s1_ref, b1_ref,
               w2_ref, s2_ref, b2_ref,
               w3_ref, s3_ref, b3_ref,
               o_ref, h1p_ref, acc_ref):
        t = pl.program_id(1)
        r0 = t * TH

        mask_m = mask_ref[...]                          # (M, 1) f32
        w1 = w1_ref[...]
        s1 = s1_ref[...]
        b1 = b1_ref[...]

        # ---- conv1 (1x1) + bn1 + relu, directly in the wide layout --------
        xt = xt_ref[0]                                  # (M, Cin_p) bf16
        h1 = jnp.dot(xt, w1, preferred_element_type=jnp.float32)
        h1 = jnp.maximum(h1 * s1 + b1, 0.0) * mask_m
        # one contiguous, sublane-aligned store covering padded rows 1..TH
        # (data columns AND the zero pad columns -> no separate zero fill)
        h1p_ref[BASE + RS:BASE + RS + M, :] = h1.astype(jnp.bfloat16)

        # ---- conv1 for the two halo rows (zeroed at the image border) -----
        def halo(src_ref, dst_off, valid):
            xr = src_ref[0, 0]                          # (RS, Cin_p) bf16
            hr = jnp.dot(xr, w1, preferred_element_type=jnp.float32)
            hr = jnp.maximum(hr * s1 + b1, 0.0) * mask_m[0:RS, :]
            hr = hr * valid.astype(jnp.float32)
            h1p_ref[dst_off:dst_off + RS, :] = hr.astype(jnp.bfloat16)

        halo(xtop_ref, BASE, r0 > 0)
        halo(xbot_ref, BASE + (TH + 1) * RS, r0 + TH < H)

        # ---- conv2 (3x3, pad=1) + bn2 + relu -------------------------------
        # Every tap is a contiguous static slice of the flat scratch; the -1
        # shift makes the valid output columns line up with the x layout so
        # the residual add needs no reshuffle.  Junk pad columns are dropped
        # at the final store.
        def tap(dy, dx):
            s = BASE + dy * RS + dx - 1
            return jnp.dot(h1p_ref[s:s + M, :], w2_ref[dy, dx],
                           preferred_element_type=jnp.float32)

        for dy in range(3):
            part = tap(dy, 0) + tap(dy, 1) + tap(dy, 2)
            if dy == 0:
                acc_ref[0:M, :] = part
            else:
                acc_ref[0:M, :] += part

        h2 = jnp.maximum(acc_ref[0:M, :] * s2_ref[...] + b2_ref[...], 0.0)

        # ---- conv3 (1x1) + bn3 + identity residual + relu ------------------
        h3 = jnp.dot(h2.astype(jnp.bfloat16), w3_ref[...],
                     preferred_element_type=jnp.float32)
        h3 = h3 * s3_ref[...] + b3_ref[...]
        out = jnp.maximum(h3 + xt.astype(jnp.float32), 0.0)
        out = out.astype(o_ref.dtype).reshape(TH, RS, Cout_p)
        o_ref[0] = out[:, 1:W + 1, :]                   # drop the pad columns

    def full(shape):
        nd = len(shape)
        return pl.BlockSpec(shape, lambda n, t: (0,) * nd)

    out = pl.pallas_call(
        kernel,
        out_shape=jax.ShapeDtypeStruct((N, H, W, Cout_p), jnp.bfloat16),
        grid_spec=pltpu.PrefetchScalarGridSpec(
            num_scalar_prefetch=0,
            grid=(N, T),
            in_specs=[
                # column-validity mask, resident
                full((M, 1)),
                # x row-tile in the flat wide layout (no in-kernel relayout)
                pl.BlockSpec((1, M, Cin_p), lambda n, t: (n, t, 0)),
                # 1-row halo blocks; index maps clamp at the image border
                pl.BlockSpec((1, 1, RS, Cin_p),
                             lambda n, t: (n, jnp.maximum(t * TH - 1, 0), 0, 0)),
                pl.BlockSpec((1, 1, RS, Cin_p),
                             lambda n, t: (n, jnp.minimum(t * TH + TH, H - 1), 0, 0)),
                full((Cin_p, Wd_p)),
                full((1, Wd_p)), full((1, Wd_p)),
                full((3, 3, Wd_p, Wd_p)),
                full((1, Wd_p)), full((1, Wd_p)),
                full((Wd_p, Cout_p)),
                full((1, Cout_p)), full((1, Cout_p)),
            ],
            out_specs=pl.BlockSpec((1, TH, W, Cout_p),
                                   lambda n, t: (n, t, 0, 0)),
            scratch_shapes=[
                pltpu.VMEM((S_rows, Wd_p), jnp.bfloat16),          # padded h1
                pltpu.VMEM((_round_up(M, 8), Wd_p), jnp.float32),  # conv2 acc
            ],
        ),
        compiler_params=pltpu.CompilerParams(
            # batch x row-tile both parallel -> shards across v7x's 2 TCs.
            dimension_semantics=("parallel", "parallel"),
            # ~96 MiB on v5e/v6e (128 MiB physical), 48 MiB on v7x (64 MiB).
            vmem_limit_bytes=_vmem_limit_bytes(),
        ),
    )(mask, xw_flat, xw4, xw4,
      prepped["w1"], prepped["s1"], prepped["b1"],
      prepped["w2"], prepped["s2"], prepped["b2"],
      prepped["w3"], prepped["s3"], prepped["b3"])

    # No-op for real 128-multiple channel stages.
    return out[..., :Cout]


def fold_bn(gamma, beta, mean, var, eps=1e-5):
    scale = gamma / jnp.sqrt(var + eps)
    bias = beta - mean * scale
    return scale.reshape(1, -1), bias.reshape(1, -1)


def make_params(key, inplanes, planes, base_width=64, groups=1):
    """Deterministic synthetic parameters matching PyTorch Bottleneck shapes."""
    expansion = 4
    width = int(planes * (base_width / 64.0)) * groups
    cout = planes * expansion
    ks = jax.random.split(key, 15)

    # PyTorch conv weight layouts: (out, in, kh, kw); convert to our layouts.
    w1_t = 0.1 * jax.random.normal(ks[0], (width, inplanes, 1, 1), jnp.float32)
    w2_t = 0.1 * jax.random.normal(ks[1], (width, width, 3, 3), jnp.float32)
    w3_t = 0.1 * jax.random.normal(ks[2], (cout, width, 1, 1), jnp.float32)

    w1 = w1_t[:, :, 0, 0].T                       # (Cin, width)
    w2 = jnp.transpose(w2_t, (2, 3, 1, 0))        # (kh, kw, Cin, Cout)
    w3 = w3_t[:, :, 0, 0].T                       # (width, Cout)

    def bn(kg, kb, km, kv, c):
        gamma = 1.0 + 0.1 * jax.random.normal(kg, (c,), jnp.float32)
        beta = 0.1 * jax.random.normal(kb, (c,), jnp.float32)
        mean = 0.1 * jax.random.normal(km, (c,), jnp.float32)
        var = jnp.abs(jax.random.normal(kv, (c,), jnp.float32)) + 0.5
        return fold_bn(gamma, beta, mean, var)

    s1, b1 = bn(ks[3], ks[4], ks[5], ks[6], width)
    s2, b2 = bn(ks[7], ks[8], ks[9], ks[10], width)
    s3, b3 = bn(ks[11], ks[12], ks[13], ks[14], cout)

    return dict(w1=w1, s1=s1, b1=b1,
                w2=w2, s2=s2, b2=b2,
                w3=w3, s3=s3, b3=b3)


def bottleneck_reference(x, p):
    """Pure-JAX f32 NHWC reference for verification."""
    h = jnp.einsum("nhwc,cd->nhwd", x, p["w1"])
    h = jnp.maximum(h * p["s1"][0] + p["b1"][0], 0.0)
    h = lax.conv_general_dilated(
        h, p["w2"], window_strides=(1, 1), padding=((1, 1), (1, 1)),
        dimension_numbers=("NHWC", "HWIO", "NHWC"))
    h = jnp.maximum(h * p["s2"][0] + p["b2"][0], 0.0)
    h = jnp.einsum("nhwc,cd->nhwd", h, p["w3"])
    h = h * p["s3"][0] + p["b3"][0]
    return jnp.maximum(h + x, 0.0)


if __name__ == "__main__":
    key = jax.random.PRNGKey(0)
    k_x, k_p = jax.random.split(key)

    # inplanes = planes * expansion so the identity residual is valid
    # (downsample=None, stride=1 in the PyTorch module's forward).
    N, H, W = 2, 16, 16
    planes = 4
    inplanes = planes * 4          # 16

    x_nchw = jax.random.normal(k_x, (N, inplanes, H, W), jnp.float32)
    x = jnp.transpose(x_nchw, (0, 2, 3, 1))       # NCHW -> NHWC

    params = make_params(k_p, inplanes, planes)
    prepped = prepare_params(params)              # one-time weight prep

    out = bottleneck_forward(x, prepped, row_tile=8)   # 2 row tiles -> halo path exercised
    out = jax.block_until_ready(out)

    ref = bottleneck_reference(x, params)
    assert out.shape == (N, H, W, planes * 4)
    out_f32 = out.astype(jnp.float32)
    max_err = float(jnp.max(jnp.abs(out_f32 - ref)))
    # bf16 x / weights / output with f32 accumulation vs an all-f32 reference.
    assert jnp.allclose(out_f32, ref, atol=3e-2, rtol=3e-2), (
        f"mismatch vs reference (max abs err {max_err})")

    print("KERNEL_OK")
</pallas_src>

<mosaic_0001>
module attributes {stable_mosaic.version = 11 : i64} {
  func.func @kernel(%arg0: i32, %arg1: i32, %arg2: memref<144x1xf32, #tpu.memory_space<vmem>>, %arg3: memref<1x144x128xbf16, #tpu.memory_space<vmem>>, %arg4: memref<1x1x18x128xbf16, #tpu.memory_space<vmem>>, %arg5: memref<1x1x18x128xbf16, #tpu.memory_space<vmem>>, %arg6: memref<128x128xbf16, #tpu.memory_space<vmem>>, %arg7: memref<1x128xf32, #tpu.memory_space<vmem>>, %arg8: memref<1x128xf32, #tpu.memory_space<vmem>>, %arg9: memref<3x3x128x128xbf16, #tpu.memory_space<vmem>>, %arg10: memref<1x128xf32, #tpu.memory_space<vmem>>, %arg11: memref<1x128xf32, #tpu.memory_space<vmem>>, %arg12: memref<128x128xbf16, #tpu.memory_space<vmem>>, %arg13: memref<1x128xf32, #tpu.memory_space<vmem>>, %arg14: memref<1x128xf32, #tpu.memory_space<vmem>>, %arg15: memref<1x8x16x128xbf16, #tpu.memory_space<vmem>>, %arg16: memref<192x128xbf16, #tpu.memory_space<vmem>>, %arg17: memref<144x128xf32, #tpu.memory_space<vmem>>) attributes {dimension_semantics = [#tpu.dimension_semantics<parallel>, #tpu.dimension_semantics<parallel>], iteration_bounds = array<i64: 2, 2>, scalar_prefetch = 0 : i64, scratch_operands = 2 : i64, tpu.core_type = #tpu.core_type<tc>, window_params = [{pipeline_mode = #tpu.pipeline_mode<synchronous>, transform_indices = @transform_0, window_bounds = array<i64: 144, 1>}, {transform_indices = @transform_1, window_bounds = array<i64: 1, 144, 128>}, {transform_indices = @transform_2, window_bounds = array<i64: 1, 1, 18, 128>}, {transform_indices = @transform_3, window_bounds = array<i64: 1, 1, 18, 128>}, {pipeline_mode = #tpu.pipeline_mode<synchronous>, transform_indices = @transform_4, window_bounds = array<i64: 128, 128>}, {pipeline_mode = #tpu.pipeline_mode<synchronous>, transform_indices = @transform_5, window_bounds = array<i64: 1, 128>}, {pipeline_mode = #tpu.pipeline_mode<synchronous>, transform_indices = @transform_6, window_bounds = array<i64: 1, 128>}, {pipeline_mode = #tpu.pipeline_mode<synchronous>, transform_indices = @transform_7, window_bounds = array<i64: 3, 3, 128, 128>}, {pipeline_mode = #tpu.pipeline_mode<synchronous>, transform_indices = @transform_8, window_bounds = array<i64: 1, 128>}, {pipeline_mode = #tpu.pipeline_mode<synchronous>, transform_indices = @transform_9, window_bounds = array<i64: 1, 128>}, {pipeline_mode = #tpu.pipeline_mode<synchronous>, transform_indices = @transform_10, window_bounds = array<i64: 128, 128>}, {pipeline_mode = #tpu.pipeline_mode<synchronous>, transform_indices = @transform_11, window_bounds = array<i64: 1, 128>}, {pipeline_mode = #tpu.pipeline_mode<synchronous>, transform_indices = @transform_12, window_bounds = array<i64: 1, 128>}, {transform_indices = @transform_13, window_bounds = array<i64: 1, 8, 16, 128>}]} {
    %c8_i32 = arith.constant 8 : i32
    %0 = arith.muli %arg1, %c8_i32 : i32
    %c0 = arith.constant 0 : index
    %c0_0 = arith.constant 0 : index
    %1 = vector.load %arg2[%c0, %c0_0] : memref<144x1xf32, #tpu.memory_space<vmem>>, vector<144x1xf32>
    %c0_1 = arith.constant 0 : index
    %c0_2 = arith.constant 0 : index
    %2 = vector.load %arg6[%c0_1, %c0_2] : memref<128x128xbf16, #tpu.memory_space<vmem>>, vector<128x128xbf16>
    %c0_3 = arith.constant 0 : index
    %c0_4 = arith.constant 0 : index
    %3 = vector.load %arg7[%c0_3, %c0_4] : memref<1x128xf32, #tpu.memory_space<vmem>>, vector<1x128xf32>
    %c0_5 = arith.constant 0 : index
    %c0_6 = arith.constant 0 : index
    %4 = vector.load %arg8[%c0_5, %c0_6] : memref<1x128xf32, #tpu.memory_space<vmem>>, vector<1x128xf32>
    %c0_7 = arith.constant 0 : index
    %c0_8 = arith.constant 0 : index
    %c0_9 = arith.constant 0 : index
    %5 = vector.load %arg3[%c0_7, %c0_8, %c0_9] : memref<1x144x128xbf16, #tpu.memory_space<vmem>>, vector<1x144x128xbf16>
    %6 = vector.shape_cast %5 : vector<1x144x128xbf16> to vector<144x128xbf16>
    %cst = arith.constant dense<0.000000e+00> : vector<144x128xf32>
    %7 = tpu.matmul %6, %2, %cst {dimension_numbers = #tpu.dot_dimension_numbers<[1], [0], [0], [1], [0, 0, 1, 1], [], []>} : vector<144x128xbf16>, vector<128x128xbf16>, vector<144x128xf32> -> vector<144x128xf32>
    %8 = vector.broadcast %3 : vector<1x128xf32> to vector<144x128xf32>
    %9 = arith.mulf %7, %8 : vector<144x128xf32>
    %10 = vector.broadcast %4 : vector<1x128xf32> to vector<144x128xf32>
    %11 = arith.addf %9, %10 : vector<144x128xf32>
    %cst_10 = arith.constant 0.000000e+00 : f32
    %12 = vector.broadcast %cst_10 : f32 to vector<144x128xf32>
    %13 = arith.maximumf %11, %12 : vector<144x128xf32>
    %14 = vector.broadcast %1 : vector<144x1xf32> to vector<144x128xf32>
    %15 = arith.mulf %13, %14 : vector<144x128xf32>
    %16 = arith.truncf %15 : vector<144x128xf32> to vector<144x128xbf16>
    %c24 = arith.constant 24 : index
    %c0_11 = arith.constant 0 : index
    %17 = vector.load %arg16[%c24, %c0_11] : memref<192x128xbf16, #tpu.memory_space<vmem>>, vector<144x128xbf16>
    tpu.vector_store %arg16[%c24, %c0_11], %16 {strides = array<i32>} : memref<192x128xbf16, #tpu.memory_space<vmem>>, vector<144x128xbf16>,
    %c0_i32 = arith.constant 0 : i32
    %18 = arith.cmpi sgt, %0, %c0_i32 : i32
    %c0_12 = arith.constant 0 : index
    %c0_13 = arith.constant 0 : index
    %c0_14 = arith.constant 0 : index
    %c0_15 = arith.constant 0 : index
    %19 = vector.load %arg4[%c0_12, %c0_13, %c0_14, %c0_15] : memref<1x1x18x128xbf16, #tpu.memory_space<vmem>>, vector<1x1x18x128xbf16>
    %20 = vector.shape_cast %19 : vector<1x1x18x128xbf16> to vector<18x128xbf16>
    %cst_16 = arith.constant dense<0.000000e+00> : vector<18x128xf32>
    %21 = tpu.matmul %20, %2, %cst_16 {dimension_numbers = #tpu.dot_dimension_numbers<[1], [0], [0], [1], [0, 0, 1, 1], [], []>} : vector<18x128xbf16>, vector<128x128xbf16>, vector<18x128xf32> -> vector<18x128xf32>
    %22 = vector.broadcast %3 : vector<1x128xf32> to vector<18x128xf32>
    %23 = arith.mulf %21, %22 : vector<18x128xf32>
    %24 = vector.broadcast %4 : vector<1x128xf32> to vector<18x128xf32>
    %25 = arith.addf %23, %24 : vector<18x128xf32>
    %cst_17 = arith.constant 0.000000e+00 : f32
    %26 = vector.broadcast %cst_17 : f32 to vector<18x128xf32>
    %27 = arith.maximumf %25, %26 : vector<18x128xf32>
    %28 = vector.extract_strided_slice %1 {offsets = [0, 0], sizes = [18, 1], strides = [1, 1]} : vector<144x1xf32> to vector<18x1xf32>
    %29 = vector.broadcast %28 : vector<18x1xf32> to vector<18x128xf32>
    %30 = arith.mulf %27, %29 : vector<18x128xf32>
    %31 = arith.extui %18 : i1 to i32
    %32 = arith.sitofp %31 : i32 to f32
    %33 = vector.broadcast %32 : f32 to vector<18x128xf32>
    %34 = arith.mulf %30, %33 : vector<18x128xf32>
    %35 = arith.truncf %34 : vector<18x128xf32> to vector<18x128xbf16>
    %c6 = arith.constant 6 : index
    %c0_18 = arith.constant 0 : index
    %36 = vector.load %arg16[%c6, %c0_18] : memref<192x128xbf16, #tpu.memory_space<vmem>>, vector<18x128xbf16>
    tpu.vector_store %arg16[%c6, %c0_18], %35 {strides = array<i32>} : memref<192x128xbf16, #tpu.memory_space<vmem>>, vector<18x128xbf16>,
    %c8_i32_19 = arith.constant 8 : i32
    %37 = arith.addi %0, %c8_i32_19 : i32
    %c16_i32 = arith.constant 16 : i32
    %38 = arith.cmpi slt, %37, %c16_i32 : i32
    %c0_20 = arith.constant 0 : index
    %c0_21 = arith.constant 0 : index
    %c0_22 = arith.constant 0 : index
    %c0_23 = arith.constant 0 : index
    %39 = vector.load %arg5[%c0_20, %c0_21, %c0_22, %c0_23] : memref<1x1x18x128xbf16, #tpu.memory_space<vmem>>, vector<1x1x18x128xbf16>
    %40 = vector.shape_cast %39 : vector<1x1x18x128xbf16> to vector<18x128xbf16>
    %cst_24 = arith.constant dense<0.000000e+00> : vector<18x128xf32>
    %41 = tpu.matmul %40, %2, %cst_24 {dimension_numbers = #tpu.dot_dimension_numbers<[1], [0], [0], [1], [0, 0, 1, 1], [], []>} : vector<18x128xbf16>, vector<128x128xbf16>, vector<18x128xf32> -> vector<18x128xf32>
    %42 = vector.broadcast %3 : vector<1x128xf32> to vector<18x128xf32>
    %43 = arith.mulf %41, %42 : vector<18x128xf32>
    %44 = vector.broadcast %4 : vector<1x128xf32> to vector<18x128xf32>
    %45 = arith.addf %43, %44 : vector<18x128xf32>
    %cst_25 = arith.constant 0.000000e+00 : f32
    %46 = vector.broadcast %cst_25 : f32 to vector<18x128xf32>
    %47 = arith.maximumf %45, %46 : vector<18x128xf32>
    %48 = vector.extract_strided_slice %1 {offsets = [0, 0], sizes = [18, 1], strides = [1, 1]} : vector<144x1xf32> to vector<18x1xf32>
    %49 = vector.broadcast %48 : vector<18x1xf32> to vector<18x128xf32>
    %50 = arith.mulf %47, %49 : vector<18x128xf32>
    %51 = arith.extui %38 : i1 to i32
    %52 = arith.sitofp %51 : i32 to f32
    %53 = vector.broadcast %52 : f32 to vector<18x128xf32>
    %54 = arith.mulf %50, %53 : vector<18x128xf32>
    %55 = arith.truncf %54 : vector<18x128xf32> to vector<18x128xbf16>
    %c168 = arith.constant 168 : index
    %c0_26 = arith.constant 0 : index
    %56 = vector.load %arg16[%c168, %c0_26] : memref<192x128xbf16, #tpu.memory_space<vmem>>, vector<18x128xbf16>
    tpu.vector_store %arg16[%c168, %c0_26], %55 {strides = array<i32>} : memref<192x128xbf16, #tpu.memory_space<vmem>>, vector<18x128xbf16>,
    %c5 = arith.constant 5 : index
    %c0_27 = arith.constant 0 : index
    %57 = vector.load %arg16[%c5, %c0_27] : memref<192x128xbf16, #tpu.memory_space<vmem>>, vector<144x128xbf16>
    %c0_28 = arith.constant 0 : index
    %c0_29 = arith.constant 0 : index
    %c0_30 = arith.constant 0 : index
    %c0_31 = arith.constant 0 : index
    %58 = vector.load %arg9[%c0_28, %c0_29, %c0_30, %c0_31] : memref<3x3x128x128xbf16, #tpu.memory_space<vmem>>, vector<1x1x128x128xbf16>
    %59 = vector.shape_cast %58 : vector<1x1x128x128xbf16> to vector<128x128xbf16>
    %cst_32 = arith.constant dense<0.000000e+00> : vector<144x128xf32>
    %60 = tpu.matmul %57, %59, %cst_32 {dimension_numbers = #tpu.dot_dimension_numbers<[1], [0], [0], [1], [0, 0, 1, 1], [], []>} : vector<144x128xbf16>, vector<128x128xbf16>, vector<144x128xf32> -> vector<144x128xf32>
    %c6_33 = arith.constant 6 : index
    %c0_34 = arith.constant 0 : index
    %61 = vector.load %arg16[%c6_33, %c0_34] : memref<192x128xbf16, #tpu.memory_space<vmem>>, vector<144x128xbf16>
    %c0_35 = arith.constant 0 : index
    %c1 = arith.constant 1 : index
    %c0_36 = arith.constant 0 : index
    %c0_37 = arith.constant 0 : index
    %62 = vector.load %arg9[%c0_35, %c1, %c0_36, %c0_37] : memref<3x3x128x128xbf16, #tpu.memory_space<vmem>>, vector<1x1x128x128xbf16>
    %63 = vector.shape_cast %62 : vector<1x1x128x128xbf16> to vector<128x128xbf16>
    %cst_38 = arith.constant dense<0.000000e+00> : vector<144x128xf32>
    %64 = tpu.matmul %61, %63, %cst_38 {dimension_numbers = #tpu.dot_dimension_numbers<[1], [0], [0], [1], [0, 0, 1, 1], [], []>} : vector<144x128xbf16>, vector<128x128xbf16>, vector<144x128xf32> -> vector<144x128xf32>
    %65 = arith.addf %60, %64 : vector<144x128xf32>
    %c7 = arith.constant 7 : index
    %c0_39 = arith.constant 0 : index
    %66 = vector.load %arg16[%c7, %c0_39] : memref<192x128xbf16, #tpu.memory_space<vmem>>, vector<144x128xbf16>
    %c0_40 = arith.constant 0 : index
    %c2 = arith.constant 2 : index
    %c0_41 = arith.constant 0 : index
    %c0_42 = arith.constant 0 : index
    %67 = vector.load %arg9[%c0_40, %c2, %c0_41, %c0_42] : memref<3x3x128x128xbf16, #tpu.memory_space<vmem>>, vector<1x1x128x128xbf16>
    %68 = vector.shape_cast %67 : vector<1x1x128x128xbf16> to vector<128x128xbf16>
    %cst_43 = arith.constant dense<0.000000e+00> : vector<144x128xf32>
    %69 = tpu.matmul %66, %68, %cst_43 {dimension_numbers = #tpu.dot_dimension_numbers<[1], [0], [0], [1], [0, 0, 1, 1], [], []>} : vector<144x128xbf16>, vector<128x128xbf16>, vector<144x128xf32> -> vector<144x128xf32>
    %70 = arith.addf %65, %69 : vector<144x128xf32>
    %c0_44 = arith.constant 0 : index
    %c0_45 = arith.constant 0 : index
    %71 = vector.load %arg17[%c0_44, %c0_45] : memref<144x128xf32, #tpu.memory_space<vmem>>, vector<144x128xf32>
    tpu.vector_store %arg17[%c0_44, %c0_45], %70 {strides = array<i32>} : memref<144x128xf32, #tpu.memory_space<vmem>>, vector<144x128xf32>,
    %c23 = arith.constant 23 : index
    %c0_46 = arith.constant 0 : index
    %72 = vector.load %arg16[%c23, %c0_46] : memref<192x128xbf16, #tpu.memory_space<vmem>>, vector<144x128xbf16>
    %c1_47 = arith.constant 1 : index
    %c0_48 = arith.constant 0 : index
    %c0_49 = arith.constant 0 : index
    %c0_50 = arith.constant 0 : index
    %73 = vector.load %arg9[%c1_47, %c0_48, %c0_49, %c0_50] : memref<3x3x128x128xbf16, #tpu.memory_space<vmem>>, vector<1x1x128x128xbf16>
    %74 = vector.shape_cast %73 : vector<1x1x128x128xbf16> to vector<128x128xbf16>
    %cst_51 = arith.constant dense<0.000000e+00> : vector<144x128xf32>
    %75 = tpu.matmul %72, %74, %cst_51 {dimension_numbers = #tpu.dot_dimension_numbers<[1], [0], [0], [1], [0, 0, 1, 1], [], []>} : vector<144x128xbf16>, vector<128x128xbf16>, vector<144x128xf32> -> vector<144x128xf32>
    %c24_52 = arith.constant 24 : index
    %c0_53 = arith.constant 0 : index
    %76 = vector.load %arg16[%c24_52, %c0_53] : memref<192x128xbf16, #tpu.memory_space<vmem>>, vector<144x128xbf16>
    %c1_54 = arith.constant 1 : index
    %c1_55 = arith.constant 1 : index
    %c0_56 = arith.constant 0 : index
    %c0_57 = arith.constant 0 : index
    %77 = vector.load %arg9[%c1_54, %c1_55, %c0_56, %c0_57] : memref<3x3x128x128xbf16, #tpu.memory_space<vmem>>, vector<1x1x128x128xbf16>
    %78 = vector.shape_cast %77 : vector<1x1x128x128xbf16> to vector<128x128xbf16>
    %cst_58 = arith.constant dense<0.000000e+00> : vector<144x128xf32>
    %79 = tpu.matmul %76, %78, %cst_58 {dimension_numbers = #tpu.dot_dimension_numbers<[1], [0], [0], [1], [0, 0, 1, 1], [], []>} : vector<144x128xbf16>, vector<128x128xbf16>, vector<144x128xf32> -> vector<144x128xf32>
    %80 = arith.addf %75, %79 : vector<144x128xf32>
    %c25 = arith.constant 25 : index
    %c0_59 = arith.constant 0 : index
    %81 = vector.load %arg16[%c25, %c0_59] : memref<192x128xbf16, #tpu.memory_space<vmem>>, vector<144x128xbf16>
    %c1_60 = arith.constant 1 : index
    %c2_61 = arith.constant 2 : index
    %c0_62 = arith.constant 0 : index
    %c0_63 = arith.constant 0 : index
    %82 = vector.load %arg9[%c1_60, %c2_61, %c0_62, %c0_63] : memref<3x3x128x128xbf16, #tpu.memory_space<vmem>>, vector<1x1x128x128xbf16>
    %83 = vector.shape_cast %82 : vector<1x1x128x128xbf16> to vector<128x128xbf16>
    %cst_64 = arith.constant dense<0.000000e+00> : vector<144x128xf32>
    %84 = tpu.matmul %81, %83, %cst_64 {dimension_numbers = #tpu.dot_dimension_numbers<[1], [0], [0], [1], [0, 0, 1, 1], [], []>} : vector<144x128xbf16>, vector<128x128xbf16>, vector<144x128xf32> -> vector<144x128xf32>
    %85 = arith.addf %80, %84 : vector<144x128xf32>
    %c0_65 = arith.constant 0 : index
    %c0_66 = arith.constant 0 : index
    %86 = vector.load %arg17[%c0_65, %c0_66] : memref<144x128xf32, #tpu.memory_space<vmem>>, vector<144x128xf32>
    %87 = arith.addf %86, %85 : vector<144x128xf32>
    %c0_67 = arith.constant 0 : index
    %c0_68 = arith.constant 0 : index
    %88 = vector.load %arg17[%c0_67, %c0_68] : memref<144x128xf32, #tpu.memory_space<vmem>>, vector<144x128xf32>
    tpu.vector_store %arg17[%c0_67, %c0_68], %87 {strides = array<i32>} : memref<144x128xf32, #tpu.memory_space<vmem>>, vector<144x128xf32>,
    %c41 = arith.constant 41 : index
    %c0_69 = arith.constant 0 : index
    %89 = vector.load %arg16[%c41, %c0_69] : memref<192x128xbf16, #tpu.memory_space<vmem>>, vector<144x128xbf16>
    %c2_70 = arith.constant 2 : index
    %c0_71 = arith.constant 0 : index
    %c0_72 = arith.constant 0 : index
    %c0_73 = arith.constant 0 : index
    %90 = vector.load %arg9[%c2_70, %c0_71, %c0_72, %c0_73] : memref<3x3x128x128xbf16, #tpu.memory_space<vmem>>, vector<1x1x128x128xbf16>
    %91 = vector.shape_cast %90 : vector<1x1x128x128xbf16> to vector<128x128xbf16>
    %cst_74 = arith.constant dense<0.000000e+00> : vector<144x128xf32>
    %92 = tpu.matmul %89, %91, %cst_74 {dimension_numbers = #tpu.dot_dimension_numbers<[1], [0], [0], [1], [0, 0, 1, 1], [], []>} : vector<144x128xbf16>, vector<128x128xbf16>, vector<144x128xf32> -> vector<144x128xf32>
    %c42 = arith.constant 42 : index
    %c0_75 = arith.constant 0 : index
    %93 = vector.load %arg16[%c42, %c0_75] : memref<192x128xbf16, #tpu.memory_space<vmem>>, vector<144x128xbf16>
    %c2_76 = arith.constant 2 : index
    %c1_77 = arith.constant 1 : index
    %c0_78 = arith.constant 0 : index
    %c0_79 = arith.constant 0 : index
    %94 = vector.load %arg9[%c2_76, %c1_77, %c0_78, %c0_79] : memref<3x3x128x128xbf16, #tpu.memory_space<vmem>>, vector<1x1x128x128xbf16>
    %95 = vector.shape_cast %94 : vector<1x1x128x128xbf16> to vector<128x128xbf16>
    %cst_80 = arith.constant dense<0.000000e+00> : vector<144x128xf32>
    %96 = tpu.matmul %93, %95, %cst_80 {dimension_numbers = #tpu.dot_dimension_numbers<[1], [0], [0], [1], [0, 0, 1, 1], [], []>} : vector<144x128xbf16>, vector<128x128xbf16>, vector<144x128xf32> -> vector<144x128xf32>
    %97 = arith.addf %92, %96 : vector<144x128xf32>
    %c43 = arith.constant 43 : index
    %c0_81 = arith.constant 0 : index
    %98 = vector.load %arg16[%c43, %c0_81] : memref<192x128xbf16, #tpu.memory_space<vmem>>, vector<144x128xbf16>
    %c2_82 = arith.constant 2 : index
    %c2_83 = arith.constant 2 : index
    %c0_84 = arith.constant 0 : index
    %c0_85 = arith.constant 0 : index
    %99 = vector.load %arg9[%c2_82, %c2_83, %c0_84, %c0_85] : memref<3x3x128x128xbf16, #tpu.memory_space<vmem>>, vector<1x1x128x128xbf16>
    %100 = vector.shape_cast %99 : vector<1x1x128x128xbf16> to vector<128x128xbf16>
    %cst_86 = arith.constant dense<0.000000e+00> : vector<144x128xf32>
    %101 = tpu.matmul %98, %100, %cst_86 {dimension_numbers = #tpu.dot_dimension_numbers<[1], [0], [0], [1], [0, 0, 1, 1], [], []>} : vector<144x128xbf16>, vector<128x128xbf16>, vector<144x128xf32> -> vector<144x128xf32>
    %102 = arith.addf %97, %101 : vector<144x128xf32>
    %c0_87 = arith.constant 0 : index
    %c0_88 = arith.constant 0 : index
    %103 = vector.load %arg17[%c0_87, %c0_88] : memref<144x128xf32, #tpu.memory_space<vmem>>, vector<144x128xf32>
    %104 = arith.addf %103, %102 : vector<144x128xf32>
    %c0_89 = arith.constant 0 : index
    %c0_90 = arith.constant 0 : index
    %105 = vector.load %arg17[%c0_89, %c0_90] : memref<144x128xf32, #tpu.memory_space<vmem>>, vector<144x128xf32>
    tpu.vector_store %arg17[%c0_89, %c0_90], %104 {strides = array<i32>} : memref<144x128xf32, #tpu.memory_space<vmem>>, vector<144x128xf32>,
    %c0_91 = arith.constant 0 : index
    %c0_92 = arith.constant 0 : index
    %106 = vector.load %arg17[%c0_91, %c0_92] : memref<144x128xf32, #tpu.memory_space<vmem>>, vector<144x128xf32>
    %c0_93 = arith.constant 0 : index
    %c0_94 = arith.constant 0 : index
    %107 = vector.load %arg10[%c0_93, %c0_94] : memref<1x128xf32, #tpu.memory_space<vmem>>, vector<1x128xf32>
    %108 = vector.broadcast %107 : vector<1x128xf32> to vector<144x128xf32>
    %109 = arith.mulf %106, %108 : vector<144x128xf32>
    %c0_95 = arith.constant 0 : index
    %c0_96 = arith.constant 0 : index
    %110 = vector.load %arg11[%c0_95, %c0_96] : memref<1x128xf32, #tpu.memory_space<vmem>>, vector<1x128xf32>
    %111 = vector.broadcast %110 : vector<1x128xf32> to vector<144x128xf32>
    %112 = arith.addf %109, %111 : vector<144x128xf32>
    %cst_97 = arith.constant 0.000000e+00 : f32
    %113 = vector.broadcast %cst_97 : f32 to vector<144x128xf32>
    %114 = arith.maximumf %112, %113 : vector<144x128xf32>
    %115 = arith.truncf %114 : vector<144x128xf32> to vector<144x128xbf16>
    %c0_98 = arith.constant 0 : index
    %c0_99 = arith.constant 0 : index
    %116 = vector.load %arg12[%c0_98, %c0_99] : memref<128x128xbf16, #tpu.memory_space<vmem>>, vector<128x128xbf16>
    %cst_100 = arith.constant dense<0.000000e+00> : vector<144x128xf32>
    %117 = tpu.matmul %115, %116, %cst_100 {dimension_numbers = #tpu.dot_dimension_numbers<[1], [0], [0], [1], [0, 0, 1, 1], [], []>} : vector<144x128xbf16>, vector<128x128xbf16>, vector<144x128xf32> -> vector<144x128xf32>
    %c0_101 = arith.constant 0 : index
    %c0_102 = arith.constant 0 : index
    %118 = vector.load %arg13[%c0_101, %c0_102] : memref<1x128xf32, #tpu.memory_space<vmem>>, vector<1x128xf32>
    %119 = vector.broadcast %118 : vector<1x128xf32> to vector<144x128xf32>
    %120 = arith.mulf %117, %119 : vector<144x128xf32>
    %c0_103 = arith.constant 0 : index
    %c0_104 = arith.constant 0 : index
    %121 = vector.load %arg14[%c0_103, %c0_104] : memref<1x128xf32, #tpu.memory_space<vmem>>, vector<1x128xf32>
    %122 = vector.broadcast %121 : vector<1x128xf32> to vector<144x128xf32>
    %123 = arith.addf %120, %122 : vector<144x128xf32>
    %124 = arith.extf %6 : vector<144x128xbf16> to vector<144x128xf32>
    %125 = arith.addf %123, %124 : vector<144x128xf32>
    %cst_105 = arith.constant 0.000000e+00 : f32
    %126 = vector.broadcast %cst_105 : f32 to vector<144x128xf32>
    %127 = arith.maximumf %125, %126 : vector<144x128xf32>
    %128 = arith.truncf %127 : vector<144x128xf32> to vector<144x128xbf16>
    %129 = vector.shape_cast %128 : vector<144x128xbf16> to vector<8x18x128xbf16>
    %130 = vector.extract_strided_slice %129 {offsets = [0, 1, 0], sizes = [8, 16, 128], strides = [1, 1, 1]} : vector<8x18x128xbf16> to vector<8x16x128xbf16>
    %c0_106 = arith.constant 0 : index
    %c0_107 = arith.constant 0 : index
    %c0_108 = arith.constant 0 : index
    %c0_109 = arith.constant 0 : index
    %131 = vector.load %arg15[%c0_106, %c0_107, %c0_108, %c0_109] : memref<1x8x16x128xbf16, #tpu.memory_space<vmem>>, vector<1x8x16x128xbf16>
    %132 = vector.shape_cast %131 : vector<1x8x16x128xbf16> to vector<8x16x128xbf16>
    %133 = vector.shape_cast %130 : vector<8x16x128xbf16> to vector<1x8x16x128xbf16>
    tpu.vector_store %arg15[%c0_106, %c0_107, %c0_108, %c0_109], %133 {strides = array<i32>} : memref<1x8x16x128xbf16, #tpu.memory_space<vmem>>, vector<1x8x16x128xbf16>,
    return
  }
  func.func @transform_0(%arg0: i32, %arg1: i32) -> (i32, i32) {
    %c0_i32 = arith.constant 0 : i32
    %c0_i32_0 = arith.constant 0 : i32
    %c0_i32_1 = arith.constant 0 : i32
    return %c0_i32, %c0_i32_0 : i32, i32
  }
  func.func @transform_1(%arg0: i32, %arg1: i32) -> (i32, i32, i32) {
    %c0_i32 = arith.constant 0 : i32
    %c0_i32_0 = arith.constant 0 : i32
    return %arg0, %arg1, %c0_i32 : i32, i32, i32
  }
  func.func @transform_2(%arg0: i32, %arg1: i32) -> (i32, i32, i32, i32) {
    %c8_i32 = arith.constant 8 : i32
    %0 = arith.muli %arg1, %c8_i32 : i32
    %c1_i32 = arith.constant 1 : i32
    %1 = arith.subi %0, %c1_i32 : i32
    %c0_i32 = arith.constant 0 : i32
    %2 = arith.maxsi %1, %c0_i32 : i32
    %c0_i32_0 = arith.constant 0 : i32
    %c0_i32_1 = arith.constant 0 : i32
    %c0_i32_2 = arith.constant 0 : i32
    return %arg0, %2, %c0_i32_0, %c0_i32_1 : i32, i32, i32, i32
  }
  func.func @transform_3(%arg0: i32, %arg1: i32) -> (i32, i32, i32, i32) {
    %c8_i32 = arith.constant 8 : i32
    %0 = arith.muli %arg1, %c8_i32 : i32
    %c8_i32_0 = arith.constant 8 : i32
    %1 = arith.addi %0, %c8_i32_0 : i32
    %c15_i32 = arith.constant 15 : i32
    %2 = arith.minsi %1, %c15_i32 : i32
    %c0_i32 = arith.constant 0 : i32
    %c0_i32_1 = arith.constant 0 : i32
    %c0_i32_2 = arith.constant 0 : i32
    return %arg0, %2, %c0_i32, %c0_i32_1 : i32, i32, i32, i32
  }
  func.func @transform_4(%arg0: i32, %arg1: i32) -> (i32, i32) {
    %c0_i32 = arith.constant 0 : i32
    %c0_i32_0 = arith.constant 0 : i32
    %c0_i32_1 = arith.constant 0 : i32
    return %c0_i32, %c0_i32_0 : i32, i32
  }
  func.func @transform_5(%arg0: i32, %arg1: i32) -> (i32, i32) {
    %c0_i32 = arith.constant 0 : i32
    %c0_i32_0 = arith.constant 0 : i32
    %c0_i32_1 = arith.constant 0 : i32
    return %c0_i32, %c0_i32_0 : i32, i32
  }
  func.func @transform_6(%arg0: i32, %arg1: i32) -> (i32, i32) {
    %c0_i32 = arith.constant 0 : i32
    %c0_i32_0 = arith.constant 0 : i32
    %c0_i32_1 = arith.constant 0 : i32
    return %c0_i32, %c0_i32_0 : i32, i32
  }
  func.func @transform_7(%arg0: i32, %arg1: i32) -> (i32, i32, i32, i32) {
    %c0_i32 = arith.constant 0 : i32
    %c0_i32_0 = arith.constant 0 : i32
    %c0_i32_1 = arith.constant 0 : i32
    %c0_i32_2 = arith.constant 0 : i32
    %c0_i32_3 = arith.constant 0 : i32
    return %c0_i32, %c0_i32_0, %c0_i32_1, %c0_i32_2 : i32, i32, i32, i32
  }
  func.func @transform_8(%arg0: i32, %arg1: i32) -> (i32, i32) {
    %c0_i32 = arith.constant 0 : i32
    %c0_i32_0 = arith.constant 0 : i32
    %c0_i32_1 = arith.constant 0 : i32
    return %c0_i32, %c0_i32_0 : i32, i32
  }
  func.func @transform_9(%arg0: i32, %arg1: i32) -> (i32, i32) {
    %c0_i32 = arith.constant 0 : i32
    %c0_i32_0 = arith.constant 0 : i32
    %c0_i32_1 = arith.constant 0 : i32
    return %c0_i32, %c0_i32_0 : i32, i32
  }
  func.func @transform_10(%arg0: i32, %arg1: i32) -> (i32, i32) {
    %c0_i32 = arith.constant 0 : i32
    %c0_i32_0 = arith.constant 0 : i32
    %c0_i32_1 = arith.constant 0 : i32
    return %c0_i32, %c0_i32_0 : i32, i32
  }
  func.func @transform_11(%arg0: i32, %arg1: i32) -> (i32, i32) {
    %c0_i32 = arith.constant 0 : i32
    %c0_i32_0 = arith.constant 0 : i32
    %c0_i32_1 = arith.constant 0 : i32
    return %c0_i32, %c0_i32_0 : i32, i32
  }
  func.func @transform_12(%arg0: i32, %arg1: i32) -> (i32, i32) {
    %c0_i32 = arith.constant 0 : i32
    %c0_i32_0 = arith.constant 0 : i32
    %c0_i32_1 = arith.constant 0 : i32
    return %c0_i32, %c0_i32_0 : i32, i32
  }
  func.func @transform_13(%arg0: i32, %arg1: i32) -> (i32, i32, i32, i32) {
    %c0_i32 = arith.constant 0 : i32
    %c0_i32_0 = arith.constant 0 : i32
    %c0_i32_1 = arith.constant 0 : i32
    return %arg0, %arg1, %c0_i32, %c0_i32_0 : i32, i32, i32, i32
  }
}

</mosaic_0001>

<bundles_post_ra>
// kernel: tpu_custom_call.1
= control target key start
LH: loop header
LB: loop body
LE: loop exit
PB: predicated region body
PF: predicated region fallthrough
CT: control target
= control target key end

     0   :  { %s9250_s0 = inlined_call_operand.vmem [shape: f32[144,1], index: 0, kind: input, shape index: {}]   ;;  %s9251_s1 = inlined_call_operand.vmem [shape: bf16[2,288,128], index: 1, kind: input, shape index: {}]   ;;  %s9252_s2 = inlined_call_operand.vmem [shape: bf16[2,16,18,128], index: 2, kind: input, shape index: {}]   ;;  %s9253_s3 = inlined_call_operand.vmem [shape: bf16[2,16,18,128], index: 3, kind: input, shape index: {}]   ;;  %s9254_s4 = inlined_call_operand.vmem [shape: bf16[128,128], index: 4, kind: input, shape index: {}]   ;;  %s9255_s5 = inlined_call_operand.vmem [shape: f32[1,128], index: 5, kind: input, shape index: {}]   ;;  %s9256_s6 = inlined_call_operand.vmem [shape: f32[1,128], index: 6, kind: input, shape index: {}]   ;;  %s9257_s7 = inlined_call_operand.vmem [shape: bf16[3,3,128,128], index: 7, kind: input, shape index: {}]   ;;  %s9258_s8 = inlined_call_operand.vmem [shape: f32[1,128], index: 8, kind: input, shape index: {}]   ;;  %s9259_s9 = inlined_call_operand.vmem [shape: f32[1,128], index: 9, kind: input, shape index: {}]   ;;  %s9260_s10 = inlined_call_operand.vmem [shape: bf16[128,128], index: 10, kind: input, shape index: {}]   ;;  %s9261_s11 = inlined_call_operand.vmem [shape: f32[1,128], index: 11, kind: input, shape index: {}]   ;;  %s9262_s12 = inlined_call_operand.vmem [shape: f32[1,128], index: 12, kind: input, shape index: {}]   ;;  %s9263_s13 = inlined_call_operand.hbm [shape: bf16[2,16,16,128], index: 13, kind: output, shape index: {}]  }
   0x1   :  { %9279 = sst [smem:[#allocation18_spill]] %s9252_s2 }
   0x2   :  { %9280 = sst [smem:[#allocation19_spill]] %s9263_s13 }
   0x3   :  { %18 = vsyncpa [#allocation5], 0 }
   0x4   :  { %20 = vsyncpa [#allocation5 + $0x1], 0  ;;  %s7249_s25 = smov 0   ;;  %s7251_s26 = smov 0  }
   0x5   :  { %s7253_s27 = smov 0   ;;  %s7255_s28 = smov 0  }
   0x6   :  { %s7257_s29 = smov 0   ;;  %s7259_s30 = smov 0  }
   0x7   :  { %s7261_s14 = smov 0   ;;  %s7263_s15 = smov 0  }
   0x8 LB: > { %9281 = sst [smem:[#allocation7_spill]] %s7141_s25  ;;  %s5570_s16 = sadd.s32 4294967295, %s7169_s15   ;;  %s7169_s15 = sphi %s7263_s15, %s26_s15   ;;  %s7165_s14 = sphi %s7261_s14, %s9314_s14   ;;  %s7161_s30 = sphi %s7259_s30, %s9313_s30   ;;  %s7157_s29 = sphi %s7257_s29, %s9312_s29   ;;  %s7153_s28 = sphi %s7255_s28, %s9311_s28   ;;  %s7149_s27 = sphi %s7253_s27, %s9310_s27   ;;  %s7145_s26 = sphi %s7251_s26, %s9316_s26   ;;  %s7141_s25 = sphi %s7249_s25, %s9315_s25  }
   0x9   : > { %9282 = sst [smem:[#allocation8_spill]] %s7149_s27  ;;  %s5571_s17 = sadd.s32 4294967294, %s7169_s15  }
   0xa   : > { %9283 = sst [smem:[#allocation9_spill]] %s7157_s29  ;;  %s35_s18 = sadd.s32 1, %s7161_s30 }
   0xb   : > { %9284 = sst [smem:[#allocation10_spill]] %s7161_s30  ;;  %p36_p0 = scmp.ge.s32.totalorder %s35_s18, 2 }
   0xc   : > { %9285 = sst [smem:[#allocation11_spill]] %s7165_s14  ;;  %s38_s19 = sadd.s32 1, %s7165_s14 }
   0xd   : > { %9286 = sst [smem:[#allocation12_spill]] %s7169_s15  ;;  %p367_p1 = scmp.ne.s32.totalorder %s7149_s27, %s7145_s26 }
   0xe   : > { %p368_p2 = scmp.eq.s32.totalorder %s5570_s16, 3  ;;  %s9318_s18 = smov (%p36_p0, %s35_s18), 0 }
   0xf   : > { %9287 = sst [smem:[#allocation13_spill]] %s9318_s18  ;;  %s9320_s19 = smov (!%p36_p0, %s38_s19), %s7165_s14 }
  0x10   : > { %s353_s20 = ssub.s32 %s7161_s30, %s9318_s18  ;;  %p7300_p3 = por %p368_p2, %p367_p1 }
  0x11   : > { %p40_p4 = scmp.ge.s32.totalorder %s9320_s19, 2  ;;  %p373_p5 = scmp.ne.s32.totalorder %s7145_s26, %s7141_s25 }
  0x12   : > { %s9288_s21 = scalar_select %p7300_p3, 1, 0 }
  0x13   : > { %p374_p6 = scmp.eq.s32.totalorder %s5571_s17, 3  ;;  %p5580_p7 = scmp.ge.s32.totalorder %s7169_s15, 1 }
  0x14   : > { %9289 = sst [smem:[#allocation14_spill]] %s9288_s21  ;;  %s9322_s19 = smov (%p40_p4, %s9320_s19), 0 }
  0x15   : > { %9290 = sst [smem:[#allocation15_spill]] %s9322_s19  ;;  %p7309_p8 = por %p374_p6, %p373_p5 }
  0x16   : > { %p475_p9 = scmp.lt.s32.totalorder %s7169_s15, 5  ;;  %s352_s23 = ssub.s32 %s7165_s14, %s9322_s19 }
  0x17   : > { %s9291_s22 = scalar_select %p7309_p8, 1, 0 }
  0x18   : > { %s357_s24 = sadd.s32 1, %s7149_s27  ;;  %s354_s16 = sor.u32 %s353_s20, %s352_s23 }
  0x19   : > { %9292 = sst [smem:[#allocation16_spill]] %s9291_s22  ;;  %p476_p10 = pnand %p5580_p7, %p475_p9 }
  0x1a   : > { %p355_p11 = scmp.eq.s32.totalorder %s354_s16, 0  ;;  %s549_s20 = smul.u32 (!%p476_p10), 18, %s7153_s28 }
  0x1b   : > { %479 = sbr.rel (%p476_p10) target bundleno = 1134 (0x46e), region = 72  ;;  %p550_p12 = scmp.lt.s32.totalorder (!%p476_p10), %s7157_s29, 1 }
  0x1c   : > { %s7318_s18 = scalar_select %p355_p11, %s7149_s27, %s357_s24  }
  0x1d   : > { %p552_p13 = scmp.lt.s32.totalorder (!%p476_p10), %s549_s20, 35  ;;  %s7360_s16 = sshll.u32 (!%p476_p10), %s7153_s28, 3 }
  0x1e   : > { %9293 = sst [smem:[#allocation17_spill]] %s7318_s18  ;;  %s5584_s30 = sadd.s32 (!%p476_p10), 4294967295, %s7360_s16 }
  0x1f   : > { %p561_p0 = scmp.gt.s32.totalorder (!%p476_p10), %s5584_s30, 0  ;;  %p5585_p1 = scmp.lt.s32.totalorder (!%p476_p10), %s5584_s30, 15 }
  0x20   : > { %v7323_v0 = vld [vmem:[%s9254_s4 + $0x38] sm:$0xff]   ;;  %v7171_v1 = vmov 0.0   ;;  %v7329_v2 = vld [vmem:[%s9254_s4 + $0x30] sm:$0xff]   ;;  %v7341_v3 = vld [vmem:[%s9254_s4 + $0x28] sm:$0xff]   ;;  %vm7172_vm0 = vmmov 0   ;;  %s7347_s19 = scalar_select %p550_p12, %s7157_s29, 1 }
  0x21   : > { %6207 = vmatprep.subr.bf16.mxu0 %v7171_v1  ;;  %6259 = vmatprep.subr.bf16.mxu1 %v7323_v0  ;;  %s9324_s20 = smov (!%p552_p13, %s549_s20), 35  ;;  %v7357_v4 = vld [vmem:[%s9254_s4 + $0x20] sm:$0xff]   ;;  %v7173_v6 = vmov 0   ;;  %v598_v7 = vld [vmem:[%s9250_s0 + $0x10] sm:$0xff]  ;;  %v597_v8 = vld [vmem:[%s9250_s0 + $0x8] sm:$0xff]  ;;  %s9326_s30 = smov (!%p561_p0, %s5584_s30), 0 }
  0x22   : > { %6208 = vmatpush3.bf16.msra.mxu0 %v7323_v0  ;;  %6260 = vmatpush3.bf16.msra.mxu1 %v7323_v0  ;;  %v596_v5 = vld [vmem:[%s9250_s0] sm:$0xff]  ;;  %s6819_s23 = smul.u32 36, %s7347_s19  ;;  %v7380_v9 = vld [vmem:[%s9254_s4 + $0x18] sm:$0xff]   ;;  %s7384_s18 = sadd.s32 8, %s7360_s16  ;;  %v7400_v12 = vld [vmem:[%s9254_s4 + $0x10] sm:$0xff]   ;;  %vm1211_vm1 = vcmask 1042432  }
  0x23   : > { %6209 = vmatprep.subr.bf16.mxu0 %v7171_v1  ;;  %6261 = vmatprep.subr.bf16.mxu1 %v7329_v2  ;;  %v599_v10 = vld [vmem:[%s9250_s0 + $0x18] sm:$0xff]  ;;  %s9328_s30 = smov (!%p5585_p1, %s9326_s30), 15  ;;  %p578_p2 = scmp.lt.s32.totalorder %s7384_s18, 15  ;;  %v600_v11 = vld [vmem:[%s9250_s0 + $0x20] sm:$0xff]  ;;  %v602_v13 = vld [vmem:[%s9250_s0 + $0x30] sm:$0xff]  ;;  %vm1212_vm2 = vcmask 1046532  }
  0x24   : > { %6223 = vmatprep.mubr.msk.bf16.mxu0 %vm7172_vm0, %v7171_v1  ;;  %6901 = vset.pattern.permute.xlu0 %v7173_v6  ;;  %s555_s17 = sadd.s32 %s6819_s23, %s9324_s20  ;;  %s6820_s25 = smul.u32 3, %s9328_s30  ;;  %v601_v14 = vld [vmem:[%s9250_s0 + $0x28] sm:$0xff]  ;;  %v7432_v17 = vld [vmem:[%s9254_s4] sm:$0xff]   ;;  %v603_v18 = vld [vmem:[%s9250_s0 + $0x38] sm:$0xff]  ;;  %vm1425_vm4 = vcmask 1044480   ;;  %vm3151_vm9 = vcmask 1046528  }
  0x25   : > { %6902 = vset.pattern.permute.xlu1 %v7173_v6  ;;  %925 = vperm.xlu0 %6901, %v596_v5   ;;  %s579_s14 = scalar_select %p578_p2, %s7384_s18, 15  ;;  %v7416_v15 = vld [vmem:[%s9254_s4 + $0x8] sm:$0xff]   ;;  %v604_v19 = vld [vmem:[%s9250_s0 + $0x40] sm:$0xff]  ;;  %v606_v20 = vld [vmem:[%s9250_s0 + $0x50] sm:$0xff]  ;;  %vm1610_vm5 = vsmask.f32 5376 }
  0x26   : > { %6210 = vmatpush3.bf16.msra.mxu0 %v7329_v2  ;;  %6262 = vmatpush3.bf16.msra.mxu1 %v7329_v2  ;;  %s9294_s20 = smul.u32 48, %s7347_s19  ;;  %s5582_s13 = sshll.u32 %s555_s17, 2  ;;  %v605_v21 = vld [vmem:[%s9250_s0 + $0x48] sm:$0xff]  ;;  %v607_v23 = vld [vmem:[%s9250_s0 + $0x58] sm:$0xff]  ;;  %v608_v26 = vld [vmem:[%s9250_s0 + $0x60] sm:$0xff] }
  0x27   : > { %6211 = vmatprep.subr.bf16.mxu0 %v7171_v1  ;;  %6263 = vmatprep.subr.bf16.mxu1 %v7341_v3  ;;  %s9295_s2 = sld [smem:[#allocation18_spill]]  ;;  %s9330_s14 = smov (!%p578_p2, %s579_s14), 15  ;;  %v609_v28 = vld [vmem:[%s9250_s0 + $0x68] sm:$0xff]  ;;  %v610_v29 = vld [vmem:[%s9250_s0 + $0x70] sm:$0xff]  ;;  %v611_v30 = vld [vmem:[%s9250_s0 + $0x78] sm:$0xff] }
  0x28   : > { %935 = vperm.xlu1 %6902, %v598_v7   ;;  %s569_s30 = sadd.s32 %s9294_s20, %s6820_s25  ;;  %s9296_s25 = smul.u32 48, %s7347_s19  ;;  %v612_v31 = vld [vmem:[%s9250_s0 + $0x80] sm:$0xff]  ;;  %v613_v33 = vld [vmem:[%s9250_s0 + $0x88] sm:$0xff]  ;;  %v6924_v41 = vld [vmem:[%s9257_s7 + $0x78] sm:$0xff]   ;;  %vm1883_vm6 = vsmask.f32 4352 }
  0x29   : > { %930 = vperm.xlu0 %6901, %v597_v8   ;;  %s5590_s21 = sshll.u32 %s569_s30, 2  ;;  %s7442_s30 = scalar_lea.vmem %s9251_s1, %s5582_s13  ;;  %v6925_v42 = vld [vmem:[%s9257_s7 + $0x70] sm:$0xff]   ;;  %v6926_v43 = vld [vmem:[%s9257_s7 + $0x38] sm:$0xff]   ;;  %v6927_v44 = vld [vmem:[%s9257_s7 + $0x68] sm:$0xff]   ;;  %vm3595_vm7 = vsmask.f32 6400 }
  0x2a   : > { %6212 = vmatpush3.bf16.msra.mxu0 %v7341_v3  ;;  %6264 = vmatpush3.bf16.msra.mxu1 %v7341_v3  ;;  %v632_v22 = vld [vmem:[%s7442_s30] sm:$0xff]   ;;  %v634_v27 = vld [vmem:[%s7442_s30 + $0x8] sm:$0xff]   ;;  %v636_v32 = vld [vmem:[%s7442_s30 + $0x10] sm:$0xff]   ;;  %p1121_p4 = scmp.gt.s32.totalorder %s7360_s16, 0  ;;  %p1228_p5 = scmp.lt.s32.totalorder %s7384_s18, 16 }
  0x2b   : > { %6213 = vmatprep.subr.bf16.mxu0 %v7171_v1  ;;  %6265 = vmatprep.subr.bf16.mxu1 %v7357_v4  ;;  %v638_v34 = vld [vmem:[%s7442_s30 + $0x18] sm:$0xff]   ;;  %v640_v35 = vld [vmem:[%s7442_s30 + $0x20] sm:$0xff]   ;;  %v642_v37 = vld [vmem:[%s7442_s30 + $0x28] sm:$0xff]   ;;  %vm2738_vm8 = vsmask.f32 7424  ;;  %s5951_s17 = sshll.u32 %s7153_s28, 4 }
  0x2c   : > { %940 = vperm.xlu1 %6902, %v599_v10   ;;  %v644_v38 = vld [vmem:[%s7442_s30 + $0x30] sm:$0xff]   ;;  %v646_v39 = vld [vmem:[%s7442_s30 + $0x38] sm:$0xff]   ;;  %v648_v40 = vld [vmem:[%s7442_s30 + $0x40] sm:$0xff]   ;;  %s1195_s24 = scalar_select %p1121_p4, 1, 0 }
  0x2d   : > { %945 = vperm.xlu0 %6901, %v600_v11   ;;  %s571_s22 = scalar_lea.vmem %s9295_s2, %s5590_s21  ;;  %s6822_s21 = smul.u32 3, %s9330_s14  ;;  %v6928_v45 = vld [vmem:[%s9257_s7 + $0x30] sm:$0xff]   ;;  %v6929_v46 = vld [vmem:[%s9257_s7 + $0x60] sm:$0xff]   ;;  %v6930_v47 = vld [vmem:[%s9257_s7 + $0x28] sm:$0xff]   ;;  %vm5202_vm10 = vsmask.f32 3328 }
  0x2e   : > { %6214 = vmatpush3.bf16.msra.mxu0 %v7357_v4  ;;  %6266 = vmatpush3.bf16.msra.mxu1 %v7357_v4  ;;  %v6912_v16 = vld [vmem:[%s571_s22] sm:$0xff]   ;;  %v6913_v24 = vld [vmem:[%s571_s22 + $0x8] ss:$0 sps:$4 sm:$0x11]   ;;  %v6931_v48 = vld [vmem:[%s9257_s7 + $0x58] sm:$0xff]   ;;  %s1196_s16 = scvt.s32.f32 %s1195_s24  ;;  %s9305_s13 = sld [smem:[#allocation19_spill]] }
  0x2f   : > { %6215 = vmatprep.subr.bf16.mxu0 %v7171_v1  ;;  %6267 = vmatprep.subr.bf16.mxu1 %v7380_v9  ;;  %s586_s27 = sadd.s32 %s6822_s21, %s9296_s25  ;;  %v6932_v49 = vld [vmem:[%s9257_s7 + $0x20] sm:$0xff]   ;;  %v6933_v50 = vld [vmem:[%s9257_s7 + $0x50] sm:$0xff]   ;;  %v6934_v51 = vld [vmem:[%s9257_s7 + $0x18] sm:$0xff]   ;;  %vm5203_vm11 = vsmask.f32 7440  ;;  %s546_s25 = sand.u32 1, %s7145_s26  }
  0x30   : > { %950 = vperm.xlu1 %6902, %v601_v14   ;;  %6275 = vmatprep.mubr.bf16.mxu1 %v6912_v16  ;;  %s5595_s14 = sshll.u32 %s586_s27, 2  ;;  %v6935_v52 = vld [vmem:[%s9257_s7 + $0x48] sm:$0xff]   ;;  %v6936_v53 = vld [vmem:[%s9257_s7 + $0x10] sm:$0xff]   ;;  %v6937_v54 = vld [vmem:[%s9257_s7 + $0x40] sm:$0xff]   ;;  %s5581_s27 = sshll.u32 %s546_s25, 6 }
  0x31   : > { %955 = vperm.xlu0 %6901, %v602_v13   ;;  %s7463_s20 = scalar_lea.vmem %s9253_s3, %s5595_s14  ;;  %v6938_v55 = vld [vmem:[%s9257_s7 + $0x8] sm:$0xff]   ;;  %v6943_v56 = vld [vmem:[%s9257_s7] sm:$0xff]   ;;  %vm7639_vm3 = vmor %vm1211_vm1, %vm1212_vm2  ;;  %s8974_s22 = scalar_lea.vmem [#allocation4], %s5581_s27 }
  0x32   : > { %6216 = vmatpush3.bf16.msra.mxu0 %v7380_v9  ;;  %6268 = vmatpush3.bf16.msra.mxu1 %v7380_v9  ;;  %v6918_v25 = vld [vmem:[%s7463_s20] sm:$0xff]   ;;  %v6919_v36 = vld [vmem:[%s7463_s20 + $0x8] ss:$0 sps:$4 sm:$0x11]   ;;  %s7655_s15 = scalar_select %p1228_p5, 1, 0  ;;  %vm8957_vm12 = vmor %vm5202_vm10, %vm5203_vm11 }
  0x33   : > { %6217 = vmatprep.subr.bf16.mxu0 %v7171_v1  ;;  %6269 = vmatprep.subr.bf16.mxu1 %v7400_v12  ;;  %v7604_v57 = vld [vmem:[%s9255_s5] ss:$0 sm:$0xff]  ;;  %s9199_s20 = scalar_lea.sflag [#allocation5], %s546_s25  ;;  %s7176_s29 = smov [#allocation4]  }
  0x34   : > { %960 = vperm.xlu1 %6902, %v603_v18   ;;  %v7610_v59 = vld [vmem:[%s9256_s6] ss:$0 sm:$0xff]  ;;  %s1303_s18 = scvt.s32.f32 %s7655_s15  ;;  %s7081_s23 = sshll.u32 %s7176_s29, 4  ;;  %s7082_s23 = int_to_ptr.vmem [resolvable:$false] %s7081_s23 }
  0x35   : > { %965 = vperm.xlu0 %6901, %v604_v19   ;;  %s7083_s27 = scalar_lea.vmem %s7082_s23, 2048 }
  0x36   : > { %6218 = vmatpush3.bf16.msra.mxu0 %v7400_v12  ;;  %6270 = vmatpush3.bf16.msra.mxu1 %v7400_v12 }
  0x37   : > { %6219 = vmatprep.subr.bf16.mxu0 %v7171_v1  ;;  %6271 = vmatprep.subr.bf16.mxu1 %v7416_v15 }
  0x38   : > { %970 = vperm.xlu1 %6902, %v605_v21  }
  0x39   : > { %975 = vperm.xlu0 %6901, %v606_v20  }
  0x3a   : > { %6220 = vmatpush3.bf16.msra.mxu0 %v7416_v15  ;;  %6272 = vmatpush3.bf16.msra.mxu1 %v7416_v15 }
  0x3b   : > { %6221 = vmatprep.subr.bf16.mxu0 %v7171_v1  ;;  %6273 = vmatprep.subr.bf16.mxu1 %v7432_v17 }
  0x3c   : > { %980 = vperm.xlu1 %6902, %v607_v23  }
  0x3d   : > { %985 = vperm.xlu0 %6901, %v608_v26   ;;  %v1197_v26 = vstv %s1196_s16 }
  0x3e   : > { %6222 = vmatpush3.bf16.msra.mxu0 %v7432_v17  ;;  %6274 = vmatpush3.bf16.msra.mxu1 %v7432_v17 }
  0x3f   : > { %6351 = vmatprep.subr.bf16.mxu0 %v7171_v1  ;;  %6279 = vmatprep.subr.bf16.mxu1 %v7323_v0 }
  0x40   : > { %990 = vperm.xlu1 %6902, %v609_v28  }
  0x41   : > { %6224 = vmatmul.mubr.bf16.vlgmr.msra.gmra.mxu0 %v632_v22  ;;  %6276 = vmatmul.mubr.bf16.vlgmr.msra.gmra.mxu1 %v6913_v24 }
  0x42   : > { %6227 = vmatprep.mubr.msk.bf16.mxu0 %vm7172_vm0, %v7171_v1  ;;  %6280 = vmatpush3.bf16.msra.mxu1 %v7323_v0 }
  0x43   : > { %6295 = vmatprep.mubr.bf16.mxu1 %v6918_v25  ;;  %6281 = vmatprep.subr.bf16.mxu1 %v7329_v2 }
  0x44   : > { %995 = vperm.xlu0 %6901, %v610_v29   ;;  %1000 = vperm.xlu1 %6902, %v611_v30  }
  0x45   : > { %6352 = vmatpush3.bf16.msra.mxu0 %v6926_v43 }
  0x46   : > { %6282 = vmatpush3.bf16.msra.mxu1 %v7329_v2  ;;  %6353 = vmatprep.subr.bf16.mxu0 %v7171_v1 }
  0x47   : > { %6283 = vmatprep.subr.bf16.mxu1 %v7341_v3 }
  0x48   : > { %1005 = vperm.xlu0 %6901, %v612_v31   ;;  %1010 = vperm.xlu1 %6902, %v613_v33  }
  0x49   : > { %6228 = vmatmul.mubr.bf16.gmra.mxu0 %v634_v27 }
  0x4a   : > { %6231 = vmatprep.mubr.msk.bf16.mxu0 %vm7172_vm0, %v7171_v1  ;;  %6284 = vmatpush3.bf16.msra.mxu1 %v7341_v3 }
  0x4b   : > { %6285 = vmatprep.subr.bf16.mxu1 %v7357_v4  ;;  %6354 = vmatpush3.bf16.msra.mxu0 %v6928_v45 }
  0x4c   : > { %6355 = vmatprep.subr.bf16.mxu0 %v7171_v1 }
  0x4e   : > { %6286 = vmatpush3.bf16.msra.mxu1 %v7357_v4 }
  0x4f   : > { %6287 = vmatprep.subr.bf16.mxu1 %v7380_v9  ;;  %6356 = vmatpush3.bf16.msra.mxu0 %v6930_v47 }
  0x50   : > { %6357 = vmatprep.subr.bf16.mxu0 %v7171_v1 }
  0x51   : > { %6232 = vmatmul.mubr.bf16.gmra.mxu0 %v636_v32 }
  0x52   : > { %6235 = vmatprep.mubr.msk.bf16.mxu0 %vm7172_vm0, %v7171_v1  ;;  %6288 = vmatpush3.bf16.msra.mxu1 %v7380_v9 }
  0x53   : > { %6289 = vmatprep.subr.bf16.mxu1 %v7400_v12  ;;  %6358 = vmatpush3.bf16.msra.mxu0 %v6932_v49 }
  0x54   : > { %6359 = vmatprep.subr.bf16.mxu0 %v7171_v1 }
  0x56   : > { %6290 = vmatpush3.bf16.msra.mxu1 %v7400_v12 }
  0x57   : > { %6291 = vmatprep.subr.bf16.mxu1 %v7416_v15  ;;  %6360 = vmatpush3.bf16.msra.mxu0 %v6934_v51 }
  0x58   : > { %6361 = vmatprep.subr.bf16.mxu0 %v7171_v1 }
  0x59   : > { %6236 = vmatmul.mubr.bf16.gmra.mxu0 %v638_v34 }
  0x5a   : > { %6239 = vmatprep.mubr.msk.bf16.mxu0 %vm7172_vm0, %v7171_v1  ;;  %6292 = vmatpush3.bf16.msra.mxu1 %v7416_v15 }
  0x5b   : > { %6293 = vmatprep.subr.bf16.mxu1 %v7432_v17  ;;  %6362 = vmatpush3.bf16.msra.mxu0 %v6936_v53 }
  0x5c   : > { %6363 = vmatprep.subr.bf16.mxu0 %v7171_v1 }
  0x5e   : > { %6294 = vmatpush3.bf16.msra.mxu1 %v7432_v17 }
  0x5f   : > { %6299 = vmatprep.subr.bf16.mxu1 %v7171_v1  ;;  %6364 = vmatpush3.bf16.msra.mxu0 %v6938_v55 }
  0x60   : > { %6365 = vmatprep.subr.bf16.mxu0 %v7171_v1 }
  0x61   : > { %6240 = vmatmul.mubr.bf16.gmra.mxu0 %v640_v35  ;;  %6296 = vmatmul.mubr.bf16.vlgmr.msra.gmra.mxu1 %v6919_v36 }
  0x62   : > { %6243 = vmatprep.mubr.msk.bf16.mxu0 %vm7172_vm0, %v7171_v1  ;;  %6315 = vmatprep.mubr.msk.bf16.mxu1 %vm7172_vm0, %v7171_v1 }
  0x63   : > { %6300 = vmatpush3.bf16.msra.mxu1 %v6924_v41  ;;  %6366 = vmatpush3.bf16.msra.mxu0 %v6943_v56 }
  0x64   : > { %6301 = vmatprep.subr.bf16.mxu1 %v7171_v1  ;;  %6455 = vmatprep.subr.bf16.mxu0 %v7171_v1 }
  0x67   : > { %6302 = vmatpush3.bf16.msra.mxu1 %v6925_v42 }
  0x68   : > { %6303 = vmatprep.subr.bf16.mxu1 %v7171_v1 }
  0x69   : > { %6244 = vmatmul.mubr.bf16.gmra.mxu0 %v642_v37 }
  0x6a   : > { %6247 = vmatprep.mubr.msk.bf16.mxu0 %vm7172_vm0, %v7171_v1 }
  0x6b   : > { %6304 = vmatpush3.bf16.msra.mxu1 %v6927_v44 }
  0x6c   : > { %6305 = vmatprep.subr.bf16.mxu1 %v7171_v1 }
  0x6f   : > { %6306 = vmatpush3.bf16.msra.mxu1 %v6929_v46 }
  0x70   : > { %6307 = vmatprep.subr.bf16.mxu1 %v7171_v1 }
  0x71   : > { %6248 = vmatmul.mubr.bf16.gmra.mxu0 %v644_v38 }
  0x72   : > { %6251 = vmatprep.mubr.msk.bf16.mxu0 %vm7172_vm0, %v7171_v1 }
  0x73   : > { %6308 = vmatpush3.bf16.msra.mxu1 %v6931_v48 }
  0x74   : > { %6309 = vmatprep.subr.bf16.mxu1 %v7171_v1 }
  0x77   : > { %6310 = vmatpush3.bf16.msra.mxu1 %v6933_v50 }
  0x78   : > { %6311 = vmatprep.subr.bf16.mxu1 %v7171_v1 }
  0x79   : > { %6252 = vmatmul.mubr.bf16.gmra.mxu0 %v646_v39 }
  0x7a   : > { %6255 = vmatprep.mubr.msk.bf16.mxu0 %vm7172_vm0, %v7171_v1 }
  0x7b   : > { %6312 = vmatpush3.bf16.msra.mxu1 %v6935_v52 }
  0x7c   : > { %6313 = vmatprep.subr.bf16.mxu1 %v7171_v1 }
  0x7f   : > { %6314 = vmatpush3.bf16.msra.mxu1 %v6937_v54 }
  0x80   : > { %6403 = vmatprep.subr.bf16.mxu1 %v7171_v1 }
  0x81   : > { %6256 = vmatmul.mubr.bf16.gmra.mxu0 %v648_v40 }
  0x82   : > { %6367 = vmatprep.mubr.msk.bf16.mxu0 %vm7172_vm0, %v7171_v1 }
  0xa0   : > { %v7618_v9 = vpop.permute.xlu0 %925 }
  0xa3   : > { %v7624_v19 = vpop.permute.xlu1 %935 }
  0xa4   : > { %v7631_v32 = vpop.permute.xlu0 %930 }
  0xa7   : > { %v941_v56 = vpop.permute.xlu1 %940 }
 0x101   : > { %v786_v58 = vpop.f32.mrf.mxu0  ;;  %v6277_v61 = vpop.f32.mrf.mxu1 }
 0x102   : > { %v863_v60 = vmul.f32 %v7604_v57, %v786_v58  ;;  %v1185_v62 = vmul.f32 %v6277_v61, %v7604_v57  ;;  %v946_v61 = vpop.permute.xlu0 %945 }
 0x103   : > { %v6225_v63 = vpop.f32.mrf.mxu0  ;;  %v1169_v2 = vpop.f32.mrf.mxu1 }
 0x104   : > { %v887_v0 = vadd.f32 %v7610_v59, %v863_v60  ;;  %v1188_v3 = vadd.f32 %v7610_v59, %v1185_v62  ;;  %v1183_v4 = vmul.f32 %v7604_v57, %v1169_v2 }
 0x105   : > { %v789_v5 = vpop.f32.mrf.mxu0  ;;  %v6278_v8 = vpop.f32.mrf.mxu1 }
 0x106   : > { %v905_v6 = vmax.f32 %v887_v0, 0.0  ;;  %v864_v7 = vmul.f32 %v7604_v57, %v789_v5  ;;  %v1191_v10 = vmax.f32 %v1188_v3, 0.0  ;;  %v1186_v11 = vadd.f32 %v7610_v59, %v1183_v4 }
 0x107   : > { %v6226_v12 = vpop.f32.mrf.mxu0  ;;  %v1172_v15 = vpop.f32.mrf.mxu1 }
 0x108   : > { %v1013_v13 = vmul.f32 %v7618_v9, %v905_v6  ;;  %v888_v14 = vadd.f32 %v7610_v59, %v864_v7  ;;  %v1189_v16 = vmax.f32 %v1186_v11, 0.0  ;;  %v1184_v17 = vmul.f32 %v7604_v57, %v1172_v15 }
 0x109   : > { %v794_v18 = vpop.f32.mrf.mxu0  ;;  %v1194_v22 = vmul.f32 %v1191_v10, %v7624_v19 }
 0x10a   : > { %v5927_v20 = vpack.c.bf16 %v1013_v13, %v1013_v13  ;;  %v865_v21 = vmul.f32 %v7604_v57, %v794_v18  ;;  %v1192_v23 = vmul.f32 %v1189_v16, %v7618_v9  ;;  %v1187_v24 = vadd.f32 %v7610_v59, %v1184_v17  ;;  %v951_v18 = vpop.permute.xlu1 %950 }
 0x10b   : > { %v6229_v25 = vpop.f32.mrf.mxu0  ;;  %v906_v27 = vmax.f32 %v888_v14, 0.0  ;;  %v1200_v35 = vmul.f32 %v1197_v26, %v1194_v22 }
 0x10c   : > { %1103 = vst [vmem:[#allocation2 + $0xc] sm:$0xf] %v5927_v20  ;;  %v889_v28 = vadd.f32 %v7610_v59, %v865_v21  ;;  %v1198_v29 = vmul.f32 %v1197_v26, %v1192_v23  ;;  %v1190_v30 = vmax.f32 %v1187_v24, 0.0  ;;  %v956_v23 = vpop.permute.xlu0 %955 }
 0x10d   : > { %v797_v31 = vpop.f32.mrf.mxu0  ;;  %v1014_v39 = vmul.f32 %v7631_v32, %v906_v27  ;;  %v5947_v47 = vpack.c.bf16 %v1200_v35, %v1200_v35 }
 0x10e   : > { %v907_v33 = vmax.f32 %v889_v28, 0.0  ;;  %v866_v34 = vmul.f32 %v7604_v57, %v797_v31  ;;  %v5945_v36 = vpack.c.bf16 %v1198_v29, %v1198_v29  ;;  %v1193_v37 = vmul.f32 %v1190_v30, %v7631_v32 }
 0x10f   : > { %v6230_v38 = vpop.f32.mrf.mxu0  ;;  %v1219_v62 = vrot.slane %v5947_v47, 5 }
 0x110   : > { %v1015_v40 = vmul.f32 %v7624_v19, %v907_v33  ;;  %v890_v41 = vadd.f32 %v7610_v59, %v866_v34  ;;  %v1214_v42 = vrot.slane %v5945_v36, 5  ;;  %v1199_v43 = vmul.f32 %v1197_v26, %v1193_v37 }
 0x111   : > { %v802_v44 = vpop.f32.mrf.mxu0 }
 0x112   : > { %v5955_v45 = vpack.c.bf16 %v1015_v40, %v1014_v39  ;;  %v867_v46 = vmul.f32 %v7604_v57, %v802_v44  ;;  %1224 = vst [vmem:[#allocation2] sm:$0x8] %v1214_v42  ;;  %v5946_v48 = vpack.c.bf16 %v1199_v43, %v1199_v43  ;;  %v908_v51 = vmax.f32 %v890_v41, 0.0 }
 0x113   : > { %v6233_v49 = vpop.f32.mrf.mxu0  ;;  %v1215_v53 = vrot.slane %v1214_v42, 4 }
 0x114   : > { %5992 = vst [vmem:[#allocation2 + $0x10] sm:$0xff] %v5955_v45   ;;  %v891_v52 = vadd.f32 %v7610_v59, %v867_v46  ;;  %v1216_v54 = vrot.slane %v5946_v48, 5  ;;  %v1016_v3 = vmul.f32 %v941_v56, %v908_v51  ;;  %v6942_v45 = vld [vmem:[%s9257_s7 + $0xb8] sm:$0xff]  }
 0x115   : > { %v805_v55 = vpop.f32.mrf.mxu0 }
 0x116   : > { %v909_v58 = vmax.f32 %v891_v52, 0.0  ;;  %v868_v60 = vmul.f32 %v7604_v57, %v805_v55  ;;  %v1217_v63 = vsel %vm7639_vm3, %v1215_v53, %v1216_v54  ;;  %v1218_v0 = vrot.slane %v1216_v54, 4 }
 0x117   : > { %v6234_v2 = vpop.f32.mrf.mxu0  ;;  %1225 = vst [vmem:[#allocation2 + $0x4] sm:$0xf] %v1217_v63 }
 0x118   : > { %v1017_v4 = vmul.f32 %v946_v61, %v909_v58  ;;  %v892_v5 = vadd.f32 %v7610_v59, %v868_v60  ;;  %v1220_v6 = vsel %vm7639_vm3, %v1218_v0, %v1219_v62  ;;  %v961_v60 = vpop.permute.xlu1 %960 }
 0x119   : > { %v810_v7 = vpop.f32.mrf.mxu0  ;;  %1226 = vst [vmem:[#allocation2 + $0x8] sm:$0xf] %v1220_v6  ;;  %v1324_v22 = vld [vmem:[#allocation2] sm:$0xc] }
 0x11a   : > { %v5960_v8 = vpack.c.bf16 %v1017_v4, %v1016_v3  ;;  %v869_v10 = vmul.f32 %v7604_v57, %v810_v7  ;;  %v910_v11 = vmax.f32 %v892_v5, 0.0  ;;  %v1359_v27 = vld [vmem:[#allocation2] sm:$0x8]  ;;  %v966_v3 = vpop.permute.xlu0 %965  ;;  %v7690_v5 = vstv %s1303_s18  ;;  %s5446_s18 = sshll.u32 %s8974_s22, 4  ;;  %s9191_s18 = int_to_ptr.vmem [resolvable:$true] %s5446_s18 }
 0x11b   : > { %v6237_v12 = vpop.f32.mrf.mxu0  ;;  %v7652_v13 = vld [vmem:[#allocation2 + $0x10] sm:$0xff]   ;;  %s7077_s21 = scalar_lea.vmem %s9191_s18, 1024  ;;  %p7084_p10 = scmp.lt.s32.totalorder %s9191_s18, %s7082_s23 }
 0x11c   : > { %5993 = vst [vmem:[#allocation2 + $0x18] sm:$0xff] %v5960_v8   ;;  %v893_v14 = vadd.f32 %v7610_v59, %v869_v10  ;;  %v1629_v16 = vshrl.u32 %v7652_v13, 16  ;;  %v1632_v17 = vshll.u32 %v7652_v13, 16  ;;  %v1018_v24 = vmul.f32 %v951_v18, %v910_v11  ;;  %v6945_v10 = vld [vmem:[%s9257_s7 + $0xb0] sm:$0xff]   ;;  %p7078_p6 = scmp.ne.s32.totalorder %s9191_s18, %s7077_s21  ;;  %p7085_p11 = scmp.lt.s32.totalorder %s7083_s27, %s7077_s21 }
 0x11d   : > { %v813_v15 = vpop.f32.mrf.mxu0 }
 0x11e   : > { %v911_v20 = vmax.f32 %v893_v14, 0.0  ;;  %v870_v21 = vmul.f32 %v7604_v57, %v813_v15  ;;  %v1325_v26 = vld [vmem:[#allocation2 + $0x4] sm:$0xf]  ;;  %v1896_v28 = vrot.slane %v1629_v16, 3  ;;  %v1897_v29 = vrot.slane %v1632_v17, 4  ;;  %p7079_p7 = pnand %p7078_p6, %p7300_p3  ;;  %p7086_p12 = por %p7085_p11, %p7084_p10 }
 0x11f   : > { %v6238_v25 = vpop.f32.mrf.mxu0  ;;  %v7665_v33 = vcombine.low %v1359_v27, %v1325_v26  ;;  %v5678_v34 = vcombine.low %v1324_v22, %v1325_v26 }
 0x120   : > { %v1019_v30 = vmul.f32 %v956_v23, %v911_v20  ;;  %v894_v31 = vadd.f32 %v7610_v59, %v870_v21  ;;  %v7667_v36 = vld [vmem:[#allocation2 + $0x8] sm:$0xff]   ;;  %v7669_v37 = vor.u32 %v1897_v29, %v1896_v28  ;;  %v6954_v25 = vld [vmem:[%s9257_s7 + $0x138] sm:$0xff]   ;;  %v1429_v28 = vrot.slane %v7652_v13, 3  ;;  %p7080_p9 = pneg %p7079_p7 }
 0x121   : > { %v818_v35 = vpop.f32.mrf.mxu0  ;;  %v6297_v40 = vpop.f32.mrf.mxu1  ;;  %v1426_v41 = vrot.slane %v7665_v33, 3  ;;  %v1427_v44 = vrot.slane %v7667_v36, 3  ;;  %v1612_v46 = vshrl.u32 %v5678_v34, 16  ;;  %v1615_v47 = vshll.u32 %v5678_v34, 16  ;;  %v6947_v29 = vld [vmem:[%s9257_s7 + $0xa8] sm:$0xff]  }
 0x122   : > { %v5965_v38 = vpack.c.bf16 %v1019_v30, %v1018_v24  ;;  %v871_v39 = vmul.f32 %v7604_v57, %v818_v35  ;;  %v1292_v42 = vmul.f32 %v6297_v40, %v7604_v57  ;;  %v912_v48 = vmax.f32 %v894_v31, 0.0  ;;  %p7087_p13 = pnand %p7086_p12, %p7080_p9 }
 0x123   : > { %v6241_v43 = vpop.f32.mrf.mxu0  ;;  %v1276_v50 = vpop.f32.mrf.mxu1  ;;  %v1620_v51 = vshrl.u32 %v7667_v36, 16  ;;  %v1623_v52 = vshll.u32 %v7667_v36, 16  ;;  %v1428_v56 = vsel %vm1425_vm4, %v1426_v41, %v1427_v44  ;;  %v1614_v58 = vrot.slane %v1612_v46, 2 }
 0x124   : > { %5994 = vst [vmem:[#allocation2 + $0x20] sm:$0xff] %v5965_v38   ;;  %v895_v49 = vadd.f32 %v7610_v59, %v871_v39  ;;  %v1295_v53 = vadd.f32 %v7610_v59, %v1292_v42  ;;  %v1290_v54 = vmul.f32 %v7604_v57, %v1276_v50  ;;  %6316 = vmatmul.mubr.bf16.vlgmr.msra.gmra.mxu1 %v1428_v56  ;;  %v1617_v0 = vrot.slane %v1615_v47, 3  ;;  %v7719_v38 = vld [vmem:[#allocation2 + $0x18] sm:$0xff]   ;;  %v976_v50 = vpop.permute.xlu0 %975 }
 0x125   : > { %v821_v55 = vpop.f32.mrf.mxu0  ;;  %v6298_v63 = vpop.f32.mrf.mxu1  ;;  %v1622_v2 = vrot.slane %v1620_v51, 2  ;;  %6404 = vmatpush3.bf16.msra.mxu1 %v6942_v45  ;;  %v1625_v8 = vrot.slane %v1623_v52, 3  ;;  %6319 = vmatprep.mubr.msk.bf16.mxu1 %vm7172_vm0, %v7171_v1  ;;  %v1020_v11 = vmul.f32 %v961_v60, %v912_v48  ;;  %v1631_v41 = vrot.slane %v1629_v16, 2  ;;  %v6956_v16 = vld [vmem:[%s9257_s7 + $0x130] sm:$0xff]  }
 0x126   : > { %v913_v61 = vmax.f32 %v895_v49, 0.0  ;;  %v872_v62 = vmul.f32 %v7604_v57, %v821_v55  ;;  %v1298_v4 = vmax.f32 %v1295_v53, 0.0  ;;  %v1293_v6 = vadd.f32 %v7610_v59, %v1290_v54  ;;  %6405 = vmatprep.subr.bf16.mxu1 %v7171_v1 }
 0x127   : > { %v6242_v7 = vpop.f32.mrf.mxu0  ;;  %v1279_v15 = vpop.f32.mrf.mxu1  ;;  %v1618_v18 = vor.u32 %v1617_v0, %v1614_v58  ;;  %v7704_v24 = vor.u32 %v1625_v8, %v1622_v2  ;;  %v1430_v47 = vsel %vm1425_vm4, %v1427_v44, %v1429_v28  ;;  %v1638_v55 = vshrl.u32 %v7719_v38, 16  ;;  %v6949_v58 = vld [vmem:[%s9257_s7 + $0xa0] sm:$0xff]  }
 0x128   : > { %v1021_v12 = vmul.f32 %v966_v3, %v913_v61  ;;  %v896_v14 = vadd.f32 %v7610_v59, %v872_v62  ;;  %v1301_v20 = vmul.f32 %v1298_v4, %v7624_v19  ;;  %v1296_v21 = vmax.f32 %v1293_v6, 0.0  ;;  %v6957_v3 = vld [vmem:[%s9257_s7 + $0x128] sm:$0xff]  }
 0x129   : > { %v1291_v22 = vmul.f32 %v7604_v57, %v1279_v15  ;;  %v826_v23 = vpop.f32.mrf.mxu0  ;;  %v1627_v35 = vsel %vm1610_vm5, %v1618_v18, %v7704_v24  ;;  %6406 = vmatpush3.bf16.msra.mxu1 %v6945_v10  ;;  %v1641_v56 = vshll.u32 %v7719_v38, 16  ;;  %v1431_v2 = vrot.slane %v7719_v38, 3 }
 0x12a   : > { %v5970_v26 = vpack.c.bf16 %v1021_v12, %v1020_v11  ;;  %v873_v27 = vmul.f32 %v7604_v57, %v826_v23  ;;  %v1307_v19 = vmul.f32 %v7690_v5, %v1301_v20  ;;  %v1299_v30 = vmul.f32 %v1296_v21, %v7618_v9  ;;  %6368 = vmatmul.mubr.bf16.vlgmr.msra.gmra.mxu0 %v1627_v35 }
 0x12b   : > { %v1294_v31 = vadd.f32 %v7610_v59, %v1291_v22  ;;  %v6245_v34 = vpop.f32.mrf.mxu0  ;;  %v914_v39 = vmax.f32 %v896_v14, 0.0  ;;  %v1634_v9 = vrot.slane %v1632_v17, 3  ;;  %6407 = vmatprep.subr.bf16.mxu1 %v7171_v1  ;;  %6371 = vmatprep.mubr.msk.bf16.mxu0 %vm7172_vm0, %v7171_v1  ;;  %v971_v17 = vpop.permute.xlu1 %970  ;;  %v1885_v4 = vshrl.u32 %v7665_v33, 16  ;;  %v7759_v8 = vld [vmem:[#allocation2 + $0x20] sm:$0xff]  }
 0x12c   : > { %5995 = vst [vmem:[#allocation2 + $0x28] sm:$0xff] %v5970_v26   ;;  %v897_v40 = vadd.f32 %v7610_v59, %v873_v27  ;;  %v5950_v42 = vpack.c.bf16 %v1307_v19, %v1307_v19  ;;  %v1305_v43 = vmul.f32 %v7690_v5, %v1299_v30  ;;  %6456 = vmatpush3.bf16.msra.mxu0 %v6954_v25  ;;  %v1640_v14 = vrot.slane %v1638_v55, 2  ;;  %v6960_v25 = vld [vmem:[%s9257_s7 + $0x120] sm:$0xff]   ;;  %v986_v19 = vpop.permute.xlu0 %985 }
 0x12d   : > { %v1297_v45 = vmax.f32 %v1294_v31, 0.0  ;;  %v829_v46 = vpop.f32.mrf.mxu0  ;;  %6320 = vmatmul.mubr.bf16.gmra.mxu1 %v1430_v47  ;;  %6457 = vmatprep.subr.bf16.mxu0 %v7171_v1  ;;  %v1022_v60 = vmul.f32 %v971_v17, %v914_v39  ;;  %v7751_v0 = vor.u32 %v1634_v9, %v1631_v41  ;;  %v1643_v15 = vrot.slane %v1641_v56, 3  ;;  %v6961_v9 = vld [vmem:[%s9257_s7 + $0x118] sm:$0xff]  }
 0x12e   : > { %v915_v48 = vmax.f32 %v897_v40, 0.0  ;;  %v874_v49 = vmul.f32 %v7604_v57, %v829_v46  ;;  %1323 = vst [vmem:[#allocation2 + $0x5c] sm:$0x1] %v5950_v42  ;;  %v5948_v53 = vpack.c.bf16 %v1305_v43, %v1305_v43  ;;  %6323 = vmatprep.mubr.msk.bf16.mxu1 %vm7172_vm0, %v7171_v1  ;;  %6408 = vmatpush3.bf16.msra.mxu1 %v6947_v29  ;;  %v1887_v21 = vrot.slane %v1885_v4, 3 }
 0x12f   : > { %v1300_v44 = vmul.f32 %v1297_v45, %v7631_v32  ;;  %v6246_v54 = vpop.f32.mrf.mxu0  ;;  %6409 = vmatprep.subr.bf16.mxu1 %v7171_v1  ;;  %v1636_v12 = vsel %vm1610_vm5, %v7704_v24, %v7751_v0  ;;  %v1888_v22 = vshll.u32 %v7665_v33, 16  ;;  %v1432_v24 = vsel %vm1425_vm4, %v1429_v28, %v1431_v2  ;;  %v981_v26 = vpop.permute.xlu1 %980 }
 0x130   : > { %v1023_v61 = vmul.f32 %v976_v50, %v915_v48  ;;  %v898_v62 = vadd.f32 %v7610_v59, %v874_v49  ;;  %1321 = vst [vmem:[#allocation2 + $0x54] sm:$0xf] %v5948_v53  ;;  %6458 = vmatpush3.bf16.msra.mxu0 %v6956_v16  ;;  %v1892_v33 = vrot.slane %v1620_v51, 3  ;;  %v1647_v13 = vshrl.u32 %v7759_v8, 16  ;;  %v6953_v51 = vld [vmem:[%s9257_s7 + $0x90] sm:$0xff]   ;;  %v6958_v53 = vld [vmem:[%s9257_s7 + $0x88] sm:$0xff]  }
 0x131   : > { %v1306_v32 = vmul.f32 %v7690_v5, %v1300_v44  ;;  %v834_v63 = vpop.f32.mrf.mxu0  ;;  %v6951_v5 = vld [vmem:[%s9257_s7 + $0x98] sm:$0xff]   ;;  %6459 = vmatprep.subr.bf16.mxu0 %v7171_v1  ;;  %v1890_v28 = vrot.slane %v1888_v22, 4  ;;  %v7790_v31 = vor.u32 %v1643_v15, %v1640_v14  ;;  %v1650_v34 = vshll.u32 %v7759_v8, 16 }
 0x132   : > { %v5975_v6 = vpack.c.bf16 %v1023_v61, %v1022_v60  ;;  %v875_v7 = vmul.f32 %v7604_v57, %v834_v63  ;;  %6410 = vmatpush3.bf16.msra.mxu1 %v6949_v58  ;;  %v916_v18 = vmax.f32 %v898_v62, 0.0  ;;  %6372 = vmatmul.mubr.bf16.gmra.mxu0 %v1636_v12  ;;  %v1893_v35 = vrot.slane %v1623_v52, 4  ;;  %v6964_v63 = vld [vmem:[%s9257_s7 + $0x110] sm:$0xff]  }
 0x133   : > { %v5949_v10 = vpack.c.bf16 %v1306_v32, %v1306_v32  ;;  %v6249_v11 = vpop.f32.mrf.mxu0  ;;  %6411 = vmatprep.subr.bf16.mxu1 %v7171_v1  ;;  %6375 = vmatprep.mubr.msk.bf16.mxu0 %vm7172_vm0, %v7171_v1  ;;  %v1891_v42 = vor.u32 %v1890_v28, %v1887_v21  ;;  %v1433_v45 = vrot.slane %v7759_v8, 3  ;;  %v7806_v46 = vld [vmem:[#allocation2 + $0x28] sm:$0xff]   ;;  %v1649_v16 = vrot.slane %v1647_v13, 2 }
 0x134   : > { %5996 = vst [vmem:[#allocation2 + $0x30] sm:$0xff] %v5975_v6   ;;  %v899_v20 = vadd.f32 %v7610_v59, %v875_v7  ;;  %6460 = vmatpush3.bf16.msra.mxu0 %v6957_v3  ;;  %v1024_v39 = vmul.f32 %v981_v26, %v916_v18  ;;  %v1894_v47 = vor.u32 %v1893_v35, %v1892_v33  ;;  %v1900_v17 = vrot.slane %v1638_v55, 3 }
 0x135   : > { %1322 = vst [vmem:[#allocation2 + $0x58] sm:$0xf] %v5949_v10  ;;  %v837_v23 = vpop.f32.mrf.mxu0  ;;  %6324 = vmatmul.mubr.bf16.gmra.mxu1 %v1432_v24  ;;  %6461 = vmatprep.subr.bf16.mxu0 %v7171_v1  ;;  %v1645_v49 = vsel %vm1610_vm5, %v7751_v0, %v7790_v31  ;;  %v1652_v50 = vrot.slane %v1650_v34, 3  ;;  %v1901_v60 = vrot.slane %v1641_v56, 4  ;;  %v1434_v62 = vsel %vm1425_vm4, %v1431_v2, %v1433_v45  ;;  %v991_v0 = vpop.permute.xlu1 %990  ;;  %v6962_v10 = vld [vmem:[%s9257_s7 + $0x80] sm:$0xff]  }
 0x136   : > { %v917_v27 = vmax.f32 %v899_v20, 0.0  ;;  %v876_v29 = vmul.f32 %v7604_v57, %v837_v23  ;;  %6327 = vmatprep.mubr.msk.bf16.mxu1 %vm7172_vm0, %v7171_v1  ;;  %6412 = vmatpush3.bf16.msra.mxu1 %v6951_v5  ;;  %v7821_v44 = vsel %vm1883_vm6, %v1891_v42, %v1894_v47  ;;  %v7825_v54 = vsel %vm1883_vm6, %v1894_v47, %v7669_v37  ;;  %v996_v2 = vpop.permute.xlu0 %995  ;;  %v6965_v23 = vld [vmem:[%s9257_s7 + $0x108] sm:$0xff]  }
 0x137   : > { %v6250_v30 = vpop.f32.mrf.mxu0  ;;  %6413 = vmatprep.subr.bf16.mxu1 %v7171_v1  ;;  %v1656_v32 = vshrl.u32 %v7806_v46, 16  ;;  %v1659_v4 = vshll.u32 %v7806_v46, 16  ;;  %v1902_v38 = vor.u32 %v1901_v60, %v1900_v17  ;;  %v7845_v7 = vor.u32 %v1652_v50, %v1649_v16 }
 0x138   : > { %v1025_v40 = vmul.f32 %v986_v19, %v917_v27  ;;  %v900_v41 = vadd.f32 %v7610_v59, %v876_v29  ;;  %6462 = vmatpush3.bf16.msra.mxu0 %v6960_v25  ;;  %v1904_v11 = vrot.slane %v1647_v13, 3  ;;  %v1435_v21 = vrot.slane %v7806_v46, 3 }
 0x139   : > { %v842_v43 = vpop.f32.mrf.mxu0  ;;  %6463 = vmatprep.subr.bf16.mxu0 %v7171_v1  ;;  %v7858_v18 = vsel %vm1883_vm6, %v7669_v37, %v1902_v38  ;;  %v1658_v22 = vrot.slane %v1656_v32, 2  ;;  %v1905_v24 = vrot.slane %v1650_v34, 4  ;;  %v1661_v26 = vrot.slane %v1659_v4, 3  ;;  %v1001_v35 = vpop.permute.xlu1 %1000 }
 0x13a   : > { %v5980_v36 = vpack.c.bf16 %v1025_v40, %v1024_v39  ;;  %v877_v52 = vmul.f32 %v7604_v57, %v842_v43  ;;  %6414 = vmatpush3.bf16.msra.mxu1 %v6953_v51  ;;  %v918_v55 = vmax.f32 %v900_v41, 0.0  ;;  %6376 = vmatmul.mubr.bf16.gmra.mxu0 %v1645_v49  ;;  %v1908_v37 = vrot.slane %v1656_v32, 3  ;;  %v6967_v41 = vld [vmem:[%s9257_s7 + $0x100] sm:$0xff]   ;;  %v1006_v47 = vpop.permute.xlu0 %1005 }
 0x13b   : > { %v6253_v48 = vpop.f32.mrf.mxu0  ;;  %6415 = vmatprep.subr.bf16.mxu1 %v7171_v1  ;;  %6379 = vmatprep.mubr.msk.bf16.mxu0 %vm7172_vm0, %v7171_v1  ;;  %v7849_v5 = vld [vmem:[#allocation2 + $0x30] sm:$0xff]   ;;  %v1654_v29 = vsel %vm1610_vm5, %v7790_v31, %v7845_v7  ;;  %v1906_v19 = vor.u32 %v1905_v24, %v1904_v11  ;;  %v1909_v51 = vrot.slane %v1659_v4, 4  ;;  %v1436_v31 = vsel %vm1425_vm4, %v1433_v45, %v1435_v21 }
 0x13c   : > { %5997 = vst [vmem:[#allocation2 + $0x38] sm:$0xff] %v5980_v36   ;;  %v901_v58 = vadd.f32 %v7610_v59, %v877_v52  ;;  %6464 = vmatpush3.bf16.msra.mxu0 %v6961_v9  ;;  %v1026_v12 = vmul.f32 %v991_v0, %v918_v55  ;;  %v1665_v13 = vshrl.u32 %v7849_v5, 16  ;;  %v1668_v40 = vshll.u32 %v7849_v5, 16 }
 0x13d   : > { %v845_v61 = vpop.f32.mrf.mxu0  ;;  %6328 = vmatmul.mubr.bf16.gmra.mxu1 %v1434_v62  ;;  %6465 = vmatprep.subr.bf16.mxu0 %v7171_v1  ;;  %v7888_v9 = vsel %vm1883_vm6, %v1902_v38, %v1906_v19  ;;  %v1910_v45 = vor.u32 %v1909_v51, %v1908_v37  ;;  %v1662_v36 = vor.u32 %v1661_v26, %v1658_v22 }
 0x13e   : > { %v919_v3 = vmax.f32 %v901_v58, 0.0  ;;  %v878_v56 = vmul.f32 %v7604_v57, %v845_v61  ;;  %6331 = vmatprep.mubr.msk.bf16.mxu1 %vm7172_vm0, %v7171_v1  ;;  %6416 = vmatpush3.bf16.msra.mxu1 %v6958_v53  ;;  %v1912_v17 = vrot.slane %v1665_v13, 3  ;;  %v1437_v53 = vrot.slane %v7849_v5, 3 }
 0x13f   : > { %v6254_v6 = vpop.f32.mrf.mxu0  ;;  %6417 = vmatprep.subr.bf16.mxu1 %v7171_v1  ;;  %v1667_v55 = vrot.slane %v1665_v13, 2  ;;  %v1913_v58 = vrot.slane %v1668_v40, 4  ;;  %v1670_v62 = vrot.slane %v1668_v40, 3  ;;  %v1663_v0 = vsel %vm1610_vm5, %v7845_v7, %v1662_v36 }
 0x140   : > { %v1027_v14 = vmul.f32 %v996_v2, %v919_v3  ;;  %v902_v15 = vadd.f32 %v7610_v59, %v878_v56  ;;  %6466 = vmatpush3.bf16.msra.mxu0 %v6964_v63  ;;  %v1011_v63 = vpop.permute.xlu1 %1010  ;;  %v1438_v38 = vsel %vm1425_vm4, %v1435_v21, %v1437_v53 }
 0x141   : > { %v850_v20 = vpop.f32.mrf.mxu0  ;;  %6467 = vmatprep.subr.bf16.mxu0 %v7171_v1  ;;  %v1671_v11 = vor.u32 %v1670_v62, %v1667_v55  ;;  %v6973_v55 = vld [vmem:[%s9257_s7 + $0xe8] sm:$0xff]   ;;  %v7980_v62 = vld [vmem:[#allocation2 + $0x14] sm:$0xf] }
 0x142   : > { %v5985_v25 = vpack.c.bf16 %v1027_v14, %v1026_v12  ;;  %v879_v33 = vmul.f32 %v7604_v57, %v850_v20  ;;  %6418 = vmatpush3.bf16.msra.mxu1 %v6962_v10  ;;  %v920_v30 = vmax.f32 %v902_v15, 0.0  ;;  %6380 = vmatmul.mubr.bf16.gmra.mxu0 %v1654_v29 }
 0x143   : > { %v6257_v27 = vpop.f32.mrf.mxu0  ;;  %v7872_v28 = vld [vmem:[#allocation2 + $0x38] sm:$0xff]   ;;  %6507 = vmatprep.subr.bf16.mxu1 %v7171_v1  ;;  %6383 = vmatprep.mubr.msk.bf16.mxu0 %vm7172_vm0, %v7171_v1  ;;  %v1672_v21 = vsel %vm1610_vm5, %v1662_v36, %v1671_v11 }
 0x144   : > { %5998 = vst [vmem:[#allocation2 + $0x40] sm:$0xff] %v5985_v25   ;;  %v903_v34 = vadd.f32 %v7610_v59, %v879_v33  ;;  %6468 = vmatpush3.bf16.msra.mxu0 %v6965_v23  ;;  %v1674_v8 = vshrl.u32 %v7872_v28, 16  ;;  %v1677_v16 = vshll.u32 %v7872_v28, 16  ;;  %v1028_v48 = vmul.f32 %v1001_v35, %v920_v30 }
 0x145   : > { %v853_v39 = vpop.f32.mrf.mxu0  ;;  %6332 = vmatmul.mubr.bf16.gmra.mxu1 %v1436_v31  ;;  %6469 = vmatprep.subr.bf16.mxu0 %v7171_v1  ;;  %v1439_v15 = vrot.slane %v7872_v28, 3 }
 0x146   : > { %v921_v42 = vmax.f32 %v903_v34, 0.0  ;;  %v880_v43 = vmul.f32 %v7604_v57, %v853_v39  ;;  %6335 = vmatprep.mubr.msk.bf16.mxu1 %vm7172_vm0, %v7171_v1  ;;  %v7898_v57 = vsel %vm1883_vm6, %v1906_v19, %v1910_v45  ;;  %v1916_v32 = vrot.slane %v1674_v8, 3 }
 0x147   : > { %v6258_v52 = vpop.f32.mrf.mxu0  ;;  %v1917_v56 = vrot.slane %v1677_v16, 4  ;;  %v1676_v22 = vrot.slane %v1674_v8, 2  ;;  %v1679_v23 = vrot.slane %v1677_v16, 3  ;;  %v1440_v33 = vsel %vm1425_vm4, %v1437_v53, %v1439_v15  ;;  %v6985_v53 = vld [vmem:[%s9257_s7 + $0x178] sm:$0xff]  }
 0x148   : > { %v1029_v49 = vmul.f32 %v1006_v47, %v921_v42  ;;  %v904_v50 = vadd.f32 %v7610_v59, %v880_v43  ;;  %6470 = vmatpush3.bf16.msra.mxu0 %v6967_v41  ;;  %v1914_v59 = vor.u32 %v1913_v58, %v1912_v17  ;;  %v6966_v17 = vld [vmem:[%s9257_s7 + $0xf8] sm:$0xff]  }
 0x149   : > { %6559 = vmatprep.subr.bf16.mxu0 %v7171_v1  ;;  %v1918_v7 = vor.u32 %v1917_v56, %v1916_v32  ;;  %v1680_v27 = vor.u32 %v1679_v23, %v1676_v22  ;;  %v7968_v58 = vld [vmem:[#allocation2 + $0x1c] sm:$0xff]   ;;  %v7982_v32 = vld [vmem:[#allocation2 + $0x18] sm:$0xf]  ;;  %v7994_v56 = vld [vmem:[#allocation2 + $0x2c] sm:$0xff]  }
 0x14a   : > { %v5990_v60 = vpack.c.bf16 %v1029_v49, %v1028_v48  ;;  %v922_v61 = vmax.f32 %v904_v50, 0.0  ;;  %6384 = vmatmul.mubr.bf16.gmra.mxu0 %v1663_v0  ;;  %v7910_v5 = vsel %vm1883_vm6, %v1910_v45, %v1914_v59  ;;  %v7949_v48 = vld [vmem:[#allocation2 + $0x10] sm:$0xf]  ;;  %v7957_v50 = vld [vmem:[#allocation2 + $0xc] sm:$0xf]  ;;  %v8023_v23 = vld [vmem:[#allocation2 + $0x54] sm:$0xff]  }
 0x14b   : > { %v6959_v3 = vld [vmem:[#allocation2 + $0x40] sm:$0xff]   ;;  %6387 = vmatprep.mubr.msk.bf16.mxu0 %vm7172_vm0, %v7171_v1  ;;  %v7915_v46 = vsel %vm1883_vm6, %v1914_v59, %v1918_v7  ;;  %v1681_v30 = vsel %vm1610_vm5, %v1671_v11, %v1680_v27  ;;  %v6970_v49 = vld [vmem:[%s9257_s7 + $0xf0] sm:$0xff]   ;;  %v3348_v59 = vshrl.u32 %v7968_v58, 16 }
 0x14c   : > { %5999 = vst [vmem:[#allocation2 + $0x48] sm:$0xff] %v5990_v60   ;;  %v1030_v4 = vmul.f32 %v1011_v63, %v922_v61  ;;  %v1683_v2 = vshrl.u32 %v6959_v3, 16  ;;  %v1686_v6 = vshll.u32 %v6959_v3, 16  ;;  %v1441_v28 = vrot.slane %v6959_v3, 3  ;;  %v6986_v60 = vld [vmem:[%s9257_s7 + $0x170] sm:$0xff]   ;;  %v6976_v61 = vld [vmem:[%s9257_s7 + $0xe0] sm:$0xff]  }
 0x14d   : > { %6336 = vmatmul.mubr.bf16.gmra.mxu1 %v1438_v38  ;;  %v7986_v63 = vld [vmem:[#allocation2 + $0x18] sm:$0xf]  ;;  %v3085_v0 = vld [vmem:[#allocation2 + $0x14] sm:$0xe]  ;;  %v7988_v3 = vld [vmem:[#allocation2 + $0x24] sm:$0xff]  }
 0x14e   : > { %v5944_v10 = vpack.c.bf16 %v1030_v4, %v1030_v4  ;;  %6339 = vmatprep.mubr.msk.bf16.mxu1 %vm7172_vm0, %v7171_v1  ;;  %v1920_v12 = vrot.slane %v1683_v2, 3  ;;  %v1921_v14 = vrot.slane %v1686_v6, 4  ;;  %v1685_v34 = vrot.slane %v1683_v2, 2  ;;  %v7996_v4 = vld [vmem:[#allocation2 + $0x34] sm:$0xff]   ;;  %v6989_v38 = vld [vmem:[%s9257_s7 + $0x168] sm:$0xff]   ;;  %v8001_v2 = vld [vmem:[#allocation2 + $0x3c] sm:$0xff]  }
 0x14f   : > { %v1688_v51 = vrot.slane %v1686_v6, 3  ;;  %v1442_v31 = vsel %vm1425_vm4, %v1439_v15, %v1441_v28  ;;  %v8011_v11 = vcombine.low %v3085_v0, %v7986_v63  ;;  %v6981_v15 = vld [vmem:[%s9257_s7 + $0xd8] sm:$0xff]   ;;  %v3356_v22 = vshrl.u32 %v7988_v3, 16  ;;  %v6990_v0 = vld [vmem:[%s9257_s7 + $0xc8] sm:$0xff]  }
 0x150   : > { %1120 = vst [vmem:[#allocation2 + $0x50] sm:$0xf] %v5944_v10  ;;  %v1922_v20 = vor.u32 %v1921_v14, %v1920_v12  ;;  %v5745_v10 = vcombine.low %v7980_v62, %v7982_v32 }
 0x151   : > { %v1689_v40 = vor.u32 %v1688_v51, %v1685_v34  ;;  %v3597_v51 = vshrl.u32 %v8011_v11, 16 }
 0x152   : > { %6388 = vmatmul.mubr.bf16.gmra.mxu0 %v1672_v21  ;;  %v7920_v24 = vsel %vm1883_vm6, %v1918_v7, %v1922_v20  ;;  %v8007_v7 = vld [vmem:[#allocation2 + $0x1c] sm:$0xf]  ;;  %v3352_v21 = vshll.u32 %v7988_v3, 16 }
 0x153   : > { %v6996_v25 = vld [vmem:[#allocation2 + $0x48] ss:$0 sps:$4 sm:$0xff]   ;;  %6391 = vmatprep.mubr.msk.bf16.mxu0 %vm7172_vm0, %v7171_v1  ;;  %v1690_v8 = vsel %vm1610_vm5, %v1680_v27, %v1689_v40  ;;  %v6991_v27 = vld [vmem:[%s9257_s7 + $0x160] sm:$0xff]  }
 0x154   : > { %v1925_v26 = vshrl.u32 %v6996_v25, 16  ;;  %v1928_v37 = vshll.u32 %v6996_v25, 16  ;;  %v6963_v35 = vld [vmem:[#allocation2 + $0x48] ss:$0 sps:$4 sm:$0x77]   ;;  %v3604_v25 = vrot.slane %v3348_v59, 1 }
 0x155   : > { %6340 = vmatmul.mubr.bf16.gmra.mxu1 %v1440_v33  ;;  %v1692_v41 = vshrl.u32 %v6963_v35, 16  ;;  %v1695_v42 = vshll.u32 %v6963_v35, 16  ;;  %v1443_v43 = vrot.slane %v6963_v35, 3  ;;  %v8003_v6 = vld [vmem:[#allocation2 + $0x44] sm:$0xff]   ;;  %v3360_v33 = vshll.u32 %v7994_v56, 16 }
 0x156   : > { %6343 = vmatprep.mubr.msk.bf16.mxu1 %vm7172_vm0, %v7171_v1  ;;  %v1927_v29 = vrot.slane %v1925_v26, 3  ;;  %v1930_v13 = vrot.slane %v1928_v37, 4  ;;  %v3364_v26 = vshrl.u32 %v7994_v56, 16  ;;  %v3368_v37 = vshll.u32 %v7996_v4, 16 }
 0x157   : > { %v1694_v45 = vrot.slane %v1692_v41, 2  ;;  %v1697_v47 = vrot.slane %v1695_v42, 3  ;;  %v1444_v36 = vsel %vm1425_vm4, %v1441_v28, %v1443_v43  ;;  %v8013_v12 = vld [vmem:[#allocation2 + $0x4c] sm:$0xff]   ;;  %v3380_v28 = vshrl.u32 %v8001_v2, 16 }
 0x158   : > { %v1931_v19 = vor.u32 %v1930_v13, %v1927_v29  ;;  %v3372_v29 = vshrl.u32 %v7996_v4, 16  ;;  %v3376_v13 = vshll.u32 %v8001_v2, 16  ;;  %v3392_v34 = vshll.u32 %v8013_v12, 16 }
 0x159   : > { %v1698_v52 = vor.u32 %v1697_v47, %v1694_v45  ;;  %v3600_v35 = vshll.u32 %v8011_v11, 16  ;;  %v3608_v42 = vrot.slane %v3356_v22, 1  ;;  %v3599_v43 = vrot.slane %v3597_v51, 1 }
 0x15a   : > { %6392 = vmatmul.mubr.bf16.gmra.mxu0 %v1681_v30  ;;  %v7929_v39 = vsel %vm1883_vm6, %v1922_v20, %v1931_v19  ;;  %v3344_v20 = vshll.u32 %v7968_v58, 16  ;;  %v3384_v19 = vshll.u32 %v8003_v6, 16  ;;  %v3388_v30 = vshrl.u32 %v8003_v6, 16 }
 0x15b   : > { %6395 = vmatprep.mubr.msk.bf16.mxu0 %vm7172_vm0, %v7171_v1  ;;  %v1699_v16 = vsel %vm1610_vm5, %v1689_v40, %v1698_v52  ;;  %v9278_v40 = vshll.u32 %v8023_v23, 16  ;;  %v3609_v45 = vrot.slane %v3352_v21, 2  ;;  %v3612_v47 = vrot.slane %v3364_v26, 1 }
 0x15c   : > { %v3605_v41 = vrot.slane %v3344_v20, 2  ;;  %v9277_v52 = vshrl.u32 %v8023_v23, 16 }
 0x15d   : > { %6344 = vmatmul.mubr.bf16.gmra.mxu1 %v1442_v31  ;;  %v6984_v31 = vld [vmem:[%s9257_s7 + $0xd0] sm:$0xff]  }
 0x15e   : > { %6347 = vmatprep.mubr.msk.bf16.mxu1 %vm7172_vm0, %v7171_v1 }
 0x162   : > { %6396 = vmatmul.mubr.bf16.gmra.mxu0 %v1690_v8  ;;  %v3602_v8 = vrot.slane %v3600_v35, 2 }
 0x163   : > { %6399 = vmatprep.mubr.msk.bf16.mxu0 %vm7172_vm0, %v7171_v1 }
 0x165   : > { %6348 = vmatmul.mubr.bf16.gmra.mxu1 %v1444_v36  ;;  %v6994_v36 = vld [vmem:[%s9257_s7 + $0x158] sm:$0xff]  }
 0x166   : > { %6419 = vmatprep.mubr.msk.bf16.mxu1 %vm7172_vm0, %v7171_v1 }
 0x16a   : > { %6400 = vmatmul.mubr.bf16.gmra.mxu0 %v1699_v16  ;;  %v3606_v16 = vor.u32 %v3605_v41, %v3604_v25  ;;  %v3625_v25 = vrot.slane %v3384_v19, 2 }
 0x16b   : > { %6471 = vmatprep.mubr.msk.bf16.mxu0 %vm7172_vm0, %v7171_v1 }
 0x16d   : > { %6420 = vmatmul.mubr.bf16.vlgmr.msra.gmra.mxu1 %v7821_v44  ;;  %v5744_v44 = vcombine.low %v7957_v50, %v7949_v48 }
 0x16e   : > { %6508 = vmatpush3.bf16.msra.mxu1 %v6966_v17  ;;  %6423 = vmatprep.mubr.msk.bf16.mxu1 %vm7172_vm0, %v7171_v1  ;;  %v3613_v17 = vrot.slane %v3360_v33, 2 }
 0x16f   : > { %6509 = vmatprep.subr.bf16.mxu1 %v7171_v1 }
 0x172   : > { %6510 = vmatpush3.bf16.msra.mxu1 %v6970_v49  ;;  %6472 = vmatmul.mubr.bf16.vlgmr.msra.gmra.mxu0 %v5744_v44  ;;  %v3616_v49 = vrot.slane %v3372_v29, 1  ;;  %v3610_v44 = vor.u32 %v3609_v45, %v3608_v42 }
 0x173   : > { %6511 = vmatprep.subr.bf16.mxu1 %v7171_v1  ;;  %6475 = vmatprep.mubr.msk.bf16.mxu0 %vm7172_vm0, %v7171_v1 }
 0x174   : > { %6560 = vmatpush3.bf16.msra.mxu0 %v6985_v53  ;;  %v3603_v53 = vor.u32 %v3602_v8, %v3599_v43  ;;  %v8089_v51 = vsel %vm3595_vm7, %v3606_v16, %v3610_v44  ;;  %v3629_v8 = vrot.slane %v3392_v34, 2 }
 0x175   : > { %6424 = vmatmul.mubr.bf16.gmra.mxu1 %v7825_v54  ;;  %6561 = vmatprep.subr.bf16.mxu0 %v7171_v1  ;;  %v7990_v54 = vld [vmem:[#allocation2 + $0x20] sm:$0xf] }
 0x176   : > { %6427 = vmatprep.mubr.msk.bf16.mxu1 %vm7172_vm0, %v7171_v1  ;;  %6512 = vmatpush3.bf16.msra.mxu1 %v6973_v55  ;;  %v5746_v14 = vcombine.low %v8007_v7, %v7990_v54  ;;  %v3617_v55 = vrot.slane %v3368_v37, 2 }
 0x177   : > { %6513 = vmatprep.subr.bf16.mxu1 %v7171_v1 }
 0x178   : > { %6562 = vmatpush3.bf16.msra.mxu0 %v6986_v60  ;;  %v3620_v60 = vrot.slane %v3380_v28, 1  ;;  %v3618_v35 = vor.u32 %v3617_v55, %v3616_v49 }
 0x179   : > { %6563 = vmatprep.subr.bf16.mxu0 %v7171_v1 }
 0x17a   : > { %6514 = vmatpush3.bf16.msra.mxu1 %v6976_v61  ;;  %6476 = vmatmul.mubr.bf16.gmra.mxu0 %v5745_v10  ;;  %v7048_v61 = vld [vmem:[#allocation2 + $0x5c] ss:$0 sps:$4 sm:$0x33]   ;;  %v3621_v10 = vrot.slane %v3376_v13, 2 }
 0x17b   : > { %6515 = vmatprep.subr.bf16.mxu1 %v7171_v1  ;;  %6479 = vmatprep.mubr.msk.bf16.mxu0 %vm7172_vm0, %v7171_v1  ;;  %v3640_v55 = vshll.u32 %v7048_v61, 16 }
 0x17c   : > { %6564 = vmatpush3.bf16.msra.mxu0 %v6989_v38  ;;  %v3614_v38 = vor.u32 %v3613_v17, %v3612_v47  ;;  %v3622_v42 = vor.u32 %v3621_v10, %v3620_v60  ;;  %v3632_v47 = vrot.slane %v9277_v52, 1  ;;  %v8112_v17 = vld [vmem:[#allocation2 + $0x28] sm:$0xf]  ;;  %v8126_v10 = vld [vmem:[#allocation2 + $0x24] sm:$0xf] }
 0x17d   : > { %6428 = vmatmul.mubr.bf16.gmra.mxu1 %v7858_v18  ;;  %6565 = vmatprep.subr.bf16.mxu0 %v7171_v1  ;;  %v3396_v18 = vshrl.u32 %v8013_v12, 16  ;;  %v8205_v52 = vld [vmem:[#allocation2 + $0x4c] sm:$0xf] }
 0x17e   : > { %6431 = vmatprep.mubr.msk.bf16.mxu1 %vm7172_vm0, %v7171_v1  ;;  %6516 = vmatpush3.bf16.msra.mxu1 %v6981_v15  ;;  %v3624_v15 = vrot.slane %v3388_v30, 1  ;;  %v8099_v41 = vsel %vm3595_vm7, %v3610_v44, %v3614_v38  ;;  %v8106_v45 = vsel %vm3595_vm7, %v3614_v38, %v3618_v35  ;;  %v8120_v49 = vsel %vm3595_vm7, %v3618_v35, %v3622_v42 }
 0x17f   : > { %6517 = vmatprep.subr.bf16.mxu1 %v7171_v1  ;;  %v5747_v35 = vcombine.low %v8126_v10, %v8112_v17 }
 0x180   : > { %6566 = vmatpush3.bf16.msra.mxu0 %v6991_v27  ;;  %v8086_v27 = vsel %vm3595_vm7, %v3603_v53, %v3606_v16  ;;  %v3626_v43 = vor.u32 %v3625_v25, %v3624_v15  ;;  %v3637_v16 = vshrl.u32 %v7048_v61, 16  ;;  %v3642_v25 = vrot.slane %v3640_v55, 2 }
 0x181   : > { %6567 = vmatprep.subr.bf16.mxu0 %v7171_v1 }
 0x182   : > { %6518 = vmatpush3.bf16.msra.mxu1 %v6984_v31  ;;  %6480 = vmatmul.mubr.bf16.gmra.mxu0 %v5746_v14  ;;  %v3628_v31 = vrot.slane %v3396_v18, 1  ;;  %v6997_v14 = vld [vmem:[%s9257_s7 + $0x150] sm:$0xff]   ;;  %v8123_v53 = vsel %vm3595_vm7, %v3622_v42, %v3626_v43  ;;  %v3639_v38 = vrot.slane %v3637_v16, 1 }
 0x183   : > { %6519 = vmatprep.subr.bf16.mxu1 %v7171_v1  ;;  %6483 = vmatprep.mubr.msk.bf16.mxu0 %vm7172_vm0, %v7171_v1 }
 0x184   : > { %6568 = vmatpush3.bf16.msra.mxu0 %v6994_v36  ;;  %v3633_v36 = vrot.slane %v9278_v40, 2  ;;  %v3630_v44 = vor.u32 %v3629_v8, %v3628_v31  ;;  %v3643_v31 = vor.u32 %v3642_v25, %v3639_v38  ;;  %v8155_v8 = vld [vmem:[#allocation2 + $0x2c] sm:$0xf]  ;;  %v8188_v38 = vld [vmem:[#allocation2 + $0x48] sm:$0xf] }
 0x185   : > { %6432 = vmatmul.mubr.bf16.gmra.mxu1 %v7888_v9  ;;  %6569 = vmatprep.subr.bf16.mxu0 %v7171_v1  ;;  %v6995_v9 = vld [vmem:[%s9257_s7 + $0xc0] sm:$0xff]  }
 0x186   : > { %6435 = vmatprep.mubr.msk.bf16.mxu1 %vm7172_vm0, %v7171_v1  ;;  %6520 = vmatpush3.bf16.msra.mxu1 %v6990_v0  ;;  %v3634_v60 = vor.u32 %v3633_v36, %v3632_v47  ;;  %v7001_v0 = vld [vmem:[%s9257_s7 + $0x148] sm:$0xff]   ;;  %v8132_v15 = vsel %vm3595_vm7, %v3626_v43, %v3630_v44  ;;  %v8151_v43 = vld [vmem:[#allocation2 + $0x30] sm:$0xf]  ;;  %v8167_v36 = vld [vmem:[#allocation2 + $0x34] sm:$0xf] }
 0x187   : > { %6521 = vmatprep.subr.bf16.mxu1 %v7171_v1  ;;  %v5748_v47 = vcombine.low %v8155_v8, %v8151_v43 }
 0x188   : > { %6570 = vmatpush3.bf16.msra.mxu0 %v6997_v14  ;;  %v8138_v61 = vsel %vm3595_vm7, %v3630_v44, %v3634_v60  ;;  %v7003_v14 = vld [vmem:[%s9257_s7 + $0x140] sm:$0xff]   ;;  %v8147_v42 = vsel %vm3595_vm7, %v3634_v60, %v3643_v31  ;;  %v2131_v44 = vld [vmem:[#allocation2 + $0x8] sm:$0x8] }
 0x189   : > { %6571 = vmatprep.subr.bf16.mxu0 %v7171_v1  ;;  %v5761_v60 = vcombine.low %v2131_v44, %v7957_v50 }
 0x18a   : > { %6522 = vmatpush3.bf16.msra.mxu1 %v6995_v9  ;;  %6484 = vmatmul.mubr.bf16.gmra.mxu0 %v5747_v35  ;;  %v8174_v9 = vld [vmem:[#allocation2 + $0x40] sm:$0xf] }
 0x18b   : > { %6611 = vmatprep.subr.bf16.mxu1 %v7171_v1  ;;  %6487 = vmatprep.mubr.msk.bf16.mxu0 %vm7172_vm0, %v7171_v1  ;;  %v2404_v25 = vshrl.u32 %v5761_v60, 16  ;;  %v2407_v35 = vshll.u32 %v5761_v60, 16  ;;  %v7005_v60 = vld [vmem:[#allocation2 + $0x14] sm:$0xff]  }
 0x18c   : > { %6572 = vmatpush3.bf16.msra.mxu0 %v7001_v0  ;;  %v8192_v0 = vld [vmem:[#allocation2 + $0x44] sm:$0xf] }
 0x18d   : > { %6436 = vmatmul.mubr.bf16.gmra.mxu1 %v7898_v57  ;;  %6573 = vmatprep.subr.bf16.mxu0 %v7171_v1  ;;  %v8163_v57 = vld [vmem:[#allocation2 + $0x38] sm:$0xf]  ;;  %v5751_v50 = vcombine.low %v8192_v0, %v8188_v38 }
 0x18e   : > { %6439 = vmatprep.mubr.msk.bf16.mxu1 %vm7172_vm0, %v7171_v1  ;;  %v5749_v16 = vcombine.low %v8167_v36, %v8163_v57 }
 0x190   : > { %6574 = vmatpush3.bf16.msra.mxu0 %v7003_v14 }
 0x191   : > { %6663 = vmatprep.subr.bf16.mxu0 %v7171_v1 }
 0x192   : > { %6488 = vmatmul.mubr.bf16.gmra.mxu0 %v5748_v47  ;;  %v7004_v47 = vld [vmem:[#allocation2 + $0xc] sm:$0xff]  }
 0x193   : > { %6491 = vmatprep.mubr.msk.bf16.mxu0 %vm7172_vm0, %v7171_v1 }
 0x195   : > { %6440 = vmatmul.mubr.bf16.gmra.mxu1 %v7910_v5  ;;  %v8178_v5 = vld [vmem:[#allocation2 + $0x3c] sm:$0xf] }
 0x196   : > { %6443 = vmatprep.mubr.msk.bf16.mxu1 %vm7172_vm0, %v7171_v1  ;;  %v5750_v55 = vcombine.low %v8178_v5, %v8174_v9 }
 0x19a   : > { %6492 = vmatmul.mubr.bf16.gmra.mxu0 %v5749_v16 }
 0x19b   : > { %6495 = vmatprep.mubr.msk.bf16.mxu0 %vm7172_vm0, %v7171_v1 }
 0x19d   : > { %6444 = vmatmul.mubr.bf16.gmra.mxu1 %v7915_v46  ;;  %v5762_v46 = vcombine.low %v7949_v48, %v7980_v62  ;;  %v2406_v48 = vrot.slane %v2404_v25, 3  ;;  %v2409_v62 = vrot.slane %v2407_v35, 4 }
 0x19e   : > { %6447 = vmatprep.mubr.msk.bf16.mxu1 %vm7172_vm0, %v7171_v1 }
 0x19f   : > { %v2412_v31 = vshrl.u32 %v5762_v46, 16  ;;  %v2415_v14 = vshll.u32 %v5762_v46, 16 }
 0x1a1   : > { %v2414_v16 = vrot.slane %v2412_v31, 3  ;;  %v2417_v44 = vrot.slane %v2415_v14, 4  ;;  %v2747_v31 = vshll.u32 %v7005_v60, 16  ;;  %v5764_v14 = vcombine.low %v7990_v54, %v8126_v10  ;;  %v7006_v54 = vld [vmem:[%s9257_s7 + $0x1f0] sm:$0xff]   ;;  %v7007_v10 = vld [vmem:[#allocation2 + $0x1c] sm:$0xff]  }
 0x1a2   : > { %6496 = vmatmul.mubr.bf16.gmra.mxu0 %v5750_v55  ;;  %v8201_v55 = vld [vmem:[#allocation2 + $0x50] sm:$0xf] }
 0x1a3   : > { %6499 = vmatprep.mubr.msk.bf16.mxu0 %vm7172_vm0, %v7171_v1  ;;  %v5752_v25 = vcombine.low %v8205_v52, %v8201_v55  ;;  %v2418_v35 = vor.u32 %v2417_v44, %v2414_v16  ;;  %v2740_v16 = vshrl.u32 %v7004_v47, 16  ;;  %v2749_v44 = vrot.slane %v2747_v31, 1 }
 0x1a4   : > { %v5765_v31 = vcombine.low %v8112_v17, %v8155_v8  ;;  %v8242_v17 = vld [vmem:[#allocation2 + $0x24] sm:$0xff]  }
 0x1a5   : > { %6448 = vmatmul.mubr.bf16.gmra.mxu1 %v7920_v24  ;;  %v5763_v24 = vcombine.low %v7982_v32, %v8007_v7  ;;  %v2410_v32 = vor.u32 %v2409_v62, %v2406_v48  ;;  %v2742_v7 = vshll.u32 %v7004_v47, 16  ;;  %v7010_v8 = vld [vmem:[%s9257_s7 + $0x1e0] sm:$0xff]  }
 0x1a6   : > { %6451 = vmatprep.mubr.msk.bf16.mxu1 %vm7172_vm0, %v7171_v1 }
 0x1a7   : > { %v2421_v46 = vshrl.u32 %v5763_v24, 16  ;;  %v2419_v40 = vsel %vm1883_vm6, %v2410_v32, %v2418_v35  ;;  %v2430_v32 = vshrl.u32 %v5764_v14, 16 }
 0x1a9   : > { %v2423_v48 = vrot.slane %v2421_v46, 3 }
 0x1aa   : > { %6500 = vmatmul.mubr.bf16.gmra.mxu0 %v5751_v50  ;;  %v2424_v50 = vshll.u32 %v5763_v24, 16  ;;  %v2744_v24 = vrot.slane %v2742_v7, 1 }
 0x1ab   : > { %6503 = vmatprep.mubr.msk.bf16.mxu0 %vm7172_vm0, %v7171_v1 }
 0x1ac   : > { %v2426_v62 = vrot.slane %v2424_v50, 4  ;;  %v2745_v7 = vor.u32 %v2744_v24, %v2740_v16  ;;  %v2755_v50 = vshll.u32 %v7007_v10, 16  ;;  %v2432_v24 = vrot.slane %v2430_v32, 3 }
 0x1ad   : > { %6452 = vmatmul.mubr.bf16.gmra.mxu1 %v7929_v39  ;;  %v7002_v39 = vld [vmem:[%s9257_s7 + $0x1f8] sm:$0xff]   ;;  %v2751_v16 = vshrl.u32 %v7005_v60, 16  ;;  %v2442_v32 = vshll.u32 %v5765_v31, 16  ;;  %v7019_v60 = vld [vmem:[%s9257_s7 + $0x1a8] sm:$0xff]  }
 0x1ae   : > { %6523 = vmatprep.mubr.msk.bf16.mxu1 %vm7172_vm0, %v7171_v1  ;;  %v2427_v46 = vor.u32 %v2426_v62, %v2423_v48  ;;  %v2750_v47 = vsel %vm2738_vm8, %v2745_v7, %v2749_v44  ;;  %v7017_v62 = vld [vmem:[%s9257_s7 + $0x1b0] sm:$0xff]  }
 0x1b2   : > { %6504 = vmatmul.mubr.bf16.gmra.mxu0 %v5752_v25  ;;  %v2433_v25 = vshll.u32 %v5764_v14, 16  ;;  %v2428_v14 = vsel %vm1883_vm6, %v2418_v35, %v2427_v46  ;;  %v2439_v35 = vshrl.u32 %v5765_v31, 16 }
 0x1b3   : > { %6575 = vmatprep.mubr.msk.bf16.mxu0 %vm7172_vm0, %v7171_v1 }
 0x1b4   : > { %v2435_v48 = vrot.slane %v2433_v25, 4  ;;  %v2753_v25 = vor.u32 %v2751_v16, %v2749_v44  ;;  %v5766_v44 = vcombine.low %v8151_v43, %v8167_v36  ;;  %v2441_v31 = vrot.slane %v2439_v35, 3  ;;  %v7011_v43 = vld [vmem:[#allocation2 + $0x2c] sm:$0xff]  }
 0x1b5   : > { %6524 = vmatmul.mubr.bf16.vlgmr.msra.gmra.mxu1 %v2419_v40  ;;  %v7016_v40 = vld [vmem:[%s9257_s7 + $0x1b8] sm:$0xff]   ;;  %v7015_v36 = vld [vmem:[%s9257_s7 + $0x1d0] sm:$0xff]  }
 0x1b6   : > { %6612 = vmatpush3.bf16.msra.mxu1 %v7002_v39  ;;  %6527 = vmatprep.mubr.msk.bf16.mxu1 %vm7172_vm0, %v7171_v1  ;;  %v7008_v39 = vld [vmem:[%s9257_s7 + $0x1e8] sm:$0xff]   ;;  %v2436_v7 = vor.u32 %v2435_v48, %v2432_v24  ;;  %v7021_v24 = vld [vmem:[%s9257_s7 + $0x1a0] sm:$0xff]   ;;  %v2759_v48 = vshrl.u32 %v7007_v10, 16  ;;  %v2451_v16 = vshll.u32 %v5766_v44, 16  ;;  %v7023_v10 = vld [vmem:[%s9257_s7 + $0x198] sm:$0xff]  }
 0x1b7   : > { %6613 = vmatprep.subr.bf16.mxu1 %v7171_v1 }
 0x1ba   : > { %6614 = vmatpush3.bf16.msra.mxu1 %v7006_v54  ;;  %6576 = vmatmul.mubr.bf16.vlgmr.msra.gmra.mxu0 %v2750_v47  ;;  %v2757_v54 = vrot.slane %v2755_v50, 1  ;;  %v2763_v47 = vshll.u32 %v8242_v17, 16  ;;  %v7013_v50 = vld [vmem:[%s9257_s7 + $0x1d8] sm:$0xff]  }
 0x1bb   : > { %6615 = vmatprep.subr.bf16.mxu1 %v7171_v1  ;;  %6579 = vmatprep.mubr.msk.bf16.mxu0 %vm7172_vm0, %v7171_v1 }
 0x1bc   : > { %6664 = vmatpush3.bf16.msra.mxu0 %v7016_v40  ;;  %v2758_v40 = vsel %vm2738_vm8, %v2753_v25, %v2757_v54  ;;  %v2771_v25 = vshll.u32 %v7011_v43, 16 }
 0x1bd   : > { %6528 = vmatmul.mubr.bf16.gmra.mxu1 %v2428_v14  ;;  %6665 = vmatprep.subr.bf16.mxu0 %v7171_v1  ;;  %v2444_v14 = vrot.slane %v2442_v32, 4 }
 0x1be   : > { %6531 = vmatprep.mubr.msk.bf16.mxu1 %vm7172_vm0, %v7171_v1  ;;  %6616 = vmatpush3.bf16.msra.mxu1 %v7008_v39  ;;  %v2437_v39 = vsel %vm1883_vm6, %v2427_v46, %v2436_v7  ;;  %v2448_v46 = vshrl.u32 %v5766_v44, 16  ;;  %v7025_v44 = vld [vmem:[%s9257_s7 + $0x190] sm:$0xff]  }
 0x1bf   : > { %6617 = vmatprep.subr.bf16.mxu1 %v7171_v1  ;;  %v2445_v35 = vor.u32 %v2444_v14, %v2441_v31  ;;  %v2773_v31 = vrot.slane %v2771_v25, 1  ;;  %v2775_v25 = vshrl.u32 %v7011_v43, 16 }
 0x1c0   : > { %6666 = vmatpush3.bf16.msra.mxu0 %v7017_v62  ;;  %v2765_v62 = vrot.slane %v2763_v47, 1  ;;  %v2450_v47 = vrot.slane %v2448_v46, 3 }
 0x1c1   : > { %6667 = vmatprep.subr.bf16.mxu0 %v7171_v1 }
 0x1c2   : > { %6618 = vmatpush3.bf16.msra.mxu1 %v7010_v8  ;;  %6580 = vmatmul.mubr.bf16.gmra.mxu0 %v2758_v40  ;;  %v2761_v8 = vor.u32 %v2759_v48, %v2757_v54  ;;  %v5767_v54 = vcombine.low %v8163_v57, %v8178_v5  ;;  %v2446_v40 = vsel %vm1883_vm6, %v2436_v7, %v2445_v35  ;;  %v7012_v57 = vld [vmem:[#allocation2 + $0x34] sm:$0xff]   ;;  %v7024_v5 = vld [vmem:[%s9257_s7 + $0x1c0] sm:$0xff]  }
 0x1c3   : > { %6619 = vmatprep.subr.bf16.mxu1 %v7171_v1  ;;  %6583 = vmatprep.mubr.msk.bf16.mxu0 %vm7172_vm0, %v7171_v1  ;;  %v2779_v46 = vshll.u32 %v7012_v57, 16 }
 0x1c4   : > { %6668 = vmatpush3.bf16.msra.mxu0 %v7019_v60  ;;  %v2766_v32 = vsel %vm2738_vm8, %v2761_v8, %v2765_v62  ;;  %v7020_v60 = vld [vmem:[%s9257_s7 + $0x1c8] sm:$0xff]   ;;  %v2457_v7 = vshrl.u32 %v5767_v54, 16  ;;  %v2460_v14 = vshll.u32 %v5767_v54, 16  ;;  %v2777_v54 = vor.u32 %v2775_v25, %v2773_v31 }
 0x1c5   : > { %6532 = vmatmul.mubr.bf16.gmra.mxu1 %v2437_v39  ;;  %6669 = vmatprep.subr.bf16.mxu0 %v7171_v1  ;;  %v2767_v39 = vshrl.u32 %v8242_v17, 16  ;;  %v7027_v17 = vld [vmem:[%s9257_s7 + $0x188] sm:$0xff]  }
 0x1c6   : > { %6535 = vmatprep.mubr.msk.bf16.mxu1 %vm7172_vm0, %v7171_v1  ;;  %6620 = vmatpush3.bf16.msra.mxu1 %v7013_v50  ;;  %v2453_v50 = vrot.slane %v2451_v16, 4  ;;  %v5768_v16 = vcombine.low %v8174_v9, %v8192_v0  ;;  %v2459_v8 = vrot.slane %v2457_v7, 3  ;;  %v7014_v9 = vld [vmem:[#allocation2 + $0x3c] sm:$0xff]   ;;  %v7022_v25 = vld [vmem:[#allocation2 + $0x4c] sm:$0xff]  }
 0x1c7   : > { %6621 = vmatprep.subr.bf16.mxu1 %v7171_v1 }
 0x1c8   : > { %6670 = vmatpush3.bf16.msra.mxu0 %v7021_v24  ;;  %v2769_v24 = vor.u32 %v2767_v39, %v2765_v62  ;;  %v2454_v48 = vor.u32 %v2453_v50, %v2450_v47  ;;  %v2466_v0 = vshrl.u32 %v5768_v16, 16  ;;  %v2787_v50 = vshll.u32 %v7014_v9, 16 }
 0x1c9   : > { %6671 = vmatprep.subr.bf16.mxu0 %v7171_v1 }
 0x1ca   : > { %6622 = vmatpush3.bf16.msra.mxu1 %v7015_v36  ;;  %6584 = vmatmul.mubr.bf16.gmra.mxu0 %v2766_v32  ;;  %v2774_v36 = vsel %vm2738_vm8, %v2769_v24, %v2773_v31  ;;  %v2455_v62 = vsel %vm1883_vm6, %v2445_v35, %v2454_v48  ;;  %v7031_v32 = vld [vmem:[%s9257_s7 + $0x180] sm:$0xff]   ;;  %v2469_v35 = vshll.u32 %v5768_v16, 16  ;;  %v2468_v39 = vrot.slane %v2466_v0, 3 }
 0x1cb   : > { %6623 = vmatprep.subr.bf16.mxu1 %v7171_v1  ;;  %6587 = vmatprep.mubr.msk.bf16.mxu0 %vm7172_vm0, %v7171_v1  ;;  %v2783_v31 = vshrl.u32 %v7012_v57, 16  ;;  %v2789_v7 = vrot.slane %v2787_v50, 1  ;;  %v2803_v50 = vshll.u32 %v7022_v25, 16 }
 0x1cc   : > { %6672 = vmatpush3.bf16.msra.mxu0 %v7023_v10  ;;  %v2462_v10 = vrot.slane %v2460_v14, 4  ;;  %v7018_v14 = vld [vmem:[#allocation2 + $0x44] sm:$0xff]  }
 0x1cd   : > { %6536 = vmatmul.mubr.bf16.gmra.mxu1 %v2446_v40  ;;  %6673 = vmatprep.subr.bf16.mxu0 %v7171_v1 }
 0x1ce   : > { %6539 = vmatprep.mubr.msk.bf16.mxu1 %vm7172_vm0, %v7171_v1  ;;  %6624 = vmatpush3.bf16.msra.mxu1 %v7020_v60  ;;  %v2781_v60 = vrot.slane %v2779_v46, 1  ;;  %v2463_v40 = vor.u32 %v2462_v10, %v2459_v8  ;;  %v2791_v10 = vshrl.u32 %v7014_v9, 16 }
 0x1cf   : > { %6625 = vmatprep.subr.bf16.mxu1 %v7171_v1 }
 0x1d0   : > { %6674 = vmatpush3.bf16.msra.mxu0 %v7025_v44  ;;  %v2782_v47 = vsel %vm2738_vm8, %v2777_v54, %v2781_v60  ;;  %v5769_v44 = vcombine.low %v8188_v38, %v8205_v52  ;;  %v2464_v43 = vsel %vm1883_vm6, %v2454_v48, %v2463_v40  ;;  %v2795_v38 = vshll.u32 %v7018_v14, 16 }
 0x1d1   : > { %6675 = vmatprep.subr.bf16.mxu0 %v7171_v1  ;;  %v5770_v48 = vcombine.low %v8201_v55, %v8201_v55  ;;  %v2793_v54 = vor.u32 %v2791_v10, %v2789_v7 }
 0x1d2   : > { %6626 = vmatpush3.bf16.msra.mxu1 %v7024_v5  ;;  %6588 = vmatmul.mubr.bf16.gmra.mxu0 %v2774_v36  ;;  %v2471_v5 = vrot.slane %v2469_v35, 4  ;;  %v2475_v24 = vshrl.u32 %v5769_v44, 16  ;;  %v2785_v36 = vor.u32 %v2783_v31, %v2781_v60 }
 0x1d3   : > { %6715 = vmatprep.subr.bf16.mxu1 %v7171_v1  ;;  %6591 = vmatprep.mubr.msk.bf16.mxu0 %vm7172_vm0, %v7171_v1  ;;  %v2484_v0 = vshrl.u32 %v5770_v48, 16  ;;  %v2487_v35 = vshll.u32 %v5770_v48, 16 }
 0x1d4   : > { %6676 = vmatpush3.bf16.msra.mxu0 %v7027_v17  ;;  %v2478_v17 = vshll.u32 %v5769_v44, 16  ;;  %v2472_v46 = vor.u32 %v2471_v5, %v2468_v39  ;;  %v2790_v52 = vsel %vm2738_vm8, %v2785_v36, %v2789_v7  ;;  %v2477_v57 = vrot.slane %v2475_v24, 3 }
 0x1d5   : > { %6540 = vmatmul.mubr.bf16.gmra.mxu1 %v2455_v62  ;;  %6677 = vmatprep.subr.bf16.mxu0 %v7171_v1  ;;  %v2486_v39 = vrot.slane %v2484_v0, 3  ;;  %v2489_v5 = vrot.slane %v2487_v35, 4  ;;  %v2799_v7 = vshrl.u32 %v7018_v14, 16  ;;  %v2805_v36 = vrot.slane %v2803_v50, 1 }
 0x1d6   : > { %6543 = vmatprep.mubr.msk.bf16.mxu1 %vm7172_vm0, %v7171_v1  ;;  %v2473_v16 = vsel %vm1883_vm6, %v2463_v40, %v2472_v46  ;;  %v2480_v62 = vrot.slane %v2478_v17, 4 }
 0x1d8   : > { %6678 = vmatpush3.bf16.msra.mxu0 %v7031_v32  ;;  %v2797_v32 = vrot.slane %v2795_v38, 1  ;;  %v2481_v55 = vor.u32 %v2480_v62, %v2477_v57  ;;  %v2490_v57 = vor.u32 %v2489_v5, %v2486_v39  ;;  %v7026_v62 = vld [vmem:[#allocation2 + $0x54] ss:$0 sps:$4 sm:$0x11]  }
 0x1d9   : > { %6767 = vmatprep.subr.bf16.mxu0 %v7171_v1 }
 0x1da   : > { %6592 = vmatmul.mubr.bf16.gmra.mxu0 %v2782_v47  ;;  %v2798_v40 = vsel %vm2738_vm8, %v2793_v54, %v2797_v32  ;;  %v2482_v31 = vsel %vm1883_vm6, %v2472_v46, %v2481_v55 }
 0x1db   : > { %6595 = vmatprep.mubr.msk.bf16.mxu0 %vm7172_vm0, %v7171_v1 }
 0x1dd   : > { %6544 = vmatmul.mubr.bf16.gmra.mxu1 %v2464_v43 }
 0x1de   : > { %6547 = vmatprep.mubr.msk.bf16.mxu1 %vm7172_vm0, %v7171_v1 }
 0x1e2   : > { %6596 = vmatmul.mubr.bf16.gmra.mxu0 %v2790_v52 }
 0x1e3   : > { %6599 = vmatprep.mubr.msk.bf16.mxu0 %vm7172_vm0, %v7171_v1 }
 0x1e4   : > { %v1536_v8 = vpop.f32.mrf.mxu1 }
 0x1e5   : > { %6548 = vmatmul.mubr.bf16.gmra.mxu1 %v2473_v16  ;;  %v2801_v16 = vor.u32 %v2799_v7, %v2797_v32  ;;  %v2807_v32 = vshrl.u32 %v7022_v25, 16 }
 0x1e6   : > { %6551 = vmatprep.mubr.msk.bf16.mxu1 %vm7172_vm0, %v7171_v1  ;;  %v6317_v60 = vpop.f32.mrf.mxu1 }
 0x1e7   : > { %v2806_v10 = vsel %vm2738_vm8, %v2801_v16, %v2805_v36  ;;  %v3049_v60 = vld [vmem:[#allocation2 + $0x14] sm:$0xf] }
 0x1e8   : > { %v1539_v47 = vpop.f32.mrf.mxu1  ;;  %v5863_v14 = vcombine.low %v3049_v60, %v7986_v63  ;;  %v3346_v60 = vrot.slane %v3344_v20, 1 }
 0x1ea   : > { %v1791_v44 = vpop.f32.mrf.mxu0  ;;  %6600 = vmatmul.mubr.bf16.gmra.mxu0 %v2798_v40  ;;  %v6318_v43 = vpop.f32.mrf.mxu1  ;;  %v2491_v40 = vsel %vm1883_vm6, %v2481_v55, %v2490_v57  ;;  %v3339_v55 = vshll.u32 %v5863_v14, 16 }
 0x1eb   : > { %v8333_v9 = vadd.f32 %v1791_v44, %v1536_v8  ;;  %6603 = vmatprep.mubr.msk.bf16.mxu0 %vm7172_vm0, %v7171_v1  ;;  %v2809_v43 = vor.u32 %v2807_v32, %v2805_v36  ;;  %v7030_v36 = vld [vmem:[%s9257_s7 + $0x238] sm:$0xff]  }
 0x1ec   : > { %v6369_v24 = vpop.f32.mrf.mxu0 }
 0x1ed   : > { %v1544_v17 = vpop.f32.mrf.mxu1  ;;  %6552 = vmatmul.mubr.bf16.gmra.mxu1 %v2482_v31  ;;  %v3153_v24 = vrot.slane %v7968_v58, 1 }
 0x1ee   : > { %6555 = vmatprep.mubr.msk.bf16.mxu1 %vm7172_vm0, %v7171_v1  ;;  %v1794_v52 = vpop.f32.mrf.mxu0 }
 0x1ef   : > { %v6321_v38 = vpop.f32.mrf.mxu1  ;;  %v8340_v48 = vadd.f32 %v1794_v52, %v1539_v47  ;;  %v2811_v47 = vshll.u32 %v7026_v62, 16  ;;  %v3152_v52 = vrot.slane %v8011_v11, 1  ;;  %v3337_v11 = vshrl.u32 %v5863_v14, 16 }
 0x1f0   : > { %v6370_v8 = vpop.f32.mrf.mxu0 }
 0x1f1   : > { %v1547_v46 = vpop.f32.mrf.mxu1  ;;  %v2813_v63 = vrot.slane %v2811_v47, 1  ;;  %v3154_v62 = vsel %vm3151_vm9, %v3152_v52, %v3153_v24  ;;  %v3341_v8 = vrot.slane %v3339_v55, 1  ;;  %v7038_v52 = vld [vmem:[%s9257_s7 + $0x220] sm:$0xff]  }
 0x1f2   : > { %v1799_v0 = vpop.f32.mrf.mxu0  ;;  %6604 = vmatmul.mubr.bf16.gmra.mxu0 %v2806_v10 }
 0x1f3   : > { %v6322_v35 = vpop.f32.mrf.mxu1  ;;  %v8344_v54 = vadd.f32 %v1799_v0, %v1544_v17  ;;  %6607 = vmatprep.mubr.msk.bf16.mxu0 %vm7172_vm0, %v7171_v1  ;;  %v2814_v25 = vsel %vm2738_vm8, %v2809_v43, %v2813_v63  ;;  %v7034_v0 = vld [vmem:[%s9257_s7 + $0x230] sm:$0xff]   ;;  %v3342_v47 = vor.u32 %v3341_v8, %v3337_v11  ;;  %v7036_v43 = vld [vmem:[%s9257_s7 + $0x228] sm:$0xff]  }
 0x1f4   : > { %v6373_v50 = vpop.f32.mrf.mxu0 }
 0x1f5   : > { %v1552_v44 = vpop.f32.mrf.mxu1  ;;  %6556 = vmatmul.mubr.bf16.gmra.mxu1 %v2491_v40  ;;  %v3155_v50 = vrot.slane %v7988_v3, 1  ;;  %v3347_v20 = vsel %vm2738_vm8, %v3342_v47, %v3346_v60  ;;  %v7042_v47 = vld [vmem:[%s9257_s7 + $0x210] sm:$0xff]  }
 0x1f6   : > { %6627 = vmatprep.mubr.msk.bf16.mxu1 %vm7172_vm0, %v7171_v1  ;;  %v1802_v39 = vpop.f32.mrf.mxu0 }
 0x1f7   : > { %v6325_v5 = vpop.f32.mrf.mxu1  ;;  %v8351_v31 = vadd.f32 %v1802_v39, %v1547_v46  ;;  %v3156_v55 = vsel %vm3151_vm9, %v3153_v24, %v3155_v50 }
 0x1f8   : > { %v6374_v17 = vpop.f32.mrf.mxu0 }
 0x1f9   : > { %v1555_v7 = vpop.f32.mrf.mxu1 }
 0x1fa   : > { %v1807_v38 = vpop.f32.mrf.mxu0  ;;  %6608 = vmatmul.mubr.bf16.gmra.mxu0 %v2814_v25  ;;  %v3354_v25 = vrot.slane %v3352_v21, 1 }
 0x1fb   : > { %v6326_v16 = vpop.f32.mrf.mxu1  ;;  %v8359_v57 = vadd.f32 %v1807_v38, %v1552_v44  ;;  %6679 = vmatprep.mubr.msk.bf16.mxu0 %vm7172_vm0, %v7171_v1 }
 0x1fc   : > { %v6377_v46 = vpop.f32.mrf.mxu0  ;;  %v3350_v16 = vor.u32 %v3348_v59, %v3346_v60 }
 0x1fd   : > { %v1560_v10 = vpop.f32.mrf.mxu1  ;;  %6628 = vmatmul.mubr.bf16.vlgmr.msra.gmra.mxu1 %v3154_v62  ;;  %v3157_v62 = vrot.slane %v7994_v56, 1 }
 0x1fe   : > { %6716 = vmatpush3.bf16.msra.mxu1 %v7030_v36  ;;  %6631 = vmatprep.mubr.msk.bf16.mxu1 %vm7172_vm0, %v7171_v1  ;;  %v1810_v35 = vpop.f32.mrf.mxu0  ;;  %v3355_v46 = vsel %vm2738_vm8, %v3350_v16, %v3354_v25 }
 0x1ff   : > { %v6329_v40 = vpop.f32.mrf.mxu1  ;;  %6717 = vmatprep.subr.bf16.mxu1 %v7171_v1  ;;  %v8372_v32 = vadd.f32 %v1810_v35, %v1555_v7  ;;  %v3158_v58 = vsel %vm3151_vm9, %v3155_v50, %v3157_v62 }
 0x200   : > { %v6378_v14 = vpop.f32.mrf.mxu0  ;;  %v3362_v40 = vrot.slane %v3360_v33, 1 }
 0x201   : > { %v1563_v44 = vpop.f32.mrf.mxu1 }
 0x202   : > { %6718 = vmatpush3.bf16.msra.mxu1 %v7034_v0  ;;  %v1815_v39 = vpop.f32.mrf.mxu0  ;;  %6680 = vmatmul.mubr.bf16.vlgmr.msra.gmra.mxu0 %v3347_v20  ;;  %v3358_v20 = vor.u32 %v3356_v22, %v3354_v25 }
 0x203   : > { %v6330_v5 = vpop.f32.mrf.mxu1  ;;  %6719 = vmatprep.subr.bf16.mxu1 %v7171_v1  ;;  %v8380_v63 = vadd.f32 %v1815_v39, %v1560_v10  ;;  %6683 = vmatprep.mubr.msk.bf16.mxu0 %vm7172_vm0, %v7171_v1  ;;  %v7040_v10 = vld [vmem:[%s9257_s7 + $0x218] sm:$0xff]  }
 0x204   : > { %v6381_v17 = vpop.f32.mrf.mxu0  ;;  %v3363_v5 = vsel %vm2738_vm8, %v3358_v20, %v3362_v40 }
 0x205   : > { %v1568_v7 = vpop.f32.mrf.mxu1  ;;  %6632 = vmatmul.mubr.bf16.gmra.mxu1 %v3156_v55  ;;  %v7044_v55 = vld [vmem:[%s9257_s7 + $0x208] sm:$0xff]  }
 0x206   : > { %6635 = vmatprep.mubr.msk.bf16.mxu1 %vm7172_vm0, %v7171_v1  ;;  %6720 = vmatpush3.bf16.msra.mxu1 %v7036_v43  ;;  %v1818_v36 = vpop.f32.mrf.mxu0  ;;  %v3159_v43 = vrot.slane %v7996_v4, 1  ;;  %v3386_v4 = vrot.slane %v3384_v19, 1 }
 0x207   : > { %v6333_v38 = vpop.f32.mrf.mxu1  ;;  %6721 = vmatprep.subr.bf16.mxu1 %v7171_v1  ;;  %v8393_v24 = vadd.f32 %v1818_v36, %v1563_v44  ;;  %v3370_v36 = vrot.slane %v3368_v37, 1 }
 0x208   : > { %v6382_v21 = vpop.f32.mrf.mxu0  ;;  %v3160_v3 = vsel %vm3151_vm9, %v3157_v62, %v3159_v43  ;;  %v7046_v38 = vld [vmem:[%s9257_s7 + $0x200] sm:$0xff]  }
 0x209   : > { %v1571_v8 = vpop.f32.mrf.mxu1  ;;  %v3374_v20 = vor.u32 %v3372_v29, %v3370_v36 }
 0x20a   : > { %6722 = vmatpush3.bf16.msra.mxu1 %v7038_v52  ;;  %v1823_v11 = vpop.f32.mrf.mxu0  ;;  %6684 = vmatmul.mubr.bf16.gmra.mxu0 %v3355_v46  ;;  %v3161_v46 = vrot.slane %v8001_v2, 1 }
 0x20b   : > { %v6334_v0 = vpop.f32.mrf.mxu1  ;;  %6723 = vmatprep.subr.bf16.mxu1 %v7171_v1  ;;  %v8403_v35 = vadd.f32 %v1823_v11, %v1568_v7  ;;  %6687 = vmatprep.mubr.msk.bf16.mxu0 %vm7172_vm0, %v7171_v1 }
 0x20c   : > { %v6385_v59 = vpop.f32.mrf.mxu0 }
 0x20d   : > { %v1576_v60 = vpop.f32.mrf.mxu1  ;;  %6636 = vmatmul.mubr.bf16.gmra.mxu1 %v3158_v58 }
 0x20e   : > { %6639 = vmatprep.mubr.msk.bf16.mxu1 %vm7172_vm0, %v7171_v1  ;;  %6724 = vmatpush3.bf16.msra.mxu1 %v7040_v10  ;;  %v1826_v14 = vpop.f32.mrf.mxu0 }
 0x20f   : > { %v6337_v44 = vpop.f32.mrf.mxu1  ;;  %6725 = vmatprep.subr.bf16.mxu1 %v7171_v1  ;;  %v8416_v50 = vadd.f32 %v1826_v14, %v1571_v8  ;;  %v3366_v8 = vor.u32 %v3364_v26, %v3362_v40  ;;  %v3378_v26 = vrot.slane %v3376_v13, 1 }
 0x210   : > { %v6386_v33 = vpop.f32.mrf.mxu0 }
 0x211   : > { %v1579_v39 = vpop.f32.mrf.mxu1  ;;  %v3371_v11 = vsel %vm2738_vm8, %v3366_v8, %v3370_v36 }
 0x212   : > { %6726 = vmatpush3.bf16.msra.mxu1 %v7042_v47  ;;  %v1831_v17 = vpop.f32.mrf.mxu0  ;;  %6688 = vmatmul.mubr.bf16.gmra.mxu0 %v3363_v5  ;;  %v3379_v5 = vsel %vm2738_vm8, %v3374_v20, %v3378_v26 }
 0x213   : > { %v6338_v7 = vpop.f32.mrf.mxu1  ;;  %6727 = vmatprep.subr.bf16.mxu1 %v7171_v1  ;;  %v8426_v52 = vadd.f32 %v1831_v17, %v1576_v60  ;;  %6691 = vmatprep.mubr.msk.bf16.mxu0 %vm7172_vm0, %v7171_v1  ;;  %v3162_v60 = vsel %vm3151_vm9, %v3159_v43, %v3161_v46  ;;  %v3163_v43 = vrot.slane %v8003_v6, 1 }
 0x214   : > { %v6389_v22 = vpop.f32.mrf.mxu0 }
 0x215   : > { %v1584_v25 = vpop.f32.mrf.mxu1  ;;  %6640 = vmatmul.mubr.bf16.gmra.mxu1 %v3160_v3  ;;  %v3164_v7 = vsel %vm3151_vm9, %v3161_v46, %v3163_v43 }
 0x216   : > { %6643 = vmatprep.mubr.msk.bf16.mxu1 %vm7172_vm0, %v7171_v1  ;;  %6728 = vmatpush3.bf16.msra.mxu1 %v7044_v55  ;;  %v1834_v16 = vpop.f32.mrf.mxu0 }
 0x217   : > { %v6341_v21 = vpop.f32.mrf.mxu1  ;;  %6729 = vmatprep.subr.bf16.mxu1 %v7171_v1  ;;  %v8439_v62 = vadd.f32 %v1834_v16, %v1579_v39  ;;  %v7066_v16 = vld [vmem:[#allocation2 + $0x4c] sm:$0xff]  }
 0x218   : > { %v6390_v37 = vpop.f32.mrf.mxu0  ;;  %v3165_v21 = vrot.slane %v7066_v16, 1 }
 0x219   : > { %v1587_v10 = vpop.f32.mrf.mxu1 }
 0x21a   : > { %6730 = vmatpush3.bf16.msra.mxu1 %v7046_v38  ;;  %v1839_v0 = vpop.f32.mrf.mxu0  ;;  %6692 = vmatmul.mubr.bf16.gmra.mxu0 %v3371_v11  ;;  %v3382_v38 = vor.u32 %v3380_v28, %v3378_v26  ;;  %v3394_v28 = vrot.slane %v3392_v34, 1 }
 0x21b   : > { %v6342_v58 = vpop.f32.mrf.mxu1  ;;  %v8445_v59 = vadd.f32 %v1839_v0, %v1584_v25  ;;  %6695 = vmatprep.mubr.msk.bf16.mxu0 %vm7172_vm0, %v7171_v1  ;;  %v3166_v0 = vsel %vm3151_vm9, %v3163_v43, %v3165_v21 }
 0x21c   : > { %v6393_v47 = vpop.f32.mrf.mxu0  ;;  %v3387_v37 = vsel %vm2738_vm8, %v3382_v38, %v3386_v4 }
 0x21d   : > { %v1592_v56 = vpop.f32.mrf.mxu1  ;;  %6644 = vmatmul.mubr.bf16.gmra.mxu1 %v3162_v60 }
 0x21e   : > { %6647 = vmatprep.mubr.msk.bf16.mxu1 %vm7172_vm0, %v7171_v1  ;;  %v1842_v40 = vpop.f32.mrf.mxu0 }
 0x21f   : > { %v6345_v14 = vpop.f32.mrf.mxu1  ;;  %v8454_v44 = vadd.f32 %v1842_v40, %v1587_v10  ;;  %v3390_v40 = vor.u32 %v3388_v30, %v3386_v4  ;;  %v9299_v4 = vshll.u32 %v8023_v23, 16 }
 0x220   : > { %v6394_v33 = vpop.f32.mrf.mxu0 }
 0x221   : > { %v1595_v39 = vpop.f32.mrf.mxu1  ;;  %v7067_v33 = vld [vmem:[#allocation2 + $0x54] sm:$0xff]  }
 0x222   : > { %v1847_v55 = vpop.f32.mrf.mxu0  ;;  %6696 = vmatmul.mubr.bf16.gmra.mxu0 %v3379_v5 }
 0x223   : > { %v6346_v17 = vpop.f32.mrf.mxu1  ;;  %v8460_v13 = vadd.f32 %v1847_v55, %v1592_v56  ;;  %6699 = vmatprep.mubr.msk.bf16.mxu0 %vm7172_vm0, %v7171_v1 }
 0x224   : > { %v6397_v3 = vpop.f32.mrf.mxu0 }
 0x225   : > { %v1600_v22 = vpop.f32.mrf.mxu1  ;;  %6648 = vmatmul.mubr.bf16.gmra.mxu1 %v3164_v7  ;;  %v7047_v7 = vld [vmem:[#allocation2 + $0x5c] ss:$0 sps:$4 sm:$0x11]  }
 0x226   : > { %6651 = vmatprep.mubr.msk.bf16.mxu1 %vm7172_vm0, %v7171_v1  ;;  %v1850_v29 = vpop.f32.mrf.mxu0 }
 0x227   : > { %v6349_v25 = vpop.f32.mrf.mxu1  ;;  %v8469_v36 = vadd.f32 %v1850_v29, %v1595_v39  ;;  %v3167_v39 = vrot.slane %v7067_v33, 1  ;;  %v3402_v29 = vrot.slane %v9299_v4, 1 }
 0x228   : > { %v6398_v8 = vpop.f32.mrf.mxu0 }
 0x229   : > { %v1603_v46 = vpop.f32.mrf.mxu1  ;;  %v3168_v55 = vsel %vm3151_vm9, %v3165_v21, %v3167_v39  ;;  %v3169_v21 = vrot.slane %v7047_v7, 1 }
 0x22a   : > { %v1855_v10 = vpop.f32.mrf.mxu0  ;;  %6700 = vmatmul.mubr.bf16.gmra.mxu0 %v3387_v37 }
 0x22b   : > { %v6350_v11 = vpop.f32.mrf.mxu1  ;;  %v8474_v19 = vadd.f32 %v1855_v10, %v1600_v22  ;;  %6703 = vmatprep.mubr.msk.bf16.mxu0 %vm7172_vm0, %v7171_v1  ;;  %v3170_v8 = vsel %vm3151_vm9, %v3167_v39, %v3169_v21 }
 0x22c   : > { %v6401_v58 = vpop.f32.mrf.mxu0 }
 0x22d   : > { %v2024_v60 = vpop.f32.mrf.mxu1  ;;  %6652 = vmatmul.mubr.bf16.gmra.mxu1 %v3166_v0 }
 0x22e   : > { %v8480_v2 = vadd.f32 %v2024_v60, %v8333_v9  ;;  %6655 = vmatprep.mubr.msk.bf16.mxu1 %vm7172_vm0, %v7171_v1  ;;  %v1858_v47 = vpop.f32.mrf.mxu0  ;;  %v3395_v9 = vsel %vm2738_vm8, %v3390_v40, %v3394_v28 }
 0x22f   : > { %v6421_v56 = vpop.f32.mrf.mxu1  ;;  %v8486_v26 = vadd.f32 %v1858_v47, %v1603_v46  ;;  %v3408_v46 = vshll.u32 %v7047_v7, 16 }
 0x230   : > { %v6402_v14 = vpop.f32.mrf.mxu0 }
 0x231   : > { %v2027_v20 = vpop.f32.mrf.mxu1 }
 0x232   : > { %v8491_v43 = vadd.f32 %v2027_v20, %v8340_v48  ;;  %v8494_v34 = vpop.f32.mrf.mxu0  ;;  %6704 = vmatmul.mubr.bf16.gmra.mxu0 %v3395_v9  ;;  %v3398_v48 = vor.u32 %v3396_v18, %v3394_v28  ;;  %v3410_v28 = vrot.slane %v3408_v46, 1 }
 0x233   : > { %v6422_v5 = vpop.f32.mrf.mxu1  ;;  %6707 = vmatprep.mubr.msk.bf16.mxu0 %vm7172_vm0, %v7171_v1 }
 0x234   : > { %v6473_v6 = vpop.f32.mrf.mxu0 }
 0x235   : > { %v2032_v30 = vpop.f32.mrf.mxu1  ;;  %6656 = vmatmul.mubr.bf16.gmra.mxu1 %v3168_v55 }
 0x236   : > { %v8500_v17 = vadd.f32 %v2032_v30, %v8344_v54  ;;  %6659 = vmatprep.mubr.msk.bf16.mxu1 %vm7172_vm0, %v7171_v1  ;;  %v8506_v3 = vpop.f32.mrf.mxu0  ;;  %v3403_v54 = vsel %vm2738_vm8, %v3398_v48, %v3402_v29 }
 0x237   : > { %v6425_v22 = vpop.f32.mrf.mxu1 }
 0x238   : > { %v6474_v25 = vpop.f32.mrf.mxu0 }
 0x239   : > { %v2035_v38 = vpop.f32.mrf.mxu1 }
 0x23a   : > { %v8511_v16 = vadd.f32 %v2035_v38, %v8351_v31  ;;  %v8514_v12 = vpop.f32.mrf.mxu0  ;;  %6708 = vmatmul.mubr.bf16.gmra.mxu0 %v3403_v54  ;;  %v9300_v31 = vshrl.u32 %v8023_v23, 16 }
 0x23b   : > { %v6426_v18 = vpop.f32.mrf.mxu1  ;;  %6711 = vmatprep.mubr.msk.bf16.mxu0 %vm7172_vm0, %v7171_v1 }
 0x23c   : > { %v6477_v37 = vpop.f32.mrf.mxu0  ;;  %v3406_v0 = vor.u32 %v9300_v31, %v3402_v29 }
 0x23d   : > { %v2040_v10 = vpop.f32.mrf.mxu1  ;;  %6660 = vmatmul.mubr.bf16.gmra.mxu1 %v3170_v8 }
 0x23e   : > { %v8520_v11 = vadd.f32 %v2040_v10, %v8359_v57  ;;  %6731 = vmatprep.mubr.msk.bf16.mxu1 %vm7172_vm0, %v7171_v1  ;;  %v8526_v58 = vpop.f32.mrf.mxu0  ;;  %v3411_v14 = vsel %vm2738_vm8, %v3406_v0, %v3410_v28  ;;  %v7050_v10 = vld [vmem:[%s9260_s10 + $0x30] sm:$0xff]  }
 0x23f   : > { %v6429_v60 = vpop.f32.mrf.mxu1 }
 0x240   : > { %v6478_v47 = vpop.f32.mrf.mxu0 }
 0x241   : > { %v2043_v56 = vpop.f32.mrf.mxu1 }
 0x242   : > { %v8529_v40 = vadd.f32 %v2043_v56, %v8372_v32  ;;  %v8532_v20 = vpop.f32.mrf.mxu0  ;;  %6712 = vmatmul.mubr.bf16.gmra.mxu0 %v3411_v14 }
 0x243   : > { %v6430_v57 = vpop.f32.mrf.mxu1  ;;  %6783 = vmatprep.mubr.msk.bf16.mxu0 %vm7172_vm0, %v7171_v1 }
 0x244   : > { %v6481_v23 = vpop.f32.mrf.mxu0  ;;  %v7051_v57 = vld [vmem:[%s9260_s10 + $0x28] sm:$0xff]  }
 0x245   : > { %v2048_v9 = vpop.f32.mrf.mxu1  ;;  %6732 = vmatmul.mubr.bf16.vlgmr.msra.gmra.mxu1 %v8086_v27 }
 0x246   : > { %v8538_v33 = vadd.f32 %v2048_v9, %v8380_v63  ;;  %6735 = vmatprep.mubr.msk.bf16.mxu1 %vm7172_vm0, %v7171_v1  ;;  %v8542_v32 = vpop.f32.mrf.mxu0 }
 0x247   : > { %v6433_v39 = vpop.f32.mrf.mxu1 }
 0x248   : > { %v6482_v5 = vpop.f32.mrf.mxu0 }
 0x249   : > { %v2051_v55 = vpop.f32.mrf.mxu1 }
 0x24a   : > { %v8545_v6 = vadd.f32 %v2051_v55, %v8393_v24  ;;  %v8547_v30 = vpop.f32.mrf.mxu0  ;;  %v7049_v24 = vld [vmem:[%s9260_s10 + $0x38] sm:$0xff]  }
 0x24b   : > { %v6434_v48 = vpop.f32.mrf.mxu1  ;;  %6768 = vmatpush3.bf16.msra.mxu0 %v7049_v24 }
 0x24c   : > { %v6485_v7 = vpop.f32.mrf.mxu0  ;;  %6769 = vmatprep.subr.bf16.mxu0 %v7171_v1 }
 0x24d   : > { %v2056_v22 = vpop.f32.mrf.mxu1  ;;  %6736 = vmatmul.mubr.bf16.gmra.mxu1 %v8089_v51 }
 0x24e   : > { %v8551_v27 = vadd.f32 %v2056_v22, %v8403_v35  ;;  %6739 = vmatprep.mubr.msk.bf16.mxu1 %vm7172_vm0, %v7171_v1  ;;  %v8555_v63 = vpop.f32.mrf.mxu0 }
 0x24f   : > { %v6437_v4 = vpop.f32.mrf.mxu1  ;;  %6770 = vmatpush3.bf16.msra.mxu0 %v7050_v10 }
 0x250   : > { %v6486_v29 = vpop.f32.mrf.mxu0  ;;  %6771 = vmatprep.subr.bf16.mxu0 %v7171_v1 }
 0x251   : > { %v2059_v25 = vpop.f32.mrf.mxu1 }
 0x252   : > { %v8561_v38 = vadd.f32 %v2059_v25, %v8416_v50  ;;  %v8563_v51 = vpop.f32.mrf.mxu0 }
 0x253   : > { %v6438_v35 = vpop.f32.mrf.mxu1  ;;  %6772 = vmatpush3.bf16.msra.mxu0 %v7051_v57 }
 0x254   : > { %v6489_v54 = vpop.f32.mrf.mxu0  ;;  %6773 = vmatprep.subr.bf16.mxu0 %v7171_v1 }
 0x255   : > { %v2064_v21 = vpop.f32.mrf.mxu1  ;;  %6740 = vmatmul.mubr.bf16.gmra.mxu1 %v8099_v41 }
 0x256   : > { %v8568_v18 = vadd.f32 %v2064_v21, %v8426_v52  ;;  %6743 = vmatprep.mubr.msk.bf16.mxu1 %vm7172_vm0, %v7171_v1  ;;  %v8572_v8 = vpop.f32.mrf.mxu0 }
 0x257   : > { %v6441_v50 = vpop.f32.mrf.mxu1 }
 0x258   : > { %v6490_v46 = vpop.f32.mrf.mxu0 }
 0x259   : > { %v2067_v37 = vpop.f32.mrf.mxu1 }
 0x25a   : > { %v8578_v31 = vadd.f32 %v2067_v37, %v8439_v62  ;;  %v8580_v0 = vpop.f32.mrf.mxu0 }
 0x25b   : > { %v6442_v41 = vpop.f32.mrf.mxu1 }
 0x25c   : > { %v6493_v52 = vpop.f32.mrf.mxu0 }
 0x25d   : > { %v2072_v60 = vpop.f32.mrf.mxu1  ;;  %6744 = vmatmul.mubr.bf16.gmra.mxu1 %v8106_v45 }
 0x25e   : > { %v8585_v28 = vadd.f32 %v2072_v60, %v8445_v59  ;;  %6747 = vmatprep.mubr.msk.bf16.mxu1 %vm7172_vm0, %v7171_v1  ;;  %v8589_v47 = vpop.f32.mrf.mxu0 }
 0x25f   : > { %v6445_v62 = vpop.f32.mrf.mxu1 }
 0x260   : > { %v6494_v56 = vpop.f32.mrf.mxu0 }
 0x261   : > { %v2075_v14 = vpop.f32.mrf.mxu1 }
 0x262   : > { %v8595_v23 = vadd.f32 %v2075_v14, %v8454_v44  ;;  %v8597_v9 = vpop.f32.mrf.mxu0 }
 0x263   : > { %v6446_v45 = vpop.f32.mrf.mxu1 }
 0x264   : > { %v6497_v59 = vpop.f32.mrf.mxu0 }
 0x265   : > { %v2080_v39 = vpop.f32.mrf.mxu1  ;;  %6748 = vmatmul.mubr.bf16.gmra.mxu1 %v8120_v49  ;;  %v7052_v49 = vld [vmem:[%s9260_s10 + $0x20] sm:$0xff]  }
 0x266   : > { %v8602_v5 = vadd.f32 %v2080_v39, %v8460_v13  ;;  %6751 = vmatprep.mubr.msk.bf16.mxu1 %vm7172_vm0, %v7171_v1  ;;  %v8606_v55 = vpop.f32.mrf.mxu0  ;;  %6774 = vmatpush3.bf16.msra.mxu0 %v7052_v49 }
 0x267   : > { %v6449_v44 = vpop.f32.mrf.mxu1  ;;  %6775 = vmatprep.subr.bf16.mxu0 %v7171_v1 }
 0x268   : > { %v6498_v48 = vpop.f32.mrf.mxu0 }
 0x269   : > { %v2083_v7 = vpop.f32.mrf.mxu1 }
 0x26a   : > { %v8609_v22 = vadd.f32 %v2083_v7, %v8469_v36  ;;  %v8611_v4 = vpop.f32.mrf.mxu0 }
 0x26b   : > { %v6450_v24 = vpop.f32.mrf.mxu1 }
 0x26c   : > { %v6501_v13 = vpop.f32.mrf.mxu0 }
 0x26d   : > { %v2088_v29 = vpop.f32.mrf.mxu1  ;;  %6752 = vmatmul.mubr.bf16.gmra.mxu1 %v8123_v53 }
 0x26e   : > { %v8618_v25 = vadd.f32 %v2088_v29, %v8474_v19  ;;  %6755 = vmatprep.mubr.msk.bf16.mxu1 %vm7172_vm0, %v7171_v1  ;;  %v8622_v36 = vpop.f32.mrf.mxu0  ;;  %v7053_v19 = vld [vmem:[%s9260_s10 + $0x18] sm:$0xff]  }
 0x26f   : > { %v6453_v35 = vpop.f32.mrf.mxu1  ;;  %6776 = vmatpush3.bf16.msra.mxu0 %v7053_v19 }
 0x270   : > { %v6502_v54 = vpop.f32.mrf.mxu0  ;;  %6777 = vmatprep.subr.bf16.mxu0 %v7171_v1 }
 0x271   : > { %v2091_v21 = vpop.f32.mrf.mxu1 }
 0x272   : > { %v8626_v50 = vadd.f32 %v2091_v21, %v8486_v26  ;;  %v8628_v46 = vpop.f32.mrf.mxu0  ;;  %v7055_v21 = vld [vmem:[%s9260_s10 + $0x8] sm:$0xff]  }
 0x273   : > { %v6454_v53 = vpop.f32.mrf.mxu1 }
 0x274   : > { %v6505_v37 = vpop.f32.mrf.mxu0 }
 0x275   : > { %v2583_v10 = vpop.f32.mrf.mxu1  ;;  %6756 = vmatmul.mubr.bf16.gmra.mxu1 %v8132_v15  ;;  %v7054_v15 = vld [vmem:[%s9260_s10 + $0x10] sm:$0xff]  }
 0x276   : > { %6759 = vmatprep.mubr.msk.bf16.mxu1 %vm7172_vm0, %v7171_v1  ;;  %v8636_v41 = vpop.f32.mrf.mxu0  ;;  %v2584_v62 = vadd.f32 %v2583_v10, %v8494_v34  ;;  %6778 = vmatpush3.bf16.msra.mxu0 %v7054_v15 }
 0x277   : > { %v6525_v52 = vpop.f32.mrf.mxu1  ;;  %6779 = vmatprep.subr.bf16.mxu0 %v7171_v1 }
 0x278   : > { %v6506_v26 = vpop.f32.mrf.mxu0 }
 0x279   : > { %v2586_v60 = vpop.f32.mrf.mxu1 }
 0x27a   : > { %v2906_v56 = vpop.f32.mrf.mxu0  ;;  %v2587_v39 = vadd.f32 %v2586_v60, %v8506_v3  ;;  %6780 = vmatpush3.bf16.msra.mxu0 %v7055_v21 }
 0x27b   : > { %v6526_v14 = vpop.f32.mrf.mxu1  ;;  %v2977_v57 = vadd.f32 %v2906_v56, %v2584_v62  ;;  %6781 = vmatprep.subr.bf16.mxu0 %v7171_v1 }
 0x27c   : > { %v6577_v45 = vpop.f32.mrf.mxu0 }
 0x27d   : > { %v2591_v59 = vpop.f32.mrf.mxu1  ;;  %6760 = vmatmul.mubr.bf16.gmra.mxu1 %v8138_v61  ;;  %v8646_v44 = vadd.f32 %v2977_v57, %v8480_v2 }
 0x27e   : > { %6763 = vmatprep.mubr.msk.bf16.mxu1 %vm7172_vm0, %v7171_v1  ;;  %v2909_v34 = vpop.f32.mrf.mxu0  ;;  %v2592_v49 = vadd.f32 %v2591_v59, %v8514_v12 }
 0x27f   : > { %v6529_v48 = vpop.f32.mrf.mxu1  ;;  %v2978_v7 = vadd.f32 %v2909_v34, %v2587_v39 }
 0x280   : > { %v6578_v24 = vpop.f32.mrf.mxu0 }
 0x281   : > { %v2594_v61 = vpop.f32.mrf.mxu1  ;;  %v8653_v13 = vadd.f32 %v2978_v7, %v8491_v43 }
 0x282   : > { %v2914_v3 = vpop.f32.mrf.mxu0  ;;  %v2595_v53 = vadd.f32 %v2594_v61, %v8526_v58 }
 0x283   : > { %v6530_v29 = vpop.f32.mrf.mxu1  ;;  %v2979_v2 = vadd.f32 %v2914_v3, %v2592_v49  ;;  %v7056_v3 = vld [vmem:[%s9260_s10] sm:$0xff]  }
 0x284   : > { %v6581_v35 = vpop.f32.mrf.mxu0  ;;  %6782 = vmatpush3.bf16.msra.mxu0 %v7056_v3 }
 0x285   : > { %v2599_v54 = vpop.f32.mrf.mxu1  ;;  %6764 = vmatmul.mubr.bf16.gmra.mxu1 %v8147_v42  ;;  %v8661_v19 = vadd.f32 %v2979_v2, %v8500_v17 }
 0x286   : > { %v2917_v12 = vpop.f32.mrf.mxu0  ;;  %v2600_v26 = vadd.f32 %v2599_v54, %v8532_v20 }
 0x287   : > { %v6533_v37 = vpop.f32.mrf.mxu1  ;;  %v2980_v43 = vadd.f32 %v2917_v12, %v2595_v53 }
 0x288   : > { %v6582_v10 = vpop.f32.mrf.mxu0 }
 0x289   : > { %v2602_v52 = vpop.f32.mrf.mxu1  ;;  %v8666_v42 = vadd.f32 %v2980_v43, %v8511_v16 }
 0x28a   : > { %v2922_v60 = vpop.f32.mrf.mxu0  ;;  %v2603_v17 = vadd.f32 %v2602_v52, %v8542_v32 }
 0x28b   : > { %v6534_v62 = vpop.f32.mrf.mxu1  ;;  %v2981_v56 = vadd.f32 %v2922_v60, %v2600_v26 }
 0x28c   : > { %v6585_v58 = vpop.f32.mrf.mxu0 }
 0x28d   : > { %v2607_v14 = vpop.f32.mrf.mxu1  ;;  %v8670_v57 = vadd.f32 %v2981_v56, %v8520_v11 }
 0x28e   : > { %v2925_v45 = vpop.f32.mrf.mxu0  ;;  %v2608_v20 = vadd.f32 %v2607_v14, %v8547_v30 }
 0x28f   : > { %v6537_v59 = vpop.f32.mrf.mxu1  ;;  %v2982_v15 = vadd.f32 %v2925_v45, %v2603_v17 }
 0x290   : > { %v6586_v39 = vpop.f32.mrf.mxu0 }
 0x291   : > { %v2610_v34 = vpop.f32.mrf.mxu1  ;;  %v8674_v16 = vadd.f32 %v2982_v15, %v8529_v40 }
 0x292   : > { %v2930_v48 = vpop.f32.mrf.mxu0  ;;  %v2611_v32 = vadd.f32 %v2610_v34, %v8555_v63 }
 0x293   : > { %v6538_v7 = vpop.f32.mrf.mxu1  ;;  %v2983_v24 = vadd.f32 %v2930_v48, %v2608_v20 }
 0x294   : > { %v6589_v61 = vpop.f32.mrf.mxu0 }
 0x295   : > { %v2615_v49 = vpop.f32.mrf.mxu1  ;;  %v8678_v11 = vadd.f32 %v2983_v24, %v8538_v33 }
 0x296   : > { %v2933_v29 = vpop.f32.mrf.mxu0  ;;  %v2616_v54 = vadd.f32 %v2615_v49, %v8563_v51 }
 0x297   : > { %v6541_v2 = vpop.f32.mrf.mxu1  ;;  %v2984_v30 = vadd.f32 %v2933_v29, %v2611_v32 }
 0x298   : > { %v6590_v40 = vpop.f32.mrf.mxu0 }
 0x299   : > { %v2618_v35 = vpop.f32.mrf.mxu1  ;;  %v8685_v21 = vadd.f32 %v2984_v30, %v8545_v6 }
 0x29a   : > { %v2938_v53 = vpop.f32.mrf.mxu0  ;;  %v2619_v43 = vadd.f32 %v2618_v35, %v8572_v8 }
 0x29b   : > { %v6542_v63 = vpop.f32.mrf.mxu1  ;;  %v2985_v12 = vadd.f32 %v2938_v53, %v2616_v54 }
 0x29c   : > { %v6593_v33 = vpop.f32.mrf.mxu0 }
 0x29d   : > { %v2623_v37 = vpop.f32.mrf.mxu1  ;;  %v8689_v10 = vadd.f32 %v2985_v12, %v8551_v27 }
 0x29e   : > { %v2941_v52 = vpop.f32.mrf.mxu0  ;;  %v2624_v51 = vadd.f32 %v2623_v37, %v8580_v0 }
 0x29f   : > { %v6545_v26 = vpop.f32.mrf.mxu1  ;;  %v2986_v60 = vadd.f32 %v2941_v52, %v2619_v43 }
 0x2a0   : > { %v6594_v62 = vpop.f32.mrf.mxu0 }
 0x2a1   : > { %v2626_v56 = vpop.f32.mrf.mxu1  ;;  %v8693_v6 = vadd.f32 %v2986_v60, %v8561_v38 }
 0x2a2   : > { %v2946_v58 = vpop.f32.mrf.mxu0  ;;  %v2627_v8 = vadd.f32 %v2626_v56, %v8589_v47 }
 0x2a3   : > { %v6546_v14 = vpop.f32.mrf.mxu1  ;;  %v2987_v17 = vadd.f32 %v2946_v58, %v2624_v51 }
 0x2a4   : > { %v6597_v45 = vpop.f32.mrf.mxu0 }
 0x2a5   : > { %v2631_v59 = vpop.f32.mrf.mxu1  ;;  %v8697_v27 = vadd.f32 %v2987_v17, %v8568_v18 }
 0x2a6   : > { %v2949_v15 = vpop.f32.mrf.mxu0  ;;  %v2632_v0 = vadd.f32 %v2631_v59, %v8597_v9 }
 0x2a7   : > { %v6549_v39 = vpop.f32.mrf.mxu1  ;;  %v2988_v34 = vadd.f32 %v2949_v15, %v2627_v8 }
 0x2a8   : > { %v6598_v20 = vpop.f32.mrf.mxu0 }
 0x2a9   : > { %v2634_v48 = vpop.f32.mrf.mxu1  ;;  %v8701_v38 = vadd.f32 %v2988_v34, %v8578_v31 }
 0x2aa   : > { %v2954_v7 = vpop.f32.mrf.mxu0  ;;  %v2635_v47 = vadd.f32 %v2634_v48, %v8606_v55 }
 0x2ab   : > { %v6550_v24 = vpop.f32.mrf.mxu1  ;;  %v2989_v61 = vadd.f32 %v2954_v7, %v2632_v0 }
 0x2ac   : > { %v6601_v49 = vpop.f32.mrf.mxu0 }
 0x2ad   : > { %v2639_v32 = vpop.f32.mrf.mxu1  ;;  %v8705_v18 = vadd.f32 %v2989_v61, %v8585_v28 }
 0x2ae   : > { %v2957_v3 = vpop.f32.mrf.mxu0  ;;  %v2640_v9 = vadd.f32 %v2639_v32, %v8611_v4 }
 0x2af   : > { %v6553_v29 = vpop.f32.mrf.mxu1  ;;  %v2990_v2 = vadd.f32 %v2957_v3, %v2635_v47 }
 0x2b0   : > { %v6602_v30 = vpop.f32.mrf.mxu0 }
 0x2b1   : > { %v2642_v40 = vpop.f32.mrf.mxu1  ;;  %v8709_v31 = vadd.f32 %v2990_v2, %v8595_v23 }
 0x2b2   : > { %v2962_v35 = vpop.f32.mrf.mxu0  ;;  %v2643_v55 = vadd.f32 %v2642_v40, %v8622_v36 }
 0x2b3   : > { %v6554_v54 = vpop.f32.mrf.mxu1  ;;  %v2991_v53 = vadd.f32 %v2962_v35, %v2640_v9 }
 0x2b4   : > { %v6605_v63 = vpop.f32.mrf.mxu0 }
 0x2b5   : > { %v2647_v12 = vpop.f32.mrf.mxu1  ;;  %v8713_v28 = vadd.f32 %v2991_v53, %v8602_v5 }
 0x2b6   : > { %v2965_v33 = vpop.f32.mrf.mxu0  ;;  %v2648_v4 = vadd.f32 %v2647_v12, %v8628_v46 }
 0x2b7   : > { %v6557_v37 = vpop.f32.mrf.mxu1  ;;  %v2992_v43 = vadd.f32 %v2965_v33, %v2643_v55 }
 0x2b8   : > { %v6606_v52 = vpop.f32.mrf.mxu0 }
 0x2b9   : > { %v2650_v26 = vpop.f32.mrf.mxu1  ;;  %v8717_v23 = vadd.f32 %v2992_v43, %v8609_v22 }
 0x2ba   : > { %v2970_v60 = vpop.f32.mrf.mxu0  ;;  %v2651_v36 = vadd.f32 %v2650_v26, %v8636_v41 }
 0x2bb   : > { %v6558_v62 = vpop.f32.mrf.mxu1  ;;  %v2993_v56 = vadd.f32 %v2970_v60, %v2648_v4 }
 0x2bc   : > { %v6609_v51 = vpop.f32.mrf.mxu0 }
 0x2bd   : > { %v3262_v58 = vpop.f32.mrf.mxu1  ;;  %v8721_v5 = vadd.f32 %v2993_v56, %v8618_v25 }
 0x2be   : > { %v2973_v14 = vpop.f32.mrf.mxu0 }
 0x2bf   : > { %v6629_v17 = vpop.f32.mrf.mxu1  ;;  %v2994_v45 = vadd.f32 %v2973_v14, %v2651_v36 }
 0x2c0   : > { %v6610_v59 = vpop.f32.mrf.mxu0 }
 0x2c1   : > { %v3265_v8 = vpop.f32.mrf.mxu1  ;;  %v8724_v46 = vadd.f32 %v2994_v45, %v8626_v50 }
 0x2c2   : > { %v3503_v22 = vpop.f32.mrf.mxu0 }
 0x2c3   : > { %v6630_v15 = vpop.f32.mrf.mxu1  ;;  %v8726_v39 = vadd.f32 %v3503_v22, %v3262_v58 }
 0x2c4   : > { %v6681_v34 = vpop.f32.mrf.mxu0 }
 0x2c5   : > { %v3270_v20 = vpop.f32.mrf.mxu1 }
 0x2c6   : > { %v3506_v48 = vpop.f32.mrf.mxu0 }
 0x2c7   : > { %v6633_v0 = vpop.f32.mrf.mxu1  ;;  %v8728_v41 = vadd.f32 %v3506_v48, %v3265_v8 }
 0x2c8   : > { %v6682_v25 = vpop.f32.mrf.mxu0 }
 0x2c9   : > { %v3273_v7 = vpop.f32.mrf.mxu1 }
 0x2ca   : > { %v3511_v24 = vpop.f32.mrf.mxu0 }
 0x2cb   : > { %v6634_v61 = vpop.f32.mrf.mxu1  ;;  %v8730_v49 = vadd.f32 %v3511_v24, %v3270_v20 }
 0x2cc   : > { %v6685_v32 = vpop.f32.mrf.mxu0 }
 0x2cd   : > { %v3278_v47 = vpop.f32.mrf.mxu1 }
 0x2ce   : > { %v3514_v50 = vpop.f32.mrf.mxu0 }
 0x2cf   : > { %v6637_v3 = vpop.f32.mrf.mxu1  ;;  %v8732_v29 = vadd.f32 %v3514_v50, %v3273_v7 }
 0x2d0   : > { %v6686_v2 = vpop.f32.mrf.mxu0 }
 0x2d1   : > { %v3281_v30 = vpop.f32.mrf.mxu1 }
 0x2d2   : > { %v3519_v40 = vpop.f32.mrf.mxu0 }
 0x2d3   : > { %v6638_v9 = vpop.f32.mrf.mxu1  ;;  %v8734_v35 = vadd.f32 %v3519_v40, %v3278_v47 }
 0x2d4   : > { %v6689_v54 = vpop.f32.mrf.mxu0 }
 0x2d5   : > { %v3286_v53 = vpop.f32.mrf.mxu1 }
 0x2d6   : > { %v3522_v63 = vpop.f32.mrf.mxu0 }
 0x2d7   : > { %v6641_v12 = vpop.f32.mrf.mxu1  ;;  %v8736_v55 = vadd.f32 %v3522_v63, %v3281_v30 }
 0x2d8   : > { %v6690_v33 = vpop.f32.mrf.mxu0 }
 0x2d9   : > { %v3289_v37 = vpop.f32.mrf.mxu1 }
 0x2da   : > { %v3527_v43 = vpop.f32.mrf.mxu0 }
 0x2db   : > { %v6642_v52 = vpop.f32.mrf.mxu1  ;;  %v8738_v26 = vadd.f32 %v3527_v43, %v3286_v53 }
 0x2dc   : > { %v6693_v4 = vpop.f32.mrf.mxu0 }
 0x2dd   : > { %v3294_v60 = vpop.f32.mrf.mxu1 }
 0x2de   : > { %v3530_v62 = vpop.f32.mrf.mxu0 }
 0x2df   : > { %v6645_v56 = vpop.f32.mrf.mxu1  ;;  %v8740_v51 = vadd.f32 %v3530_v62, %v3289_v37 }
 0x2e0   : > { %v6694_v58 = vpop.f32.mrf.mxu0 }
 0x2e1   : > { %v3297_v36 = vpop.f32.mrf.mxu1 }
 0x2e2   : > { %v3535_v14 = vpop.f32.mrf.mxu0 }
 0x2e3   : > { %v6646_v17 = vpop.f32.mrf.mxu1  ;;  %v8742_v45 = vadd.f32 %v3535_v14, %v3294_v60 }
 0x2e4   : > { %v6697_v59 = vpop.f32.mrf.mxu0 }
 0x2e5   : > { %v3302_v8 = vpop.f32.mrf.mxu1 }
 0x2e6   : > { %v3538_v22 = vpop.f32.mrf.mxu0 }
 0x2e7   : > { %v6649_v15 = vpop.f32.mrf.mxu1  ;;  %v8744_v34 = vadd.f32 %v3538_v22, %v3297_v36 }
 0x2e8   : > { %v6698_v20 = vpop.f32.mrf.mxu0 }
 0x2e9   : > { %v3305_v48 = vpop.f32.mrf.mxu1 }
 0x2ea   : > { %v3543_v0 = vpop.f32.mrf.mxu0 }
 0x2eb   : > { %v6650_v25 = vpop.f32.mrf.mxu1  ;;  %v8746_v7 = vadd.f32 %v3543_v0, %v3302_v8 }
 0x2ec   : > { %v6701_v24 = vpop.f32.mrf.mxu0 }
 0x2ed   : > { %v3310_v61 = vpop.f32.mrf.mxu1  ;;  %v8764_v24 = vld [vmem:[%s9258_s8] ss:$0 sm:$0xff] }
 0x2ee   : > { %v3546_v32 = vpop.f32.mrf.mxu0 }
 0x2ef   : > { %v6653_v47 = vpop.f32.mrf.mxu1  ;;  %v8748_v50 = vadd.f32 %v3546_v32, %v3305_v48 }
 0x2f0   : > { %v6702_v3 = vpop.f32.mrf.mxu0 }
 0x2f1   : > { %v3313_v2 = vpop.f32.mrf.mxu1 }
 0x2f2   : > { %v3551_v30 = vpop.f32.mrf.mxu0 }
 0x2f3   : > { %v6654_v40 = vpop.f32.mrf.mxu1  ;;  %v8750_v9 = vadd.f32 %v3551_v30, %v3310_v61 }
 0x2f4   : > { %v6705_v54 = vpop.f32.mrf.mxu0 }
 0x2f5   : > { %v3318_v53 = vpop.f32.mrf.mxu1 }
 0x2f6   : > { %v3554_v63 = vpop.f32.mrf.mxu0 }
 0x2f7   : > { %v6657_v12 = vpop.f32.mrf.mxu1  ;;  %v8752_v33 = vadd.f32 %v3554_v63, %v3313_v2 }
 0x2f8   : > { %v6706_v37 = vpop.f32.mrf.mxu0 }
 0x2f9   : > { %v3321_v43 = vpop.f32.mrf.mxu1 }
 0x2fa   : > { %v3559_v52 = vpop.f32.mrf.mxu0 }
 0x2fb   : > { %v6658_v4 = vpop.f32.mrf.mxu1  ;;  %v8754_v60 = vadd.f32 %v3559_v52, %v3318_v53 }
 0x2fc   : > { %v6709_v62 = vpop.f32.mrf.mxu0 }
 0x2fd   : > { %v3326_v56 = vpop.f32.mrf.mxu1 }
 0x2fe   : > { %v3562_v58 = vpop.f32.mrf.mxu0 }
 0x2ff   : > { %v6661_v36 = vpop.f32.mrf.mxu1  ;;  %v8756_v14 = vadd.f32 %v3562_v58, %v3321_v43 }
 0x300   : > { %v6710_v17 = vpop.f32.mrf.mxu0 }
 0x301   : > { %v3329_v59 = vpop.f32.mrf.mxu1 }
 0x302   : > { %v3567_v8 = vpop.f32.mrf.mxu0 }
 0x303   : > { %v6662_v22 = vpop.f32.mrf.mxu1  ;;  %v8758_v15 = vadd.f32 %v3567_v8, %v3326_v56 }
 0x304   : > { %v6713_v20 = vpop.f32.mrf.mxu0 }
 0x305   : > { %v3736_v48 = vpop.f32.mrf.mxu1 }
 0x306   : > { %v3807_v0 = vadd.f32 %v3736_v48, %v8726_v39  ;;  %v3570_v25 = vpop.f32.mrf.mxu0  ;;  %v8774_v39 = vld [vmem:[%s9259_s9] ss:$0 sm:$0xff] }
 0x307   : > { %v6733_v61 = vpop.f32.mrf.mxu1  ;;  %v8766_v32 = vadd.f32 %v3570_v25, %v3329_v59 }
 0x308   : > { %v3843_v47 = vadd.f32 %v3807_v0, %v8646_v44  ;;  %v6714_v3 = vpop.f32.mrf.mxu0 }
 0x309   : > { %v3739_v2 = vpop.f32.mrf.mxu1 }
 0x30a   : > { %v3904_v30 = vmul.f32 %v8764_v24, %v3843_v47  ;;  %v3808_v40 = vadd.f32 %v3739_v2, %v8728_v41 }
 0x30b   : > { %v6734_v54 = vpop.f32.mrf.mxu1 }
 0x30c   : > { %v3844_v53 = vadd.f32 %v3808_v40, %v8653_v13  ;;  %v3929_v12 = vadd.f32 %v8774_v39, %v3904_v30 }
 0x30d   : > { %v3744_v63 = vpop.f32.mrf.mxu1 }
 0x30e   : > { %v3905_v37 = vmul.f32 %v8764_v24, %v3844_v53  ;;  %v3809_v44 = vadd.f32 %v3744_v63, %v8730_v49  ;;  %v3947_v62 = vmax.f32 %v3929_v12, 0.0 }
 0x30f   : > { %v6737_v43 = vpop.f32.mrf.mxu1 }
 0x310   : > { %v3930_v52 = vadd.f32 %v8774_v39, %v3905_v37  ;;  %v3845_v41 = vadd.f32 %v3809_v44, %v8661_v19 }
 0x311   : > { %v3747_v4 = vpop.f32.mrf.mxu1 }
 0x312   : > { %v3948_v56 = vmax.f32 %v3930_v52, 0.0  ;;  %v3906_v58 = vmul.f32 %v8764_v24, %v3845_v41  ;;  %v3810_v36 = vadd.f32 %v3747_v4, %v8732_v29 }
 0x313   : > { %v6738_v13 = vpop.f32.mrf.mxu1 }
 0x314   : > { %v3965_v17 = vpack.c.bf16 %v3948_v56, %v3947_v62  ;;  %v3846_v59 = vadd.f32 %v3810_v36, %v8666_v42  ;;  %v3931_v22 = vadd.f32 %v8774_v39, %v3906_v58 }
 0x315   : > { %v3752_v8 = vpop.f32.mrf.mxu1 }
 0x316   : > { %v3907_v49 = vmul.f32 %v8764_v24, %v3846_v59  ;;  %v3811_v20 = vadd.f32 %v3752_v8, %v8734_v35  ;;  %6784 = vmatmul.mubr.bf16.vlgmr.msra.gmra.mxu0 %v3965_v17  ;;  %v3949_v25 = vmax.f32 %v3931_v22, 0.0 }
 0x317   : > { %v6741_v19 = vpop.f32.mrf.mxu1  ;;  %6787 = vmatprep.mubr.msk.bf16.mxu0 %vm7172_vm0, %v7171_v1 }
 0x318   : > { %v3932_v48 = vadd.f32 %v8774_v39, %v3907_v49  ;;  %v3847_v29 = vadd.f32 %v3811_v20, %v8670_v57 }
 0x319   : > { %v3755_v0 = vpop.f32.mrf.mxu1 }
 0x31a   : > { %v3950_v61 = vmax.f32 %v3932_v48, 0.0  ;;  %v3908_v42 = vmul.f32 %v8764_v24, %v3847_v29  ;;  %v3812_v47 = vadd.f32 %v3755_v0, %v8736_v55 }
 0x31b   : > { %v6742_v3 = vpop.f32.mrf.mxu1 }
 0x31c   : > { %v3848_v2 = vadd.f32 %v3812_v47, %v8674_v16  ;;  %v3966_v35 = vpack.c.bf16 %v3950_v61, %v3949_v25  ;;  %v3933_v40 = vadd.f32 %v8774_v39, %v3908_v42 }
 0x31d   : > { %v3760_v30 = vpop.f32.mrf.mxu1 }
 0x31e   : > { %v3909_v54 = vmul.f32 %v8764_v24, %v3848_v2  ;;  %v3813_v53 = vadd.f32 %v3760_v30, %v8738_v26  ;;  %6788 = vmatmul.mubr.bf16.gmra.mxu0 %v3966_v35  ;;  %v3951_v37 = vmax.f32 %v3933_v40, 0.0 }
 0x31f   : > { %v6745_v57 = vpop.f32.mrf.mxu1  ;;  %6791 = vmatprep.mubr.msk.bf16.mxu0 %vm7172_vm0, %v7171_v1 }
 0x320   : > { %v3934_v63 = vadd.f32 %v8774_v39, %v3909_v54  ;;  %v3849_v55 = vadd.f32 %v3813_v53, %v8678_v11 }
 0x321   : > { %v3763_v12 = vpop.f32.mrf.mxu1 }
 0x322   : > { %v3952_v16 = vmax.f32 %v3934_v63, 0.0  ;;  %v3910_v44 = vmul.f32 %v8764_v24, %v3849_v55  ;;  %v3814_v43 = vadd.f32 %v3763_v12, %v8740_v51 }
 0x323   : > { %v6746_v52 = vpop.f32.mrf.mxu1 }
 0x324   : > { %v3850_v41 = vadd.f32 %v3814_v43, %v8685_v21  ;;  %v3967_v26 = vpack.c.bf16 %v3952_v16, %v3951_v37  ;;  %v3935_v62 = vadd.f32 %v8774_v39, %v3910_v44 }
 0x325   : > { %v3768_v4 = vpop.f32.mrf.mxu1 }
 0x326   : > { %v3911_v56 = vmul.f32 %v8764_v24, %v3850_v41  ;;  %v3815_v58 = vadd.f32 %v3768_v4, %v8742_v45  ;;  %6792 = vmatmul.mubr.bf16.gmra.mxu0 %v3967_v26  ;;  %v3953_v17 = vmax.f32 %v3935_v62, 0.0 }
 0x327   : > { %v6749_v11 = vpop.f32.mrf.mxu1  ;;  %6795 = vmatprep.mubr.msk.bf16.mxu0 %vm7172_vm0, %v7171_v1 }
 0x328   : > { %v3936_v36 = vadd.f32 %v8774_v39, %v3911_v56  ;;  %v3851_v51 = vadd.f32 %v3815_v58, %v8689_v10 }
 0x329   : > { %v3771_v13 = vpop.f32.mrf.mxu1 }
 0x32a   : > { %v3954_v21 = vmax.f32 %v3936_v36, 0.0  ;;  %v3912_v59 = vmul.f32 %v8764_v24, %v3851_v51  ;;  %v3816_v8 = vadd.f32 %v3771_v13, %v8744_v34 }
 0x32b   : > { %v6750_v22 = vpop.f32.mrf.mxu1 }
 0x32c   : > { %v3852_v49 = vadd.f32 %v3816_v8, %v8693_v6  ;;  %v3968_v45 = vpack.c.bf16 %v3954_v21, %v3953_v17  ;;  %v3937_v19 = vadd.f32 %v8774_v39, %v3912_v59 }
 0x32d   : > { %v3776_v20 = vpop.f32.mrf.mxu1 }
 0x32e   : > { %v3913_v48 = vmul.f32 %v8764_v24, %v3852_v49  ;;  %v3817_v29 = vadd.f32 %v3776_v20, %v8746_v7  ;;  %6796 = vmatmul.mubr.bf16.gmra.mxu0 %v3968_v45  ;;  %v3955_v61 = vmax.f32 %v3937_v19, 0.0 }
 0x32f   : > { %v6753_v10 = vpop.f32.mrf.mxu1  ;;  %6799 = vmatprep.mubr.msk.bf16.mxu0 %vm7172_vm0, %v7171_v1 }
 0x330   : > { %v3938_v0 = vadd.f32 %v8774_v39, %v3913_v48  ;;  %v3853_v34 = vadd.f32 %v3817_v29, %v8697_v27 }
 0x331   : > { %v3779_v25 = vpop.f32.mrf.mxu1 }
 0x332   : > { %v3956_v6 = vmax.f32 %v3938_v0, 0.0  ;;  %v3914_v42 = vmul.f32 %v8764_v24, %v3853_v34  ;;  %v3818_v47 = vadd.f32 %v3779_v25, %v8748_v50 }
 0x333   : > { %v6754_v3 = vpop.f32.mrf.mxu1 }
 0x334   : > { %v3854_v2 = vadd.f32 %v3818_v47, %v8701_v38  ;;  %v3969_v7 = vpack.c.bf16 %v3956_v6, %v3955_v61  ;;  %v3939_v30 = vadd.f32 %v8774_v39, %v3914_v42  ;;  %v7068_v61 = vld [vmem:[%s7442_s30] sm:$0xff]   ;;  %v7174_v42 = vmov 1966171168  }
 0x335   : > { %v3784_v35 = vpop.f32.mrf.mxu1  ;;  %v4267_v47 = vunpack.c.l.s4 %v7174_v42  ;;  %v4269_v3 = vlaneseq }
 0x336   : > { %v3915_v40 = vmul.f32 %v8764_v24, %v3854_v2  ;;  %v3819_v54 = vadd.f32 %v3784_v35, %v8750_v9  ;;  %6800 = vmatmul.mubr.bf16.gmra.mxu0 %v3969_v7  ;;  %v3957_v63 = vmax.f32 %v3939_v30, 0.0  ;;  %v4194_v7 = vunpack.c.h.bf16 %v7068_v61 }
 0x337   : > { %v6757_v27 = vpop.f32.mrf.mxu1  ;;  %6803 = vmatprep.mubr.msk.bf16.mxu0 %vm7172_vm0, %v7171_v1 }
 0x338   : > { %v3940_v53 = vadd.f32 %v8774_v39, %v3915_v40  ;;  %v3855_v50 = vadd.f32 %v3819_v54, %v8705_v18  ;;  %v4268_v27 = vunpack.c.0.s8 %v4267_v47 }
 0x339   : > { %v3787_v57 = vpop.f32.mrf.mxu1 }
 0x33a   : > { %v3958_v38 = vmax.f32 %v3940_v53, 0.0  ;;  %v3916_v55 = vmul.f32 %v8764_v24, %v3855_v50  ;;  %v3820_v12 = vadd.f32 %v3787_v57, %v8752_v33  ;;  %v4270_v53 = vshrl.u32 %v4269_v3, 7 }
 0x33b   : > { %v6758_v37 = vpop.f32.mrf.mxu1 }
 0x33c   : > { %v3856_v16 = vadd.f32 %v3820_v12, %v8709_v31  ;;  %v3970_v9 = vpack.c.bf16 %v3958_v38, %v3957_v63  ;;  %v3941_v43 = vadd.f32 %v8774_v39, %v3916_v55  ;;  %v8876_v37 = vsub.s32 %v4268_v27, %v4270_v53 }
 0x33d   : > { %v3792_v44 = vpop.f32.mrf.mxu1 }
 0x33e   : > { %v3917_v52 = vmul.f32 %v8764_v24, %v3856_v16  ;;  %v3821_v41 = vadd.f32 %v3792_v44, %v8754_v60  ;;  %6804 = vmatmul.mubr.bf16.gmra.mxu0 %v3970_v9  ;;  %v3959_v62 = vmax.f32 %v3941_v43, 0.0  ;;  %v7069_v16 = vld [vmem:[%s7442_s30 + $0x8] sm:$0xff]   ;;  %v7175_v44 = vmov 1935823168  }
 0x33f   : > { %v6761_v18 = vpop.f32.mrf.mxu1  ;;  %6807 = vmatprep.mubr.msk.bf16.mxu0 %vm7172_vm0, %v7171_v1  ;;  %v4195_v9 = vunpack.c.l.bf16 %v7069_v16  ;;  %v4709_v43 = vunpack.c.l.s4 %v7175_v44 }
 0x340   : > { %v3942_v26 = vadd.f32 %v8774_v39, %v3917_v52  ;;  %v3857_v33 = vadd.f32 %v3821_v41, %v8713_v28  ;;  %v4196_v18 = vunpack.c.h.bf16 %v7069_v16 }
 0x341   : > { %v3795_v4 = vpop.f32.mrf.mxu1 }
 0x342   : > { %v3960_v31 = vmax.f32 %v3942_v26, 0.0  ;;  %v3918_v56 = vmul.f32 %v8764_v24, %v3857_v33  ;;  %v3822_v58 = vadd.f32 %v3795_v4, %v8756_v14 }
 0x343   : > { %v6762_v11 = vpop.f32.mrf.mxu1 }
 0x344   : > { %v3858_v36 = vadd.f32 %v3822_v58, %v8717_v23  ;;  %v3971_v60 = vpack.c.bf16 %v3960_v31, %v3959_v62  ;;  %v3943_v13 = vadd.f32 %v8774_v39, %v3918_v56  ;;  %v8882_v62 = vld [vmem:[%s7442_s30 + $0x10] sm:$0xff]   ;;  %v8887_v58 = vld [vmem:[%s7442_s30 + $0x18] sm:$0xff]  }
 0x345   : > { %v3800_v51 = vpop.f32.mrf.mxu1  ;;  %v4197_v31 = vunpack.c.l.bf16 %v8882_v62  ;;  %v4198_v56 = vunpack.c.h.bf16 %v8882_v62  ;;  %v4199_v11 = vunpack.c.l.bf16 %v8887_v58 }
 0x346   : > { %v3919_v17 = vmul.f32 %v8764_v24, %v3858_v36  ;;  %v3823_v21 = vadd.f32 %v3800_v51, %v8758_v15  ;;  %6808 = vmatmul.mubr.bf16.gmra.mxu0 %v3971_v60  ;;  %v3961_v22 = vmax.f32 %v3943_v13, 0.0  ;;  %v4200_v36 = vunpack.c.h.bf16 %v8887_v58  ;;  %v8892_v51 = vld [vmem:[%s7442_s30 + $0x20] sm:$0xff]  }
 0x347   : > { %v6765_v28 = vpop.f32.mrf.mxu1  ;;  %6811 = vmatprep.mubr.msk.bf16.mxu0 %vm7172_vm0, %v7171_v1  ;;  %v4201_v13 = vunpack.c.l.bf16 %v8892_v51 }
 0x348   : > { %v3944_v59 = vadd.f32 %v8774_v39, %v3919_v17  ;;  %v3859_v14 = vadd.f32 %v3823_v21, %v8721_v5 }
 0x349   : > { %v3803_v8 = vpop.f32.mrf.mxu1 }
 0x34a   : > { %v3962_v23 = vmax.f32 %v3944_v59, 0.0  ;;  %v3920_v49 = vmul.f32 %v8764_v24, %v3859_v14  ;;  %v3824_v45 = vadd.f32 %v3803_v8, %v8766_v32  ;;  %v8863_v32 = vld [vmem:[%s9261_s11] ss:$0 sm:$0xff]  ;;  %v4202_v59 = vunpack.c.h.bf16 %v8892_v51  ;;  %v8900_v14 = vld [vmem:[%s7442_s30 + $0x28] sm:$0xff]  }
 0x34b   : > { %v6766_v20 = vpop.f32.mrf.mxu1  ;;  %v4203_v8 = vunpack.c.l.bf16 %v8900_v14 }
 0x34c   : > { %v3945_v19 = vadd.f32 %v8774_v39, %v3920_v49  ;;  %v3860_v15 = vadd.f32 %v3824_v45, %v8724_v46  ;;  %v3972_v48 = vpack.c.bf16 %v3962_v23, %v3961_v22  ;;  %v8868_v46 = vld [vmem:[%s9262_s12] ss:$0 sm:$0xff]  ;;  %v4710_v22 = vunpack.c.0.s8 %v4709_v43 }
 0x34e   : > { %v3921_v29 = vmul.f32 %v8764_v24, %v3860_v15  ;;  %6812 = vmatmul.mubr.bf16.gmra.mxu0 %v3972_v48  ;;  %v3963_v10 = vmax.f32 %v3945_v19, 0.0  ;;  %v4204_v48 = vunpack.c.h.bf16 %v8900_v14 }
 0x34f   : > { %6815 = vmatprep.mubr.msk.bf16.mxu0 %vm7172_vm0, %v7171_v1 }
 0x350   : > { %v3946_v5 = vadd.f32 %v8774_v39, %v3921_v29  ;;  %v4193_v39 = vunpack.c.l.bf16 %v7068_v61  ;;  %v8907_v29 = vld [vmem:[%s7442_s30 + $0x30] sm:$0xff]  }
 0x352   : > { %v3964_v0 = vmax.f32 %v3946_v5, 0.0  ;;  %v4205_v5 = vunpack.c.l.bf16 %v8907_v29 }
 0x354   : > { %v3973_v34 = vpack.c.bf16 %v3964_v0, %v3963_v10 }
 0x356   : > { %6816 = vmatmul.mubr.bf16.gmra.mxu0 %v3973_v34 }
 0x3d6   : > { %v4072_v25 = vpop.f32.mrf.mxu0 }
 0x3d7   : > { %v4150_v24 = vmul.f32 %v8863_v32, %v4072_v25 }
 0x3d8   : > { %v6785_v1 = vpop.f32.mrf.mxu0 }
 0x3d9   : > { %v4175_v6 = vadd.f32 %v8868_v46, %v4150_v24 }
 0x3da   : > { %v4075_v2 = vpop.f32.mrf.mxu0 }
 0x3db   : > { %v4151_v35 = vmul.f32 %v8863_v32, %v4075_v2  ;;  %v4211_v40 = vadd.f32 %v4193_v39, %v4175_v6  ;;  %v8913_v39 = vsub.s32 %v4710_v22, %v4270_v53 }
 0x3dc   : > { %v6786_v30 = vpop.f32.mrf.mxu0 }
 0x3dd   : > { %v4176_v54 = vadd.f32 %v8868_v46, %v4151_v35  ;;  %v4229_v55 = vmax.f32 %v4211_v40, 0.0  ;;  %v4206_v40 = vunpack.c.h.bf16 %v8907_v29 }
 0x3de   : > { %v4080_v50 = vpop.f32.mrf.mxu0 }
 0x3df   : > { %v4212_v57 = vadd.f32 %v4194_v7, %v4176_v54  ;;  %v4152_v63 = vmul.f32 %v8863_v32, %v4080_v50 }
 0x3e0   : > { %v6789_v38 = vpop.f32.mrf.mxu0 }
 0x3e1   : > { %v4230_v12 = vmax.f32 %v4212_v57, 0.0  ;;  %v4177_v52 = vadd.f32 %v8868_v46, %v4152_v63  ;;  %v8919_v63 = vld [vmem:[%s7442_s30 + $0x38] sm:$0xff]  }
 0x3e2   : > { %v4083_v41 = vpop.f32.mrf.mxu0  ;;  %v4207_v53 = vunpack.c.l.bf16 %v8919_v63 }
 0x3e3   : > { %v4247_v26 = vpack.c.bf16 %v4230_v12, %v4229_v55  ;;  %v5909_v33 = vpack.c.bf16 %v4230_v12, %v4230_v12  ;;  %v4153_v4 = vmul.f32 %v8863_v32, %v4083_v41  ;;  %v4213_v23 = vadd.f32 %v4195_v9, %v4177_v52 }
 0x3e4   : > { %v6790_v60 = vpop.f32.mrf.mxu0 }
 0x3e5   : > { %v4272_v17 = vrot.slane %v4247_v26, %v8876_v37  ;;  %v4279_v21 = vrot.slane %v5909_v33, %v8876_v37  ;;  %v4178_v28 = vadd.f32 %v8868_v46, %v4153_v4  ;;  %v4231_v6 = vmax.f32 %v4213_v23, 0.0 }
 0x3e6   : > { %v4088_v49 = vpop.f32.mrf.mxu0 }
 0x3e7   : > { %v4280_v45 = vcombine.high %v4272_v17, %v4272_v17  ;;  %v4281_v20 = vcombine.high %v4279_v21, %v4279_v21  ;;  %v4288_v19 = vrot.slane %v4272_v17, %v8876_v37  ;;  %v4295_v15 = vrot.slane %v4279_v21, %v8876_v37 }
 0x3e8   : > { %v4214_v10 = vadd.f32 %v4196_v18, %v4178_v28  ;;  %v4154_v0 = vmul.f32 %v8863_v32, %v4088_v49  ;;  %v6793_v34 = vpop.f32.mrf.mxu0 }
 0x3e9   : > { %v4302_v25 = vrot.slane %v4280_v45, %v8876_v37  ;;  %v4309_v24 = vrot.slane %v4281_v20, %v8876_v37  ;;  %v4310_v1 = vcombine.high %v4288_v19, %v4288_v19  ;;  %v4311_v61 = vcombine.high %v4295_v15, %v4295_v15 }
 0x3ea   : > { %v4232_v42 = vmax.f32 %v4214_v10, 0.0  ;;  %v4179_v47 = vadd.f32 %v8868_v46, %v4154_v0  ;;  %v4091_v3 = vpop.f32.mrf.mxu0 }
 0x3eb   : > { %v4312_v2 = vcombine.high %v4302_v25, %v4302_v25  ;;  %v4313_v7 = vcombine.high %v4309_v24, %v4309_v24  ;;  %v4706_v35 = vcombine.low %v4288_v19, %v4310_v1  ;;  %v4730_v30 = vcombine.low %v4295_v15, %v4311_v61 }
 0x3ec   : > { %v4248_v54 = vpack.c.bf16 %v4232_v42, %v4231_v6  ;;  %v5910_v27 = vpack.c.bf16 %v4232_v42, %v4232_v42  ;;  %v4155_v50 = vmul.f32 %v8863_v32, %v4091_v3  ;;  %v6794_v57 = vpop.f32.mrf.mxu0  ;;  %v4215_v12 = vadd.f32 %v4197_v31, %v4179_v47 }
 0x3ed   : > { %v4707_v38 = vcombine.low %v4302_v25, %v4312_v2  ;;  %v4731_v55 = vcombine.low %v4309_v24, %v4313_v7  ;;  %v4714_v16 = vrot.slane %v4706_v35, %v8913_v39  ;;  %v4738_v18 = vrot.slane %v4730_v30, %v8913_v39 }
 0x3ee   : > { %v4321_v9 = vrot.slane %v4248_v54, %v8876_v37  ;;  %v4328_v44 = vrot.slane %v5910_v27, %v8876_v37  ;;  %v4180_v43 = vadd.f32 %v8868_v46, %v4155_v50  ;;  %v4096_v52 = vpop.f32.mrf.mxu0  ;;  %v4233_v22 = vmax.f32 %v4215_v12, 0.0 }
 0x3ef   : > { %v4721_v41 = vrot.slane %v4707_v38, %v8913_v39  ;;  %v4745_v26 = vrot.slane %v4731_v55, %v8913_v39  ;;  %v4156_v33 = vmul.f32 %v8863_v32, %v4096_v52 }
 0x3f0   : > { %v4329_v4 = vcombine.high %v4321_v9, %v4321_v9  ;;  %v4330_v31 = vcombine.high %v4328_v44, %v4328_v44  ;;  %v4337_v60 = vrot.slane %v4321_v9, %v8876_v37  ;;  %v6797_v17 = vpop.f32.mrf.mxu0  ;;  %v4216_v23 = vadd.f32 %v4198_v56, %v4180_v43 }
 0x3f1   : > { %v4722_v21 = vcombine.low %v4714_v16, %v4721_v41  ;;  %v4746_v28 = vcombine.low %v4738_v18, %v4745_v26  ;;  %v8934_v49 = vrot.slane %v4328_v44, %v8876_v37  ;;  %v4181_v25 = vadd.f32 %v8868_v46, %v4156_v33 }
 0x3f2   : > { %v4351_v45 = vrot.slane %v4329_v4, %v8876_v37  ;;  %v4358_v20 = vrot.slane %v4330_v31, %v8876_v37  ;;  %v4359_v19 = vcombine.high %v4337_v60, %v4337_v60  ;;  %v4099_v15 = vpop.f32.mrf.mxu0  ;;  %v4760_v34 = vrot.slane %v4337_v60, %v8913_v39 }
 0x3f3   : > { %v4729_v10 = vrot.slane %v4722_v21, %v8913_v39  ;;  %v4753_v0 = vrot.slane %v4746_v28, %v8913_v39  ;;  %v4234_v1 = vmax.f32 %v4216_v23, 0.0  ;;  %v4360_v2 = vcombine.high %v8934_v49, %v8934_v49 }
 0x3f4   : > { %v4361_v62 = vcombine.high %v4351_v45, %v4351_v45  ;;  %v4362_v24 = vcombine.high %v4358_v20, %v4358_v20  ;;  %v4769_v56 = vcombine.low %v4359_v19, %v8934_v49  ;;  %v6798_v61 = vpop.f32.mrf.mxu0  ;;  %v4767_v7 = vrot.slane %v4760_v34, %v8913_v39 }
 0x3f5   : > { %v5206_v6 = vshrl.u32 %v4729_v10, 16  ;;  %v5209_v42 = vshll.u32 %v4729_v10, 16  ;;  %v5215_v47 = vshll.u32 %v4753_v0, 16  ;;  %v5219_v3 = vshrl.u32 %v4753_v0, 16 }
 0x3f6   : > { %v4768_v35 = vcombine.low %v4351_v45, %v4361_v62  ;;  %v8947_v30 = vcombine.low %v4358_v20, %v4362_v24  ;;  %v4104_v54 = vpop.f32.mrf.mxu0  ;;  %v4783_v12 = vrot.slane %v4769_v56, %v8913_v39  ;;  %v5225_v16 = vshll.u32 %v4767_v7, 16 }
 0x3f7   : > { %v5208_v27 = vrot.slane %v5206_v6, 4  ;;  %v5211_v50 = vrot.slane %v5209_v42, 5  ;;  %v5217_v57 = vrot.slane %v5215_v47, 5  ;;  %v5221_v38 = vrot.slane %v5219_v3, 4 }
 0x3f8   : > { %v4776_v55 = vrot.slane %v4768_v35, %v8913_v39  ;;  %v4249_v9 = vpack.c.bf16 %v4234_v1, %v4233_v22  ;;  %v6801_v44 = vpop.f32.mrf.mxu0  ;;  %v5911_v41 = vpack.c.bf16 %v4234_v1, %v4234_v1  ;;  %v4217_v18 = vadd.f32 %v4199_v11, %v4181_v25 }
 0x3f9   : > { %v5212_v43 = vor.u32 %v5211_v50, %v5208_v27  ;;  %v5222_v52 = vor.u32 %v5221_v38, %v5217_v57  ;;  %v4800_v4 = vrot.slane %v8947_v30, %v8913_v39  ;;  %v4157_v60 = vmul.f32 %v8863_v32, %v4099_v15 }
 0x3fa   : > { %v4784_v33 = vcombine.low %v4776_v55, %v4783_v12  ;;  %v4370_v31 = vrot.slane %v4249_v9, %v8876_v37  ;;  %v4107_v17 = vpop.f32.mrf.mxu0  ;;  %v5227_v22 = vrot.slane %v5225_v16, 5  ;;  %v4377_v11 = vrot.slane %v5911_v41, %v8876_v37 }
 0x3fb   : > { %v5213_v21 = vrot.slane %v5212_v43, 4  ;;  %v5223_v28 = vrot.slane %v5222_v52, 4  ;;  %v4182_v20 = vadd.f32 %v8868_v46, %v4157_v60  ;;  %v4158_v34 = vmul.f32 %v8863_v32, %v4104_v54 }
 0x3fc   : > { %v4791_v23 = vrot.slane %v4784_v33, %v8913_v39  ;;  %v4378_v49 = vcombine.high %v4370_v31, %v4370_v31  ;;  %v4386_v45 = vrot.slane %v4370_v31, %v8876_v37  ;;  %v6802_v19 = vpop.f32.mrf.mxu0  ;;  %v4379_v0 = vcombine.high %v4377_v11, %v4377_v11 }
 0x3fd   : > { %v5218_v10 = vsel %vm8957_vm12, %v5213_v21, %v5217_v57  ;;  %v5228_v15 = vsel %vm8957_vm12, %v5223_v28, %v5227_v22  ;;  %v4393_v61 = vrot.slane %v4377_v11, %v8876_v37  ;;  %v4218_v47 = vadd.f32 %v4200_v36, %v4182_v20 }
 0x3fe   : > { %5413 = vst [vmem:[%s8974_s22] sm:$0xf] %v5218_v10  ;;  %v5230_v25 = vshrl.u32 %v4791_v23, 16  ;;  %v5233_v62 = vshll.u32 %v4791_v23, 16  ;;  %5414 = vst [vmem:[%s8974_s22 + $0x4] sm:$0xf] %v5228_v15  ;;  %v4400_v24 = vrot.slane %v4378_v49, %v8876_v37  ;;  %v4408_v56 = vcombine.high %v4386_v45, %v4386_v45  ;;  %v4112_v1 = vpop.f32.mrf.mxu0 }
 0x3ff   : > { %v4407_v6 = vrot.slane %v4379_v0, %v8876_v37  ;;  %v4793_v42 = vcombine.low %v4360_v2, %v4386_v45  ;;  %v4235_v57 = vmax.f32 %v4217_v18, 0.0  ;;  %v4236_v38 = vmax.f32 %v4218_v47, 0.0 }
 0x400   : > { %v5232_v3 = vrot.slane %v5230_v25, 4  ;;  %v5235_v7 = vrot.slane %v5233_v62, 5  ;;  %v4410_v35 = vcombine.high %v4400_v24, %v4400_v24  ;;  %v4822_v30 = vrot.slane %v4400_v24, %v8913_v39  ;;  %v6805_v54 = vpop.f32.mrf.mxu0 }
 0x401   : > { %v4807_v27 = vrot.slane %v4793_v42, %v8913_v39  ;;  %v4830_v50 = vcombine.low %v4408_v56, %v4393_v61  ;;  %v4183_v2 = vadd.f32 %v8868_v46, %v4158_v34  ;;  %v4409_v58 = vcombine.high %v4393_v61, %v4393_v61 }
 0x402   : > { %v5236_v55 = vor.u32 %v5235_v7, %v5232_v3  ;;  %v4829_v12 = vrot.slane %v4822_v30, %v8913_v39  ;;  %v4831_v16 = vcombine.low %v4410_v35, %v4407_v6  ;;  %v8987_v9 = vpop.f32.mrf.mxu0  ;;  %v4250_v44 = vpack.c.bf16 %v4236_v38, %v4235_v57 }
 0x403   : > { %v4808_v36 = vcombine.low %v4800_v4, %v4807_v27  ;;  %v5912_v43 = vpack.c.bf16 %v4236_v38, %v4236_v38  ;;  %v4411_v52 = vcombine.high %v4407_v6, %v4407_v6  ;;  %v4838_v41 = vrot.slane %v4830_v50, %v8913_v39 }
 0x404   : > { %v4845_v33 = vrot.slane %v4831_v16, %v8913_v39  ;;  %v5249_v31 = vshll.u32 %v4829_v12, 16  ;;  %v6806_v18 = vpop.f32.mrf.mxu0  ;;  %v4419_v21 = vrot.slane %v4250_v44, %v8876_v37  ;;  %v4159_v22 = vmul.f32 %v8863_v32, %v4107_v17 }
 0x405   : > { %v4815_v60 = vrot.slane %v4808_v36, %v8913_v39  ;;  %v4426_v28 = vrot.slane %v5912_v43, %v8876_v37  ;;  %v5237_v11 = vrot.slane %v5236_v55, 4  ;;  %v4219_v49 = vadd.f32 %v4201_v13, %v4183_v2 }
 0x406   : > { %v4846_v23 = vcombine.low %v4838_v41, %v4845_v33  ;;  %v5251_v4 = vrot.slane %v5249_v31, 5  ;;  %v4120_v45 = vpop.f32.mrf.mxu0  ;;  %v4427_v10 = vcombine.high %v4419_v21, %v4419_v21  ;;  %v4435_v34 = vrot.slane %v4419_v21, %v8876_v37 }
 0x407   : > { %v5239_v20 = vshll.u32 %v4815_v60, 16  ;;  %v5243_v19 = vshrl.u32 %v4815_v60, 16  ;;  %v4428_v15 = vcombine.high %v4426_v28, %v4426_v28  ;;  %v4442_v25 = vrot.slane %v4426_v28, %v8876_v37 }
 0x408   : > { %v4853_v0 = vrot.slane %v4846_v23, %v8913_v39  ;;  %v4160_v62 = vmul.f32 %v8863_v32, %v4112_v1  ;;  %v6809_v17 = vpop.f32.mrf.mxu0  ;;  %v4449_v61 = vrot.slane %v4427_v10, %v8876_v37  ;;  %v4184_v13 = vadd.f32 %v8868_v46, %v4159_v22 }
 0x409   : > { %v5241_v24 = vrot.slane %v5239_v20, 5  ;;  %v5245_v56 = vrot.slane %v5243_v19, 4  ;;  %v4457_v47 = vcombine.high %v4435_v34, %v4435_v34  ;;  %v4458_v3 = vcombine.high %v4442_v25, %v4442_v25 }
 0x40a   : > { %v5254_v6 = vshrl.u32 %v4853_v0, 16  ;;  %v5257_v42 = vshll.u32 %v4853_v0, 16  ;;  %v9003_v7 = vpop.f32.mrf.mxu0  ;;  %v9008_v1 = vrot.slane %v4428_v15, %v8876_v37  ;;  %v4459_v54 = vcombine.high %v4449_v61, %v4449_v61 }
 0x40b   : > { %v5242_v35 = vsel %vm8957_vm12, %v5237_v11, %v5241_v24  ;;  %v5246_v30 = vor.u32 %v5245_v56, %v5241_v24  ;;  %v4854_v57 = vcombine.low %v4409_v58, %v4435_v34  ;;  %v4855_v38 = vcombine.low %v4411_v52, %v4449_v61 }
 0x40c   : > { %v5256_v27 = vrot.slane %v5254_v6, 4  ;;  %v5259_v50 = vrot.slane %v5257_v42, 5  ;;  %5415 = vst [vmem:[%s8974_s22 + $0x8] sm:$0xf] %v5242_v35  ;;  %v6810_v55 = vpop.f32.mrf.mxu0  ;;  %v4884_v16 = vrot.slane %v4457_v47, %v8913_v39  ;;  %v4892_v2 = vcombine.low %v4459_v54, %v9008_v1 }
 0x40d   : > { %v5247_v12 = vrot.slane %v5246_v30, 4  ;;  %v4893_v36 = vcombine.low %v4442_v25, %v4458_v3  ;;  %v4862_v43 = vrot.slane %v4854_v57, %v8913_v39  ;;  %v4869_v41 = vrot.slane %v4855_v38, %v8913_v39 }
 0x40e   : > { %v5260_v44 = vor.u32 %v5259_v50, %v5256_v27  ;;  %v4220_v33 = vadd.f32 %v4202_v59, %v4184_v13  ;;  %v9017_v31 = vpop.f32.mrf.mxu0  ;;  %v4891_v52 = vrot.slane %v4884_v16, %v8913_v39  ;;  %v4900_v18 = vrot.slane %v4892_v2, %v8913_v39 }
 0x40f   : > { %v5252_v58 = vsel %vm8957_vm12, %v5247_v12, %v5251_v4  ;;  %v4907_v60 = vrot.slane %v4893_v36, %v8913_v39  ;;  %v4870_v21 = vcombine.low %v4862_v43, %v4869_v41  ;;  %v4237_v28 = vmax.f32 %v4219_v49, 0.0 }
 0x410   : > { %5416 = vst [vmem:[%s8974_s22 + $0xc] sm:$0xf] %v5252_v58  ;;  %v4238_v22 = vmax.f32 %v4220_v33, 0.0  ;;  %v4185_v11 = vadd.f32 %v8868_v46, %v4160_v62  ;;  %v6813_v23 = vpop.f32.mrf.mxu0  ;;  %v4460_v51 = vcombine.high %v9008_v1, %v9008_v1  ;;  %v5273_v20 = vshll.u32 %v4891_v52, 16 }
 0x411   : > { %v4908_v59 = vcombine.low %v4900_v18, %v4907_v60  ;;  %v4161_v4 = vmul.f32 %v8863_v32, %v8987_v9  ;;  %v5261_v19 = vrot.slane %v5260_v44, 4  ;;  %v4877_v10 = vrot.slane %v4870_v21, %v8913_v39 }
 0x412   : > { %v4251_v15 = vpack.c.bf16 %v4238_v22, %v4237_v28  ;;  %v5913_v0 = vpack.c.bf16 %v4238_v22, %v4238_v22  ;;  %v9031_v34 = vpop.f32.mrf.mxu0  ;;  %v4221_v25 = vadd.f32 %v4203_v8, %v4185_v11  ;;  %v4162_v17 = vmul.f32 %v8863_v32, %v4120_v45 }
 0x413   : > { %v4915_v49 = vrot.slane %v4908_v59, %v8913_v39  ;;  %v4186_v62 = vadd.f32 %v8868_v46, %v4161_v4  ;;  %v5263_v24 = vshll.u32 %v4877_v10, 16  ;;  %v5267_v56 = vshrl.u32 %v4877_v10, 16 }
 0x414   : > { %v4468_v9 = vrot.slane %v4251_v15, %v8876_v37  ;;  %v4475_v61 = vrot.slane %v5913_v0, %v8876_v37  ;;  %v6814_v13 = vpop.f32.mrf.mxu0  ;;  %v5275_v6 = vrot.slane %v5273_v20, 5  ;;  %v4239_v36 = vmax.f32 %v4221_v25, 0.0 }
 0x415   : > { %v5278_v42 = vshrl.u32 %v4915_v49, 16  ;;  %v5281_v47 = vshll.u32 %v4915_v49, 16  ;;  %v4222_v3 = vadd.f32 %v4204_v48, %v4186_v62  ;;  %v5265_v35 = vrot.slane %v5263_v24, 5 }
 0x416   : > { %v5269_v8 = vrot.slane %v5267_v56, 4  ;;  %v4476_v30 = vcombine.high %v4468_v9, %v4468_v9  ;;  %v4477_v1 = vcombine.high %v4475_v61, %v4475_v61  ;;  %v9042_v54 = vpop.f32.mrf.mxu0  ;;  %v4484_v50 = vrot.slane %v4468_v9, %v8876_v37 }
 0x417   : > { %v5280_v45 = vrot.slane %v5278_v42, 4  ;;  %v5283_v27 = vrot.slane %v5281_v47, 5  ;;  %v4491_v57 = vrot.slane %v4475_v61, %v8876_v37  ;;  %v5266_v38 = vsel %vm8957_vm12, %v5261_v19, %v5265_v35 }
 0x418   : > { %v5270_v55 = vor.u32 %v5269_v8, %v5265_v35  ;;  %v4498_v14 = vrot.slane %v4476_v30, %v8876_v37  ;;  %v4505_v48 = vrot.slane %v4477_v1, %v8876_v37  ;;  %v6817_v12 = vpop.f32.mrf.mxu0  ;;  %5417 = vst [vmem:[%s8974_s22 + $0x10] sm:$0xf] %v5266_v38  ;;  %v4506_v16 = vcombine.high %v4484_v50, %v4484_v50 }
 0x419   : > { %v4507_v2 = vcombine.high %v4491_v57, %v4491_v57  ;;  %v4240_v44 = vmax.f32 %v4222_v3, 0.0  ;;  %v5284_v18 = vor.u32 %v5283_v27, %v5280_v45  ;;  %v4187_v10 = vadd.f32 %v8868_v46, %v4162_v17 }
 0x41a   : > { %v5271_v43 = vrot.slane %v5270_v55, 4  ;;  %v4508_v41 = vcombine.high %v4498_v14, %v4498_v14  ;;  %v4509_v33 = vcombine.high %v4505_v48, %v4505_v48  ;;  %v4916_v58 = vcombine.low %v4460_v51, %v4498_v14  ;;  %v9051_v52 = vpop.f32.mrf.mxu0 }
 0x41b   : > { %v4917_v60 = vcombine.low %v4484_v50, %v4506_v16  ;;  %v4954_v21 = vcombine.low %v4491_v57, %v4507_v2  ;;  %v4252_v28 = vpack.c.bf16 %v4240_v44, %v4239_v36  ;;  %v5914_v19 = vpack.c.bf16 %v4240_v44, %v4240_v44 }
 0x41c   : > { %v5276_v22 = vsel %vm8957_vm12, %v5271_v43, %v5275_v6  ;;  %v4924_v11 = vrot.slane %v4916_v58, %v8913_v39  ;;  %v4946_v23 = vrot.slane %v4508_v41, %v8913_v39  ;;  %v4955_v59 = vcombine.low %v4505_v48, %v4509_v33  ;;  %v6818_v20 = vpop.f32.mrf.mxu0 }
 0x41d   : > { %5418 = vst [vmem:[%s8974_s22 + $0x14] sm:$0xf] %v5276_v22  ;;  %v4931_v4 = vrot.slane %v4917_v60, %v8913_v39  ;;  %v4517_v51 = vrot.slane %v4252_v28, %v8876_v37  ;;  %v4962_v0 = vrot.slane %v4954_v21, %v8913_v39  ;;  %v4163_v25 = vmul.f32 %v8863_v32, %v9003_v7  ;;  %v9094_v20 = vld [vmem:[%s7442_s30 + $0x40] sm:$0xff]   ;;  %s9303_s30 = sld [smem:[#allocation9_spill]] }
 0x41e   : > { %v4953_v15 = vrot.slane %v4946_v23, %v8913_v39  ;;  %v4969_v49 = vrot.slane %v4955_v59, %v8913_v39  ;;  %v4524_v24 = vrot.slane %v5914_v19, %v8876_v37  ;;  %v4208_v61 = vunpack.c.h.bf16 %v8919_v63 }
 0x41f   : > { %v4932_v62 = vcombine.low %v4924_v11, %v4931_v4  ;;  %v4525_v56 = vcombine.high %v4517_v51, %v4517_v51  ;;  %v4533_v9 = vrot.slane %v4517_v51, %v8876_v37  ;;  %v5285_v13 = vrot.slane %v5284_v18, 4 }
 0x420   : > { %v4970_v6 = vcombine.low %v4962_v0, %v4969_v49  ;;  %v4188_v17 = vadd.f32 %v8868_v46, %v4163_v25  ;;  %v4526_v47 = vcombine.high %v4524_v24, %v4524_v24  ;;  %v9072_v3 = vrot.slane %v4524_v24, %v8876_v37 }
 0x421   : > { %v4939_v42 = vrot.slane %v4932_v62, %v8913_v39  ;;  %v4547_v7 = vrot.slane %v4525_v56, %v8876_v37  ;;  %v5297_v8 = vshll.u32 %v4953_v15, 16  ;;  %v4555_v30 = vcombine.high %v4533_v9, %v4533_v9 }
 0x422   : > { %v4977_v35 = vrot.slane %v4970_v6, %v8913_v39  ;;  %v4223_v1 = vadd.f32 %v4205_v5, %v4187_v10  ;;  %v4554_v50 = vrot.slane %v4526_v47, %v8876_v37  ;;  %v4224_v57 = vadd.f32 %v4206_v40, %v4188_v17 }
 0x423   : > { %v5287_v45 = vshll.u32 %v4939_v42, 16  ;;  %v5291_v27 = vshrl.u32 %v4939_v42, 16  ;;  %v4557_v14 = vcombine.high %v4547_v7, %v4547_v7  ;;  %v4978_v48 = vcombine.low %v4533_v9, %v4555_v30  ;;  %s5921_s24 = sshll.u32 %s9303_s30, 5 }
 0x424   : > { %v5302_v38 = vshrl.u32 %v4977_v35, 16  ;;  %v5305_v55 = vshll.u32 %v4977_v35, 16  ;;  %v4558_v2 = vcombine.high %v4554_v50, %v4554_v50  ;;  %v5008_v36 = vrot.slane %v9072_v3, %v8913_v39  ;;  %s5443_s16 = sadd.s32 %s5951_s17, %s5921_s24 }
 0x425   : > { %v5289_v12 = vrot.slane %v5287_v45, 5  ;;  %v5293_v16 = vrot.slane %v5291_v27, 4  ;;  %v4979_v43 = vcombine.low %v4547_v7, %v4557_v14  ;;  %v4241_v41 = vmax.f32 %v4223_v1, 0.0  ;;  %s5922_s15 = sshll.u32 %s5443_s16, 6 }
 0x426   : > { %v5304_v44 = vrot.slane %v5302_v38, 4  ;;  %v5307_v5 = vrot.slane %v5305_v55, 5  ;;  %v5299_v33 = vrot.slane %v5297_v8, 5  ;;  %v5015_v58 = vrot.slane %v5008_v36, %v8913_v39  ;;  %s9189_s2 = scalar_lea.hbm %s9305_s13, %s5922_s15 }
 0x427   : > { %v5290_v29 = vsel %vm8957_vm12, %v5285_v13, %v5289_v12  ;;  %v5294_v40 = vor.u32 %v5293_v16, %v5289_v12  ;;  %v4986_v18 = vrot.slane %v4978_v48, %v8913_v39  ;;  %v4993_v60 = vrot.slane %v4979_v43, %v8913_v39 }
 0x428   : > { %5419 = vst [vmem:[%s8974_s22 + $0x18] sm:$0xf] %v5290_v29  ;;  %v4242_v21 = vmax.f32 %v4224_v57, 0.0  ;;  %v4164_v28 = vmul.f32 %v8863_v32, %v9017_v31  ;;  %v5308_v11 = vor.u32 %v5307_v5, %v5304_v44  ;;  %v5016_v23 = vcombine.low %v4554_v50, %v4558_v2 }
 0x429   : > { %v5295_v22 = vrot.slane %v5294_v40, 4  ;;  %v4165_v59 = vmul.f32 %v8863_v32, %v9031_v34  ;;  %v4209_v4 = vunpack.c.l.bf16 %v9094_v20  ;;  %v4994_v19 = vcombine.low %v4986_v18, %v4993_v60 }
 0x42a   : > { %v4253_v51 = vpack.c.bf16 %v4242_v21, %v4241_v41  ;;  %v5915_v10 = vpack.c.bf16 %v4242_v21, %v4242_v21  ;;  %v5321_v0 = vshll.u32 %v5015_v58, 16  ;;  %v4189_v49 = vadd.f32 %v8868_v46, %v4164_v28 }
 0x42b   : > { %v5300_v15 = vsel %vm8957_vm12, %v5295_v22, %v5299_v33  ;;  %v4190_v31 = vadd.f32 %v8868_v46, %v4165_v59  ;;  %v4556_v25 = vcombine.high %v9072_v3, %v9072_v3  ;;  %v5001_v34 = vrot.slane %v4994_v19, %v8913_v39 }
 0x42c   : > { %5420 = vst [vmem:[%s8974_s22 + $0x1c] sm:$0xf] %v5300_v15  ;;  %v4566_v62 = vrot.slane %v4253_v51, %v8876_v37  ;;  %v4573_v24 = vrot.slane %v5915_v10, %v8876_v37  ;;  %v5309_v56 = vrot.slane %v5308_v11, 4  ;;  %v5024_v9 = vrot.slane %v5016_v23, %v8913_v39 }
 0x42d   : > { %v4225_v13 = vadd.f32 %v4207_v53, %v4189_v49  ;;  %v4226_v6 = vadd.f32 %v4208_v61, %v4190_v31  ;;  %v5311_v17 = vshll.u32 %v5001_v34, 16  ;;  %v5315_v42 = vshrl.u32 %v5001_v34, 16 }
 0x42e   : > { %v4574_v47 = vcombine.high %v4566_v62, %v4566_v62  ;;  %v4575_v7 = vcombine.high %v4573_v24, %v4573_v24  ;;  %v5323_v35 = vrot.slane %v5321_v0, 5  ;;  %v4582_v3 = vrot.slane %v4566_v62, %v8876_v37 }
 0x42f   : > { %v4243_v8 = vmax.f32 %v4225_v13, 0.0  ;;  %v4244_v30 = vmax.f32 %v4226_v6, 0.0  ;;  %v5313_v1 = vrot.slane %v5311_v17, 5  ;;  %v5317_v45 = vrot.slane %v5315_v42, 4 }
 0x430   : > { %v4589_v27 = vrot.slane %v4573_v24, %v8876_v37  ;;  %v4596_v50 = vrot.slane %v4574_v47, %v8876_v37  ;;  %v4603_v63 = vrot.slane %v4575_v7, %v8876_v37  ;;  %v4604_v53 = vcombine.high %v4582_v3, %v4582_v3 }
 0x431   : > { %v5017_v61 = vcombine.low %v4556_v25, %v4582_v3  ;;  %v4254_v57 = vpack.c.bf16 %v4244_v30, %v4243_v8  ;;  %v5314_v38 = vsel %vm8957_vm12, %v5309_v56, %v5313_v1  ;;  %v5318_v55 = vor.u32 %v5317_v45, %v5313_v1 }
 0x432   : > { %v4606_v14 = vcombine.high %v4596_v50, %v4596_v50  ;;  %v4166_v48 = vmul.f32 %v8863_v32, %v9042_v54  ;;  %5421 = vst [vmem:[%s8974_s22 + $0x20] sm:$0xf] %v5314_v38  ;;  %v5041_v16 = vcombine.low %v4604_v53, %v4589_v27  ;;  %v5916_v2 = vpack.c.bf16 %v4244_v30, %v4244_v30 }
 0x433   : > { %v5031_v12 = vrot.slane %v5017_v61, %v8913_v39  ;;  %v4167_v36 = vmul.f32 %v8863_v32, %v9051_v52  ;;  %v5319_v44 = vrot.slane %v5318_v55, 4  ;;  %v4605_v5 = vcombine.high %v4589_v27, %v4589_v27 }
 0x434   : > { %v5040_v43 = vcombine.low %v4596_v50, %v4606_v14  ;;  %v4615_v41 = vrot.slane %v4254_v57, %v8876_v37  ;;  %v5055_v40 = vrot.slane %v5041_v16, %v8913_v39  ;;  %v5070_v33 = vrot.slane %v4603_v63, %v8913_v39 }
 0x435   : > { %v5032_v29 = vcombine.low %v5024_v9, %v5031_v12  ;;  %v4622_v54 = vrot.slane %v5916_v2, %v8876_v37  ;;  %v5324_v58 = vsel %vm8957_vm12, %v5319_v44, %v5323_v35  ;;  %v4607_v52 = vcombine.high %v4603_v63, %v4603_v63 }
 0x436   : > { %v5048_v18 = vrot.slane %v5040_v43, %v8913_v39  ;;  %v4623_v60 = vcombine.high %v4615_v41, %v4615_v41  ;;  %v4631_v32 = vrot.slane %v4615_v41, %v8876_v37  ;;  %5422 = vst [vmem:[%s8974_s22 + $0x24] sm:$0xf] %v5324_v58  ;;  %v5077_v51 = vrot.slane %v5070_v33, %v8913_v39 }
 0x437   : > { %v5039_v21 = vrot.slane %v5032_v29, %v8913_v39  ;;  %v4624_v28 = vcombine.high %v4622_v54, %v4622_v54  ;;  %v4638_v22 = vrot.slane %v4622_v54, %v8876_v37  ;;  %v4191_v0 = vadd.f32 %v8868_v46, %v4166_v48 }
 0x438   : > { %v5056_v11 = vcombine.low %v5048_v18, %v5055_v40  ;;  %v4645_v23 = vrot.slane %v4623_v60, %v8876_v37  ;;  %v4653_v59 = vcombine.high %v4631_v32, %v4631_v32  ;;  %v5078_v19 = vcombine.low %v4605_v5, %v4631_v32 }
 0x439   : > { %v5326_v10 = vshrl.u32 %v5039_v21, 16  ;;  %v5329_v15 = vshll.u32 %v5039_v21, 16  ;;  %v4654_v31 = vcombine.high %v4638_v22, %v4638_v22  ;;  %v9138_v56 = vrot.slane %v4624_v28, %v8876_v37 }
 0x43a   : > { %v5063_v49 = vrot.slane %v5056_v11, %v8913_v39  ;;  %v4655_v25 = vcombine.high %v4645_v23, %v4645_v23  ;;  %v5079_v34 = vcombine.low %v4607_v52, %v4645_v23  ;;  %v5086_v9 = vrot.slane %v5078_v19, %v8913_v39 }
 0x43b   : > { %v5328_v62 = vrot.slane %v5326_v10, 4  ;;  %v5331_v24 = vrot.slane %v5329_v15, 5  ;;  %v5102_v42 = vcombine.low %v4653_v59, %v4638_v22  ;;  %v4210_v47 = vunpack.c.h.bf16 %v9094_v20 }
 0x43c   : > { %v5335_v13 = vshll.u32 %v5063_v49, 16  ;;  %v5339_v6 = vshrl.u32 %v5063_v49, 16  ;;  %v5093_v17 = vrot.slane %v5079_v34, %v8913_v39  ;;  %v5345_v35 = vshll.u32 %v5077_v51, 16 }
 0x43d   : > { %v5332_v7 = vor.u32 %v5331_v24, %v5328_v62  ;;  %v5103_v3 = vcombine.low %v4655_v25, %v9138_v56  ;;  %v5132_v45 = vrot.slane %v4654_v31, %v8913_v39  ;;  %v5110_v50 = vrot.slane %v5102_v42, %v8913_v39 }
 0x43e   : > { %v5337_v8 = vrot.slane %v5335_v13, 5  ;;  %v5341_v30 = vrot.slane %v5339_v6, 4  ;;  %v5094_v1 = vcombine.low %v5086_v9, %v5093_v17  ;;  %v4227_v53 = vadd.f32 %v4209_v4, %v4191_v0 }
 0x43f   : > { %v5333_v27 = vrot.slane %v5332_v7, 4  ;;  %v5117_v63 = vrot.slane %v5103_v3, %v8913_v39  ;;  %v4192_v38 = vadd.f32 %v8868_v46, %v4167_v36  ;;  %v5347_v14 = vrot.slane %v5345_v35, 5 }
 0x440   : > { %v5342_v61 = vor.u32 %v5341_v30, %v5337_v8  ;;  %v5101_v57 = vrot.slane %v5094_v1, %v8913_v39  ;;  %v5139_v20 = vrot.slane %v5132_v45, %v8913_v39  ;;  %v4245_v4 = vmax.f32 %v4227_v53, 0.0 }
 0x441   : > { %v5338_v55 = vsel %vm8957_vm12, %v5333_v27, %v5337_v8  ;;  %v5118_v48 = vcombine.low %v5110_v50, %v5117_v63  ;;  %v4228_v44 = vadd.f32 %v4210_v47, %v4192_v38  ;;  %v4656_v0 = vcombine.high %v9138_v56, %v9138_v56 }
 0x442   : > { %v5343_v12 = vrot.slane %v5342_v61, 4  ;;  %5423 = vst [vmem:[%s8974_s22 + $0x28] sm:$0xf] %v5338_v55  ;;  %v5350_v16 = vshrl.u32 %v5101_v57, 16  ;;  %v5353_v2 = vshll.u32 %v5101_v57, 16  ;;  %v5369_v32 = vshll.u32 %v5139_v20, 16 }
 0x443   : > { %v5125_v5 = vrot.slane %v5118_v48, %v8913_v39  ;;  %v4246_v41 = vmax.f32 %v4228_v44, 0.0 }
 0x444   : > { %v5348_v43 = vsel %vm8957_vm12, %v5343_v12, %v5347_v14  ;;  %v5352_v46 = vrot.slane %v5350_v16, 4  ;;  %v5355_v36 = vrot.slane %v5353_v2, 5  ;;  %v5371_v10 = vrot.slane %v5369_v32, 5 }
 0x445   : > { %5424 = vst [vmem:[%s8974_s22 + $0x2c] sm:$0xf] %v5348_v43  ;;  %v5359_v29 = vshll.u32 %v5125_v5, 16  ;;  %v5363_v40 = vshrl.u32 %v5125_v5, 16  ;;  %v4255_v54 = vpack.c.bf16 %v4246_v41, %v4245_v4  ;;  %v5917_v58 = vpack.c.bf16 %v4246_v41, %v4246_v41 }
 0x446   : > { %v5356_v33 = vor.u32 %v5355_v36, %v5352_v46 }
 0x447   : > { %v5361_v18 = vrot.slane %v5359_v29, 5  ;;  %v5365_v60 = vrot.slane %v5363_v40, 4  ;;  %v4664_v21 = vrot.slane %v4255_v54, %v8876_v37  ;;  %v4671_v28 = vrot.slane %v5917_v58, %v8876_v37 }
 0x448   : > { %v5357_v52 = vrot.slane %v5356_v33, 4 }
 0x449   : > { %v5366_v22 = vor.u32 %v5365_v60, %v5361_v18  ;;  %v4672_v23 = vcombine.high %v4664_v21, %v4664_v21  ;;  %v4673_v59 = vcombine.high %v4671_v28, %v4671_v28  ;;  %v4680_v19 = vrot.slane %v4664_v21, %v8876_v37 }
 0x44a   : > { %v5362_v11 = vsel %vm8957_vm12, %v5357_v52, %v5361_v18  ;;  %v4687_v15 = vrot.slane %v4671_v28, %v8876_v37 }
 0x44b   : > { %v5367_v51 = vrot.slane %v5366_v22, 4  ;;  %5425 = vst [vmem:[%s8974_s22 + $0x30] sm:$0xf] %v5362_v11  ;;  %v4694_v49 = vrot.slane %v4672_v23, %v8876_v37  ;;  %v4701_v31 = vrot.slane %v4673_v59, %v8876_v37  ;;  %v4702_v25 = vcombine.high %v4680_v19, %v4680_v19 }
 0x44c   : > { %v4703_v62 = vcombine.high %v4687_v15, %v4687_v15 }
 0x44d   : > { %v5372_v34 = vsel %vm8957_vm12, %v5367_v51, %v5371_v10  ;;  %v4704_v24 = vcombine.high %v4694_v49, %v4694_v49  ;;  %v4705_v9 = vcombine.high %v4701_v31, %v4701_v31  ;;  %v5140_v13 = vcombine.low %v4656_v0, %v4694_v49 }
 0x44e   : > { %5426 = vst [vmem:[%s8974_s22 + $0x34] sm:$0xf] %v5372_v34  ;;  %v5141_v6 = vcombine.low %v4680_v19, %v4702_v25  ;;  %v5165_v17 = vcombine.low %v4687_v15, %v4703_v62 }
 0x44f   : > { %v5148_v42 = vrot.slane %v5140_v13, %v8913_v39  ;;  %v5164_v47 = vcombine.low %v4704_v24, %v4701_v31  ;;  %v5194_v3 = vrot.slane %v4705_v9, %v8913_v39 }
 0x450   : > { %v5155_v56 = vrot.slane %v5141_v6, %v8913_v39  ;;  %v5179_v35 = vrot.slane %v5165_v17, %v8913_v39 }
 0x451   : > { %v5172_v37 = vrot.slane %v5164_v47, %v8913_v39  ;;  %v5201_v45 = vrot.slane %v5194_v3, %v8913_v39 }
 0x452   : > { %v5156_v7 = vcombine.low %v5148_v42, %v5155_v56 }
 0x453   : > { %v5180_v30 = vcombine.low %v5172_v37, %v5179_v35  ;;  %v5393_v48 = vshll.u32 %v5201_v45, 16 }
 0x454   : > { %v5163_v8 = vrot.slane %v5156_v7, %v8913_v39 }
 0x455   : > { %v5187_v1 = vrot.slane %v5180_v30, %v8913_v39  ;;  %v5395_v44 = vrot.slane %v5393_v48, 5 }
 0x456   : > { %v5374_v27 = vshrl.u32 %v5163_v8, 16  ;;  %v5377_v50 = vshll.u32 %v5163_v8, 16 }
 0x457   : > { %v5383_v61 = vshll.u32 %v5187_v1, 16  ;;  %v5387_v57 = vshrl.u32 %v5187_v1, 16 }
 0x458   : > { %v5376_v63 = vrot.slane %v5374_v27, 4  ;;  %v5379_v53 = vrot.slane %v5377_v50, 5 }
 0x459   : > { %v5385_v55 = vrot.slane %v5383_v61, 5  ;;  %v5389_v14 = vrot.slane %v5387_v57, 4 }
 0x45a   : > { %v5380_v38 = vor.u32 %v5379_v53, %v5376_v63 }
 0x45b   : > { %v5390_v16 = vor.u32 %v5389_v14, %v5385_v55 }
 0x45c   : > { %v5381_v12 = vrot.slane %v5380_v38, 4 }
 0x45d   : > { %v5391_v2 = vrot.slane %v5390_v16, 4 }
 0x45e   : > { %v5386_v39 = vsel %vm8957_vm12, %v5381_v12, %v5385_v55 }
 0x45f   : > { %5427 = vst [vmem:[%s8974_s22 + $0x38] sm:$0xf] %v5386_v39  ;;  %v5396_v5 = vsel %vm8957_vm12, %v5391_v2, %v5395_v44 }
 0x460   : > { %5428 = vst [vmem:[%s8974_s22 + $0x3c] sm:$0xf] %v5396_v5 }
 0x461   : > { %7090 = shalt.err (!%p7087_p13)
}
 0x462   : > { %s7091_s25 = scalar_lea.hbm %s9189_s2, 1024  ;;  %s7095_s17 = scalar_lea.hbm %s9305_s13, 4096 }
 0x463   : > { %p7092_p0 = scmp.ne.s32.totalorder %s9189_s2, %s7091_s25  ;;  %p7096_p4 = scmp.lt.s32.totalorder %s9189_s2, %s9305_s13 }
 0x464   : > { %p7097_p5 = scmp.lt.s32.totalorder %s7095_s17, %s7091_s25 }
 0x465   : > { %p7093_p1 = pnand %p7092_p0, %p7300_p3 }
 0x466   : > { %p7098_p6 = por %p7097_p5, %p7096_p4 }
 0x467   : > { %p7094_p2 = pneg %p7093_p1 }
 0x469   : > { %p7099_p7 = pnand %p7098_p6, %p7094_p2 }
 0x46b   : > { %7102 = shalt.err (!%p7099_p7)
}
 0x46c   : > { %s7177_s15 = smov 64   ;;  %s7178_s14 = smov 4  }
 0x46d   : > { %6823 = dma.vmem_to_hbm [thread:$0]  (%p7300_p3), %s9191_s18, 1024, %s9189_s2, %s9199_s20, %s7177_s15, %s7177_s15, %s7178_s14  }
 0x46e PF: > { %s9306_s19 = sld [smem:[#allocation12_spill]] }
 0x46f   : > { %s9307_s21 = sld [smem:[#allocation7_spill]] }
 0x474   : > { %p6829_p9 = scmp.ge.s32.totalorder %s9306_s19, 2 }
 0x475   : > { %s5461_s23 = sand.u32 1, %s9307_s21  }
 0x476   : > { %p6826_p10 = pnand %p6829_p9, %p7309_p8  ;;  %s5462_s27 = scalar_lea.sflag [#allocation5], %s5461_s23 }
 0x478   : > { %p6827_p11 = pneg %p6826_p10 }
 0x47a   : > { %7136 = dma.done.wait (%p6827_p11), %s5462_s27, 1024  }
 0x47b   : > { %7138 = vsyncadd (%p6827_p11), %s5462_s27, 4294966272  ;;  %s26_s15 = sadd.s32 1, %s9306_s19   ;;  %s9309_s22 = sld [smem:[#allocation8_spill]] }
 0x47c   : > { %p23_p12 = scmp.ge.s32.totalorder %s26_s15, 6   ;;  %s9310_s27 = sld [smem:[#allocation17_spill]] }
 0x47d   : > { %s9311_s28 = sld [smem:[#allocation10_spill]]  ;;  %s9315_s25 = smov %s7145_s26 }
 0x47e   : > { %s9312_s29 = sld [smem:[#allocation11_spill]]  ;;  %25 = sbr.rel (!%p23_p12) target bundleno = 8 (0x8), region = 121 }
 0x47f   : > { %s9313_s30 = sld [smem:[#allocation13_spill]] }
 0x480   : > { %s9314_s14 = sld [smem:[#allocation15_spill]] }
 0x481   : > { %s9316_s26 = smov %s9309_s22 }
 0x483   :  { %5467 = vsyncpa [#allocation5], 1 }
 0x484   :  { %5469 = vsyncpa [#allocation5 + $0x1], 1 }

</bundles_post_ra>
